<compile_context>
chip_gen: v7x
topology: tpu7x:2x2x1
jax: 0.10.0
libtpu: 0.0.40
codegen_flags: <defaults>
</compile_context>

<pallas_src>
import functools

import jax
import jax.numpy as jnp
from jax.experimental import pallas as pl
from jax.experimental.pallas import tpu as pltpu


# ----------------------------- fused Pallas kernel ---------------------------

def _film_fused_kernel(
    x0_ref,       # (N*H, W*Cin)          bf16  input, NHWC flattened
    h_ref,        # (N, BG)               bf16  question embedding
    wfirst_ref,   # (W*Cin, W*C)          bf16  block-diag first 1x1 conv
    fbnw_ref,     # (1, W*C)              f32   first BN weight (tiled over w)
    fbnb_ref,     # (1, W*C)              f32   first BN bias   (tiled over w)
    mask_ref,     # (KH, N*H, 1)          f32   conv2 H-tap boundary masks
    fcw_ref,      # (BG, nb*2*W*C)        bf16  film_fc weight, W-pre-tiled
    fcb_ref,      # (1, nb*2*W*C)         f32   film_fc bias,   W-pre-tiled
    p1_ref,       # (nb, H, W*C)          f32   pos-enc + bias for block conv1
    w1bd_ref,     # (nb, W*C, W*C)        bf16  block-diag block conv1 (1x1)
    b2_ref,       # (nb*KH, W*C, W*C)     bf16  banded block conv2 (KxK same)
    bnw_ref,      # (nb, 1, W*C)          f32   block BN weight (tiled over w)
    bnb_ref,      # (nb, 1, W*C)          f32   block BN bias   (tiled over w)
    blast_ref,    # (KHo, W*C, LCO)       bf16  banded last conv (lane-padded)
    plast_ref,    # (H, LCO)              f32   pos-enc + bias for last conv
    out_ref,      # (N*H, LCO)            f32   full-row-space output
    *, n_blocks, res_kh, out_kh, n, h_sz, w_sz, c_sz, inv_m, eps):
  f32 = jnp.float32
  bf16 = jnp.bfloat16
  NH = n * h_sz
  WC = w_sz * c_sz
  pad = (res_kh - 1) // 2

  def dot(a, b):
    return jnp.dot(a, b, preferred_element_type=f32)

  def fold_w(v):
    """(R, W*C) -> (R, W*C): every lane ends with the sum over its channel's
    W positions.  Log-tree of circular XLU lane rolls when W is a power of
    two, linear otherwise.  Exact f32 (no MXU)."""
    if (w_sz & (w_sz - 1)) == 0:
      s = v
      step = c_sz
      while step < WC:
        s = s + pltpu.roll(s, step, axis=1)
        step *= 2
      return s
    s = v
    for k in range(1, w_sz):
      s = s + pltpu.roll(v, k * c_sz, axis=1)
    return s

  def bn_stats(y):
    """Single-pass per-channel batch stats over (N, H, W), lane-tiled (1, W*C)."""
    mean = fold_w(jnp.sum(y, axis=0, keepdims=True)) * inv_m       # (1, W*C)
    ex2 = fold_w(jnp.sum(y * y, axis=0, keepdims=True)) * inv_m    # (1, W*C)
    var = jnp.maximum(ex2 - mean * mean, 0.0)
    return mean, jax.lax.rsqrt(var + eps)

  def expand_rows(v):
    """(N, L) -> (N*H, L): each sample's row repeated H times (sublane bcast)."""
    parts = [jnp.broadcast_to(v[i:i + 1], (h_sz, v.shape[1])) for i in range(n)]
    return jnp.concatenate(parts, axis=0) if n > 1 else parts[0]

  def tile_n(v):
    """(H', L) -> (N*H', L): sample-independent map replicated over N."""
    return jnp.concatenate([v] * n, axis=0) if n > 1 else v

  # ---- FiLM coefficients for every block (depends only on h; off the
  #      activation critical path, done once at entry) ------------------------
  bg_all = dot(h_ref[...], fcw_ref[...]) + fcb_ref[...]      # (N, nb*2*W*C) f32

  # ---- first_conv: 1x1 conv -> BatchNorm(batch stats) -> ReLU ----------------
  # (conv bias dropped: it cancels exactly under the following BatchNorm)
  y1 = dot(x0_ref[...], wfirst_ref[...])                     # (N*H, W*C) f32
  mean, invstd = bn_stats(y1)
  scale = fbnw_ref[...] * invstd                             # (1, W*C)
  shift = fbnb_ref[...] - mean * scale
  xcur = jnp.maximum(y1 * scale + shift, 0.0)

  # ---- residual FiLM blocks --------------------------------------------------
  for blk in range(n_blocks):
    # conv1 (1x1; coord channels + bias folded into p1) + ReLU
    res = jnp.maximum(
        dot(xcur.astype(bf16), w1bd_ref[blk]) + tile_n(p1_ref[blk]), 0.0)

    # conv2 (KxK, same padding):
    #   H taps  -> static sublane roll + boundary mask (XLU/VPU, no MXU pass)
    #   W taps + channel mix -> one banded (W*C, W*C) matmul per H tap
    acc = None
    for kh in range(res_kh):
      sh = (pad - kh) % NH
      rolled = pltpu.roll(res, sh, axis=0) if sh else res
      if kh != pad:
        rolled = rolled * mask_ref[kh]                       # zero-pad rows
      part = dot(rolled.astype(bf16), b2_ref[blk * res_kh + kh])
      acc = part if acc is None else acc + part
    # conv2 bias dropped: it cancels exactly under the following BatchNorm

    # BatchNorm (batch stats) fused with FiLM:  relu(BN(acc)*beta + gamma) + res
    mean, invstd = bn_stats(acc)
    scale = bnw_ref[blk] * invstd                            # (1, W*C)
    shift = bnb_ref[blk] - mean * scale
    beta = bg_all[:, blk * 2 * WC: blk * 2 * WC + WC]        # (N, W*C) mult.
    gamma = bg_all[:, blk * 2 * WC + WC: (blk + 1) * 2 * WC]  # (N, W*C) add.
    a_rows = expand_rows(beta * scale)                       # (N*H, W*C)
    b_rows = expand_rows(beta * shift + gamma)
    xcur = jnp.maximum(acc * a_rows + b_rows, 0.0) + res

  # ---- last conv (valid padding): computed in the full N*H row space; rows
  #      with h >= Ho are dead and trimmed by the wrapper ----------------------
  acc = None
  for kh in range(out_kh):
    sh = (-kh) % NH
    rolled = pltpu.roll(xcur, sh, axis=0) if sh else xcur
    part = dot(rolled.astype(bf16), blast_ref[kh])           # (N*H, LCO)
    acc = part if acc is None else acc + part
  out_ref[...] = acc + tile_n(plast_ref[...])


# ------------------------ structural-matrix builders -------------------------

def _block_diag(w_cc, width):
  """kron(I_width, w_cc) -> (width*Cin, width*Cout) block-diagonal matrix."""
  return jnp.kron(jnp.eye(width, dtype=w_cc.dtype), w_cc)


def _banded(k4, w_in, w_out, base):
  """Per-kh banded matrices applying a KHxKW conv along the W axis.

  k4: (KH, KW, Cin, Cout).  B[kh, wi*Cin+ci, wo*Cout+co] = k4[kh, wi-wo-base]
  when 0 <= wi-wo-base < KW else 0.
  """
  kh_, kw_, cin, cout = k4.shape
  wi = jnp.arange(w_in)[None, :, None]
  wo = jnp.arange(w_out)[None, None, :]
  kw = jnp.arange(kw_)[:, None, None]
  ind = (wi == wo + kw + base).astype(k4.dtype)              # (KW, Wi, Wo)
  r = jnp.einsum('hwio,wab->haibo', k4, ind)                 # (KH,Wi,Cin,Wo,Cout)
  return r.reshape(kh_, w_in * cin, w_out * cout)


# --------------------------------- forward -----------------------------------

def film_module_forward(params, x_nchw, h):
  """FilmModule.forward.  x_nchw: (N, Cin, H, W), h: (N, bg_hidden)."""
  eps = 1e-5
  f32, bf16 = jnp.float32, jnp.bfloat16

  N, cin, H, W = x_nchw.shape
  C = params['first_w'].shape[1]
  n_blocks = params['c1_w'].shape[0]
  res_kh = params['c2_w'].shape[1]
  out_kh = params['last_w'].shape[0]
  Co = params['last_w'].shape[3]
  Ho, Wo = H - out_kh + 1, W - out_kh + 1
  NH, WC = N * H, W * C
  pad = (res_kh - 1) // 2
  LCO = ((Wo * Co + 127) // 128) * 128          # lane-dense padded output width

  # input activation: NHWC flattened, shipped bf16 (the MXU truncates anyway)
  x0 = jnp.transpose(x_nchw, (0, 2, 3, 1)).reshape(NH, W * cin).astype(bf16)
  h_bf = h.astype(bf16)

  xc = jnp.linspace(-1.0, 1.0, W).astype(f32)
  yc = jnp.linspace(-1.0, 1.0, H).astype(f32)

  # first conv (bias dropped — cancelled by the following BatchNorm) + BN affine
  wfirst = _block_diag(params['first_w'].astype(f32), W).astype(bf16)
  fbnw = jnp.tile(params['first_bn_w'].astype(f32)[None, :], (1, W))   # (1,W*C)
  fbnb = jnp.tile(params['first_bn_b'].astype(f32)[None, :], (1, W))

  # boundary masks for the 'same'-padding H taps of conv2 (also cover the
  # cross-sample wrap of the circular roll)
  rows_h = jnp.arange(NH) % H
  mask_same = jnp.stack(
      [((rows_h + kh - pad >= 0) & (rows_h + kh - pad < H)).astype(f32)
       for kh in range(res_kh)])[:, :, None]                            # (KH,NH,1)

  # per-block parameters
  p1_list, w1_list, b2_list = [], [], []
  for blk in range(n_blocks):
    c1w = params['c1_w'][blk].astype(f32)                    # (C+2, C)
    c1b = params['c1_b'][blk].astype(f32)                    # (C,)
    pos = (xc[None, :, None] * c1w[C][None, None, :]
           + yc[:, None, None] * c1w[C + 1][None, None, :]
           + c1b[None, None, :])                             # (H, W, C)
    p1_list.append(pos.reshape(H, WC))                       # NOT tiled over N
    w1_list.append(_block_diag(c1w[:C], W))
    b2_list.append(_banded(params['c2_w'][blk].astype(f32), W, W, -pad))
  p1 = jnp.stack(p1_list)                                    # (nb, H, W*C) f32
  w1bd = jnp.stack(w1_list).astype(bf16)                     # (nb, W*C, W*C)
  b2 = jnp.stack(b2_list).astype(bf16).reshape(n_blocks * res_kh, WC, WC)
  bnw = jnp.tile(params['bn_w'].astype(f32)[:, None, :], (1, 1, W))    # (nb,1,W*C)
  bnb = jnp.tile(params['bn_b'].astype(f32)[:, None, :], (1, 1, W))

  # film_fc, reorganised & pre-tiled over W so the kernel's one entry matmul
  # yields beta/gamma directly in the (N, W*C) lane layout:
  #   lanes [blk*2*WC, blk*2*WC+WC) -> beta (mult.), next WC -> gamma (add.)
  bg = params['fc_w'].shape[0]
  fcw = params['fc_w'].astype(f32).reshape(bg, n_blocks, 2, 1, C)
  fcw = jnp.broadcast_to(fcw, (bg, n_blocks, 2, W, C)).reshape(
      bg, n_blocks * 2 * WC).astype(bf16)
  fcb = params['fc_b'].astype(f32).reshape(n_blocks, 2, 1, C)
  fcb = jnp.broadcast_to(fcb, (n_blocks, 2, W, C)).reshape(1, n_blocks * 2 * WC)

  # last conv (valid); coord channels + bias folded into plast; lanes padded
  wl = params['last_w'].astype(f32)                          # (KH, KW, C+2, Co)
  bl = params['last_b'].astype(f32)
  blast = _banded(wl[:, :, :C, :], W, Wo, 0)                 # (KH, W*C, Wo*Co)
  blast = jnp.pad(blast, ((0, 0), (0, 0), (0, LCO - Wo * Co))).astype(bf16)
  xc_g = xc[jnp.arange(Wo)[:, None] + jnp.arange(out_kh)[None, :]]     # (Wo, KW)
  yc_g = yc[jnp.arange(Ho)[:, None] + jnp.arange(out_kh)[None, :]]     # (Ho, KH)
  px = jnp.einsum('wk,kc->wc', xc_g, wl[:, :, C, :].sum(axis=0))       # (Wo, Co)
  py = jnp.einsum('hk,kc->hc', yc_g, wl[:, :, C + 1, :].sum(axis=1))   # (Ho, Co)
  plast = (px[None, :, :] + py[:, None, :] + bl[None, None, :]).reshape(
      Ho, Wo * Co)
  plast = jnp.pad(plast, ((0, H - Ho), (0, LCO - Wo * Co)))  # (H, LCO) f32

  inputs = [x0, h_bf, wfirst, fbnw, fbnb, mask_same, fcw, fcb,
            p1, w1bd, b2, bnw, bnb, blast, plast]

  def full_spec(a):
    return pl.BlockSpec(a.shape, lambda i, _n=a.ndim: (0,) * _n)

  kernel = functools.partial(
      _film_fused_kernel, n_blocks=n_blocks, res_kh=res_kh, out_kh=out_kh,
      n=N, h_sz=H, w_sz=W, c_sz=C, inv_m=1.0 / float(N * H * W), eps=eps)

  out_full = pl.pallas_call(
      kernel,
      out_shape=jax.ShapeDtypeStruct((NH, LCO), f32),
      grid_spec=pltpu.PrefetchScalarGridSpec(
          num_scalar_prefetch=0,
          grid=(1,),
          in_specs=[full_spec(a) for a in inputs],
          out_specs=pl.BlockSpec((NH, LCO), lambda i: (0, 0)),
      ),
      compiler_params=pltpu.CompilerParams(
          dimension_semantics=("arbitrary",),
          vmem_limit_bytes=32 * 1024 * 1024),
  )(*inputs)

  # trim dead rows (h >= Ho) and padded lanes, back to NCHW
  out = out_full.reshape(N, H, LCO)[:, :Ho, :Wo * Co].reshape(N, Ho, Wo, Co)
  return jnp.transpose(out, (0, 3, 1, 2))


# --------------------------------- params ------------------------------------

def init_params(key, *, in_channels, res_channels, res_kernel, bg_hidden_size,
                out_channels, out_kernel, n_blocks):
  ks = iter(jax.random.split(key, 16))

  def w(shape, scale=0.1):
    return (jax.random.normal(next(ks), shape) * scale).astype(jnp.float32)

  C = res_channels
  return dict(
      fc_w=w((bg_hidden_size, C * n_blocks * 2)),
      fc_b=w((C * n_blocks * 2,)),
      first_w=w((in_channels, C)),
      first_b=w((C,)),
      first_bn_w=jnp.ones((C,), jnp.float32),
      first_bn_b=jnp.zeros((C,), jnp.float32),
      c1_w=w((n_blocks, C + 2, C)),
      c1_b=w((n_blocks, C)),
      c2_w=w((n_blocks, res_kernel, res_kernel, C, C)),
      c2_b=w((n_blocks, C)),
      bn_w=jnp.ones((n_blocks, C), jnp.float32),
      bn_b=jnp.zeros((n_blocks, C), jnp.float32),
      last_w=w((out_kernel, out_kernel, C + 2, out_channels)),
      last_b=w((out_channels,)),
  )


# ---------------------------------- main --------------------------------------

if __name__ == "__main__":
  key = jax.random.PRNGKey(0)
  kx, kh, kp = jax.random.split(key, 3)

  N, Cin, H, W = 2, 4, 16, 16
  res_channels, res_kernel = 16, 3
  bg_hidden, out_channels, out_kernel, n_blocks = 32, 8, 3, 3

  x = jax.random.normal(kx, (N, Cin, H, W), jnp.float32)   # NCHW, like PyTorch
  h = jax.random.normal(kh, (N, bg_hidden), jnp.float32)

  params = init_params(kp, in_channels=Cin, res_channels=res_channels,
                       res_kernel=res_kernel, bg_hidden_size=bg_hidden,
                       out_channels=out_channels, out_kernel=out_kernel,
                       n_blocks=n_blocks)

  fwd = jax.jit(film_module_forward)
  out = jax.block_until_ready(fwd(params, x, h))

  expected = (N, out_channels, H - out_kernel + 1, W - out_kernel + 1)
  assert out.shape == expected, (out.shape, expected)
  assert bool(jnp.all(jnp.isfinite(out)))
  print("KERNEL_OK")
</pallas_src>

<mosaic_0001>
module attributes {stable_mosaic.version = 11 : i64} {
  func.func @_film_fused_kernel(%arg0: i32, %arg1: memref<32x64xbf16, #tpu.memory_space<vmem>>, %arg2: memref<2x32xbf16, #tpu.memory_space<vmem>>, %arg3: memref<64x256xbf16, #tpu.memory_space<vmem>>, %arg4: memref<1x256xf32, #tpu.memory_space<vmem>>, %arg5: memref<1x256xf32, #tpu.memory_space<vmem>>, %arg6: memref<3x32x1xf32, #tpu.memory_space<vmem>>, %arg7: memref<32x1536xbf16, #tpu.memory_space<vmem>>, %arg8: memref<1x1536xf32, #tpu.memory_space<vmem>>, %arg9: memref<3x16x256xf32, #tpu.memory_space<vmem>>, %arg10: memref<3x256x256xbf16, #tpu.memory_space<vmem>>, %arg11: memref<9x256x256xbf16, #tpu.memory_space<vmem>>, %arg12: memref<3x1x256xf32, #tpu.memory_space<vmem>>, %arg13: memref<3x1x256xf32, #tpu.memory_space<vmem>>, %arg14: memref<3x256x128xbf16, #tpu.memory_space<vmem>>, %arg15: memref<16x128xf32, #tpu.memory_space<vmem>>, %arg16: memref<32x128xf32, #tpu.memory_space<vmem>>) attributes {dimension_semantics = [#tpu.dimension_semantics<arbitrary>], iteration_bounds = array<i64: 1>, scalar_prefetch = 0 : i64, scratch_operands = 0 : i64, tpu.core_type = #tpu.core_type<tc>, window_params = [{pipeline_mode = #tpu.pipeline_mode<synchronous>, transform_indices = @transform_0, window_bounds = array<i64: 32, 64>}, {pipeline_mode = #tpu.pipeline_mode<synchronous>, transform_indices = @transform_1, window_bounds = array<i64: 2, 32>}, {pipeline_mode = #tpu.pipeline_mode<synchronous>, transform_indices = @transform_2, window_bounds = array<i64: 64, 256>}, {pipeline_mode = #tpu.pipeline_mode<synchronous>, transform_indices = @transform_3, window_bounds = array<i64: 1, 256>}, {pipeline_mode = #tpu.pipeline_mode<synchronous>, transform_indices = @transform_4, window_bounds = array<i64: 1, 256>}, {pipeline_mode = #tpu.pipeline_mode<synchronous>, transform_indices = @transform_5, window_bounds = array<i64: 3, 32, 1>}, {pipeline_mode = #tpu.pipeline_mode<synchronous>, transform_indices = @transform_6, window_bounds = array<i64: 32, 1536>}, {pipeline_mode = #tpu.pipeline_mode<synchronous>, transform_indices = @transform_7, window_bounds = array<i64: 1, 1536>}, {pipeline_mode = #tpu.pipeline_mode<synchronous>, transform_indices = @transform_8, window_bounds = array<i64: 3, 16, 256>}, {pipeline_mode = #tpu.pipeline_mode<synchronous>, transform_indices = @transform_9, window_bounds = array<i64: 3, 256, 256>}, {pipeline_mode = #tpu.pipeline_mode<synchronous>, transform_indices = @transform_10, window_bounds = array<i64: 9, 256, 256>}, {pipeline_mode = #tpu.pipeline_mode<synchronous>, transform_indices = @transform_11, window_bounds = array<i64: 3, 1, 256>}, {pipeline_mode = #tpu.pipeline_mode<synchronous>, transform_indices = @transform_12, window_bounds = array<i64: 3, 1, 256>}, {pipeline_mode = #tpu.pipeline_mode<synchronous>, transform_indices = @transform_13, window_bounds = array<i64: 3, 256, 128>}, {pipeline_mode = #tpu.pipeline_mode<synchronous>, transform_indices = @transform_14, window_bounds = array<i64: 16, 128>}, {pipeline_mode = #tpu.pipeline_mode<synchronous>, transform_indices = @transform_15, window_bounds = array<i64: 32, 128>}]} {
    %c0 = arith.constant 0 : index
    %c0_0 = arith.constant 0 : index
    %0 = vector.load %arg2[%c0, %c0_0] : memref<2x32xbf16, #tpu.memory_space<vmem>>, vector<2x32xbf16>
    %c0_1 = arith.constant 0 : index
    %c0_2 = arith.constant 0 : index
    %1 = vector.load %arg7[%c0_1, %c0_2] : memref<32x1536xbf16, #tpu.memory_space<vmem>>, vector<32x1536xbf16>
    %cst = arith.constant dense<0.000000e+00> : vector<2x1536xf32>
    %2 = tpu.matmul %0, %1, %cst {dimension_numbers = #tpu.dot_dimension_numbers<[1], [0], [0], [1], [0, 0, 1, 1], [], []>} : vector<2x32xbf16>, vector<32x1536xbf16>, vector<2x1536xf32> -> vector<2x1536xf32>
    %c0_3 = arith.constant 0 : index
    %c0_4 = arith.constant 0 : index
    %3 = vector.load %arg8[%c0_3, %c0_4] : memref<1x1536xf32, #tpu.memory_space<vmem>>, vector<1x1536xf32>
    %4 = vector.broadcast %3 : vector<1x1536xf32> to vector<2x1536xf32>
    %5 = arith.addf %2, %4 : vector<2x1536xf32>
    %c0_5 = arith.constant 0 : index
    %c0_6 = arith.constant 0 : index
    %6 = vector.load %arg1[%c0_5, %c0_6] : memref<32x64xbf16, #tpu.memory_space<vmem>>, vector<32x64xbf16>
    %c0_7 = arith.constant 0 : index
    %c0_8 = arith.constant 0 : index
    %7 = vector.load %arg3[%c0_7, %c0_8] : memref<64x256xbf16, #tpu.memory_space<vmem>>, vector<64x256xbf16>
    %cst_9 = arith.constant dense<0.000000e+00> : vector<32x256xf32>
    %8 = tpu.matmul %6, %7, %cst_9 {dimension_numbers = #tpu.dot_dimension_numbers<[1], [0], [0], [1], [0, 0, 1, 1], [], []>} : vector<32x64xbf16>, vector<64x256xbf16>, vector<32x256xf32> -> vector<32x256xf32>
    %cst_10 = arith.constant dense<0.000000e+00> : vector<256xf32>
    %9 = vector.multi_reduction <add>, %8, %cst_10 [0] : vector<32x256xf32> to vector<256xf32>
    %10 = vector.shape_cast %9 : vector<256xf32> to vector<1x256xf32>
    %c16_i32 = arith.constant 16 : i32
    %11 = tpu.dynamic_rotate %10 by %c16_i32 dim 1 : vector<1x256xf32>, i32 -> vector<1x256xf32>
    %12 = arith.addf %10, %11 : vector<1x256xf32>
    %c32_i32 = arith.constant 32 : i32
    %13 = tpu.dynamic_rotate %12 by %c32_i32 dim 1 : vector<1x256xf32>, i32 -> vector<1x256xf32>
    %14 = arith.addf %12, %13 : vector<1x256xf32>
    %c64_i32 = arith.constant 64 : i32
    %15 = tpu.dynamic_rotate %14 by %c64_i32 dim 1 : vector<1x256xf32>, i32 -> vector<1x256xf32>
    %16 = arith.addf %14, %15 : vector<1x256xf32>
    %c128_i32 = arith.constant 128 : i32
    %17 = tpu.dynamic_rotate %16 by %c128_i32 dim 1 : vector<1x256xf32>, i32 -> vector<1x256xf32>
    %18 = arith.addf %16, %17 : vector<1x256xf32>
    %cst_11 = arith.constant 0.001953125 : f32
    %19 = vector.broadcast %cst_11 : f32 to vector<1x256xf32>
    %20 = arith.mulf %18, %19 : vector<1x256xf32>
    %21 = arith.mulf %8, %8 : vector<32x256xf32>
    %cst_12 = arith.constant dense<0.000000e+00> : vector<256xf32>
    %22 = vector.multi_reduction <add>, %21, %cst_12 [0] : vector<32x256xf32> to vector<256xf32>
    %23 = vector.shape_cast %22 : vector<256xf32> to vector<1x256xf32>
    %c16_i32_13 = arith.constant 16 : i32
    %24 = tpu.dynamic_rotate %23 by %c16_i32_13 dim 1 : vector<1x256xf32>, i32 -> vector<1x256xf32>
    %25 = arith.addf %23, %24 : vector<1x256xf32>
    %c32_i32_14 = arith.constant 32 : i32
    %26 = tpu.dynamic_rotate %25 by %c32_i32_14 dim 1 : vector<1x256xf32>, i32 -> vector<1x256xf32>
    %27 = arith.addf %25, %26 : vector<1x256xf32>
    %c64_i32_15 = arith.constant 64 : i32
    %28 = tpu.dynamic_rotate %27 by %c64_i32_15 dim 1 : vector<1x256xf32>, i32 -> vector<1x256xf32>
    %29 = arith.addf %27, %28 : vector<1x256xf32>
    %c128_i32_16 = arith.constant 128 : i32
    %30 = tpu.dynamic_rotate %29 by %c128_i32_16 dim 1 : vector<1x256xf32>, i32 -> vector<1x256xf32>
    %31 = arith.addf %29, %30 : vector<1x256xf32>
    %cst_17 = arith.constant 0.001953125 : f32
    %32 = vector.broadcast %cst_17 : f32 to vector<1x256xf32>
    %33 = arith.mulf %31, %32 : vector<1x256xf32>
    %34 = arith.mulf %20, %20 : vector<1x256xf32>
    %35 = arith.subf %33, %34 : vector<1x256xf32>
    %cst_18 = arith.constant 0.000000e+00 : f32
    %36 = vector.broadcast %cst_18 : f32 to vector<1x256xf32>
    %37 = arith.maximumf %35, %36 : vector<1x256xf32>
    %cst_19 = arith.constant 9.99999974E-6 : f32
    %38 = vector.broadcast %cst_19 : f32 to vector<1x256xf32>
    %39 = arith.addf %37, %38 : vector<1x256xf32>
    %40 = math.rsqrt %39 : vector<1x256xf32>
    %c0_20 = arith.constant 0 : index
    %c0_21 = arith.constant 0 : index
    %41 = vector.load %arg4[%c0_20, %c0_21] : memref<1x256xf32, #tpu.memory_space<vmem>>, vector<1x256xf32>
    %42 = arith.mulf %41, %40 : vector<1x256xf32>
    %c0_22 = arith.constant 0 : index
    %c0_23 = arith.constant 0 : index
    %43 = vector.load %arg5[%c0_22, %c0_23] : memref<1x256xf32, #tpu.memory_space<vmem>>, vector<1x256xf32>
    %44 = arith.mulf %20, %42 : vector<1x256xf32>
    %45 = arith.subf %43, %44 : vector<1x256xf32>
    %46 = vector.broadcast %42 : vector<1x256xf32> to vector<32x256xf32>
    %47 = arith.mulf %8, %46 : vector<32x256xf32>
    %48 = vector.broadcast %45 : vector<1x256xf32> to vector<32x256xf32>
    %49 = arith.addf %47, %48 : vector<32x256xf32>
    %cst_24 = arith.constant 0.000000e+00 : f32
    %50 = vector.broadcast %cst_24 : f32 to vector<32x256xf32>
    %51 = arith.maximumf %49, %50 : vector<32x256xf32>
    %52 = arith.truncf %51 : vector<32x256xf32> to vector<32x256xbf16>
    %c0_25 = arith.constant 0 : index
    %c0_26 = arith.constant 0 : index
    %c0_27 = arith.constant 0 : index
    %53 = vector.load %arg10[%c0_25, %c0_26, %c0_27] : memref<3x256x256xbf16, #tpu.memory_space<vmem>>, vector<1x256x256xbf16>
    %54 = vector.shape_cast %53 : vector<1x256x256xbf16> to vector<256x256xbf16>
    %cst_28 = arith.constant dense<0.000000e+00> : vector<32x256xf32>
    %55 = tpu.matmul %52, %54, %cst_28 {dimension_numbers = #tpu.dot_dimension_numbers<[1], [0], [0], [1], [0, 0, 1, 1], [], []>} : vector<32x256xbf16>, vector<256x256xbf16>, vector<32x256xf32> -> vector<32x256xf32>
    %c0_29 = arith.constant 0 : index
    %c0_30 = arith.constant 0 : index
    %c0_31 = arith.constant 0 : index
    %56 = vector.load %arg9[%c0_29, %c0_30, %c0_31] : memref<3x16x256xf32, #tpu.memory_space<vmem>>, vector<1x16x256xf32>
    %57 = vector.shape_cast %56 : vector<1x16x256xf32> to vector<16x256xf32>
    %58 = tpu.concatenate %57, %57 in 0 : vector<16x256xf32>, vector<16x256xf32> -> vector<32x256xf32>
    %59 = arith.addf %55, %58 : vector<32x256xf32>
    %cst_32 = arith.constant 0.000000e+00 : f32
    %60 = vector.broadcast %cst_32 : f32 to vector<32x256xf32>
    %61 = arith.maximumf %59, %60 : vector<32x256xf32>
    %c1_i32 = arith.constant 1 : i32
    %62 = tpu.dynamic_rotate %61 by %c1_i32 dim 0 : vector<32x256xf32>, i32 -> vector<32x256xf32>
    %c0_33 = arith.constant 0 : index
    %c0_34 = arith.constant 0 : index
    %c0_35 = arith.constant 0 : index
    %63 = vector.load %arg6[%c0_33, %c0_34, %c0_35] : memref<3x32x1xf32, #tpu.memory_space<vmem>>, vector<1x32x1xf32>
    %64 = vector.shape_cast %63 : vector<1x32x1xf32> to vector<32x1xf32>
    %65 = vector.broadcast %64 : vector<32x1xf32> to vector<32x256xf32>
    %66 = arith.mulf %62, %65 : vector<32x256xf32>
    %67 = arith.truncf %66 : vector<32x256xf32> to vector<32x256xbf16>
    %c0_36 = arith.constant 0 : index
    %c0_37 = arith.constant 0 : index
    %c0_38 = arith.constant 0 : index
    %68 = vector.load %arg11[%c0_36, %c0_37, %c0_38] : memref<9x256x256xbf16, #tpu.memory_space<vmem>>, vector<1x256x256xbf16>
    %69 = vector.shape_cast %68 : vector<1x256x256xbf16> to vector<256x256xbf16>
    %cst_39 = arith.constant dense<0.000000e+00> : vector<32x256xf32>
    %70 = tpu.matmul %67, %69, %cst_39 {dimension_numbers = #tpu.dot_dimension_numbers<[1], [0], [0], [1], [0, 0, 1, 1], [], []>} : vector<32x256xbf16>, vector<256x256xbf16>, vector<32x256xf32> -> vector<32x256xf32>
    %71 = arith.truncf %61 : vector<32x256xf32> to vector<32x256xbf16>
    %c1 = arith.constant 1 : index
    %c0_40 = arith.constant 0 : index
    %c0_41 = arith.constant 0 : index
    %72 = vector.load %arg11[%c1, %c0_40, %c0_41] : memref<9x256x256xbf16, #tpu.memory_space<vmem>>, vector<1x256x256xbf16>
    %73 = vector.shape_cast %72 : vector<1x256x256xbf16> to vector<256x256xbf16>
    %cst_42 = arith.constant dense<0.000000e+00> : vector<32x256xf32>
    %74 = tpu.matmul %71, %73, %cst_42 {dimension_numbers = #tpu.dot_dimension_numbers<[1], [0], [0], [1], [0, 0, 1, 1], [], []>} : vector<32x256xbf16>, vector<256x256xbf16>, vector<32x256xf32> -> vector<32x256xf32>
    %75 = arith.addf %70, %74 : vector<32x256xf32>
    %c31_i32 = arith.constant 31 : i32
    %76 = tpu.dynamic_rotate %61 by %c31_i32 dim 0 : vector<32x256xf32>, i32 -> vector<32x256xf32>
    %c2 = arith.constant 2 : index
    %c0_43 = arith.constant 0 : index
    %c0_44 = arith.constant 0 : index
    %77 = vector.load %arg6[%c2, %c0_43, %c0_44] : memref<3x32x1xf32, #tpu.memory_space<vmem>>, vector<1x32x1xf32>
    %78 = vector.shape_cast %77 : vector<1x32x1xf32> to vector<32x1xf32>
    %79 = vector.broadcast %78 : vector<32x1xf32> to vector<32x256xf32>
    %80 = arith.mulf %76, %79 : vector<32x256xf32>
    %81 = arith.truncf %80 : vector<32x256xf32> to vector<32x256xbf16>
    %c2_45 = arith.constant 2 : index
    %c0_46 = arith.constant 0 : index
    %c0_47 = arith.constant 0 : index
    %82 = vector.load %arg11[%c2_45, %c0_46, %c0_47] : memref<9x256x256xbf16, #tpu.memory_space<vmem>>, vector<1x256x256xbf16>
    %83 = vector.shape_cast %82 : vector<1x256x256xbf16> to vector<256x256xbf16>
    %cst_48 = arith.constant dense<0.000000e+00> : vector<32x256xf32>
    %84 = tpu.matmul %81, %83, %cst_48 {dimension_numbers = #tpu.dot_dimension_numbers<[1], [0], [0], [1], [0, 0, 1, 1], [], []>} : vector<32x256xbf16>, vector<256x256xbf16>, vector<32x256xf32> -> vector<32x256xf32>
    %85 = arith.addf %75, %84 : vector<32x256xf32>
    %cst_49 = arith.constant dense<0.000000e+00> : vector<256xf32>
    %86 = vector.multi_reduction <add>, %85, %cst_49 [0] : vector<32x256xf32> to vector<256xf32>
    %87 = vector.shape_cast %86 : vector<256xf32> to vector<1x256xf32>
    %c16_i32_50 = arith.constant 16 : i32
    %88 = tpu.dynamic_rotate %87 by %c16_i32_50 dim 1 : vector<1x256xf32>, i32 -> vector<1x256xf32>
    %89 = arith.addf %87, %88 : vector<1x256xf32>
    %c32_i32_51 = arith.constant 32 : i32
    %90 = tpu.dynamic_rotate %89 by %c32_i32_51 dim 1 : vector<1x256xf32>, i32 -> vector<1x256xf32>
    %91 = arith.addf %89, %90 : vector<1x256xf32>
    %c64_i32_52 = arith.constant 64 : i32
    %92 = tpu.dynamic_rotate %91 by %c64_i32_52 dim 1 : vector<1x256xf32>, i32 -> vector<1x256xf32>
    %93 = arith.addf %91, %92 : vector<1x256xf32>
    %c128_i32_53 = arith.constant 128 : i32
    %94 = tpu.dynamic_rotate %93 by %c128_i32_53 dim 1 : vector<1x256xf32>, i32 -> vector<1x256xf32>
    %95 = arith.addf %93, %94 : vector<1x256xf32>
    %cst_54 = arith.constant 0.001953125 : f32
    %96 = vector.broadcast %cst_54 : f32 to vector<1x256xf32>
    %97 = arith.mulf %95, %96 : vector<1x256xf32>
    %98 = arith.mulf %85, %85 : vector<32x256xf32>
    %cst_55 = arith.constant dense<0.000000e+00> : vector<256xf32>
    %99 = vector.multi_reduction <add>, %98, %cst_55 [0] : vector<32x256xf32> to vector<256xf32>
    %100 = vector.shape_cast %99 : vector<256xf32> to vector<1x256xf32>
    %c16_i32_56 = arith.constant 16 : i32
    %101 = tpu.dynamic_rotate %100 by %c16_i32_56 dim 1 : vector<1x256xf32>, i32 -> vector<1x256xf32>
    %102 = arith.addf %100, %101 : vector<1x256xf32>
    %c32_i32_57 = arith.constant 32 : i32
    %103 = tpu.dynamic_rotate %102 by %c32_i32_57 dim 1 : vector<1x256xf32>, i32 -> vector<1x256xf32>
    %104 = arith.addf %102, %103 : vector<1x256xf32>
    %c64_i32_58 = arith.constant 64 : i32
    %105 = tpu.dynamic_rotate %104 by %c64_i32_58 dim 1 : vector<1x256xf32>, i32 -> vector<1x256xf32>
    %106 = arith.addf %104, %105 : vector<1x256xf32>
    %c128_i32_59 = arith.constant 128 : i32
    %107 = tpu.dynamic_rotate %106 by %c128_i32_59 dim 1 : vector<1x256xf32>, i32 -> vector<1x256xf32>
    %108 = arith.addf %106, %107 : vector<1x256xf32>
    %cst_60 = arith.constant 0.001953125 : f32
    %109 = vector.broadcast %cst_60 : f32 to vector<1x256xf32>
    %110 = arith.mulf %108, %109 : vector<1x256xf32>
    %111 = arith.mulf %97, %97 : vector<1x256xf32>
    %112 = arith.subf %110, %111 : vector<1x256xf32>
    %cst_61 = arith.constant 0.000000e+00 : f32
    %113 = vector.broadcast %cst_61 : f32 to vector<1x256xf32>
    %114 = arith.maximumf %112, %113 : vector<1x256xf32>
    %cst_62 = arith.constant 9.99999974E-6 : f32
    %115 = vector.broadcast %cst_62 : f32 to vector<1x256xf32>
    %116 = arith.addf %114, %115 : vector<1x256xf32>
    %117 = math.rsqrt %116 : vector<1x256xf32>
    %c0_63 = arith.constant 0 : index
    %c0_64 = arith.constant 0 : index
    %c0_65 = arith.constant 0 : index
    %118 = vector.load %arg12[%c0_63, %c0_64, %c0_65] : memref<3x1x256xf32, #tpu.memory_space<vmem>>, vector<1x1x256xf32>
    %119 = vector.shape_cast %118 : vector<1x1x256xf32> to vector<1x256xf32>
    %120 = arith.mulf %119, %117 : vector<1x256xf32>
    %c0_66 = arith.constant 0 : index
    %c0_67 = arith.constant 0 : index
    %c0_68 = arith.constant 0 : index
    %121 = vector.load %arg13[%c0_66, %c0_67, %c0_68] : memref<3x1x256xf32, #tpu.memory_space<vmem>>, vector<1x1x256xf32>
    %122 = vector.shape_cast %121 : vector<1x1x256xf32> to vector<1x256xf32>
    %123 = arith.mulf %97, %120 : vector<1x256xf32>
    %124 = arith.subf %122, %123 : vector<1x256xf32>
    %125 = vector.extract_strided_slice %5 {offsets = [0, 0], sizes = [2, 256], strides = [1, 1]} : vector<2x1536xf32> to vector<2x256xf32>
    %126 = vector.extract_strided_slice %5 {offsets = [0, 256], sizes = [2, 256], strides = [1, 1]} : vector<2x1536xf32> to vector<2x256xf32>
    %127 = vector.broadcast %120 : vector<1x256xf32> to vector<2x256xf32>
    %128 = arith.mulf %125, %127 : vector<2x256xf32>
    %129 = vector.extract_strided_slice %128 {offsets = [0, 0], sizes = [1, 256], strides = [1, 1]} : vector<2x256xf32> to vector<1x256xf32>
    %130 = vector.shape_cast %129 : vector<1x256xf32> to vector<1x256xf32>
    %131 = vector.broadcast %130 : vector<1x256xf32> to vector<16x256xf32>
    %132 = vector.extract_strided_slice %128 {offsets = [1, 0], sizes = [1, 256], strides = [1, 1]} : vector<2x256xf32> to vector<1x256xf32>
    %133 = vector.shape_cast %132 : vector<1x256xf32> to vector<1x256xf32>
    %134 = vector.broadcast %133 : vector<1x256xf32> to vector<16x256xf32>
    %135 = tpu.concatenate %131, %134 in 0 : vector<16x256xf32>, vector<16x256xf32> -> vector<32x256xf32>
    %136 = vector.broadcast %124 : vector<1x256xf32> to vector<2x256xf32>
    %137 = arith.mulf %125, %136 : vector<2x256xf32>
    %138 = arith.addf %137, %126 : vector<2x256xf32>
    %139 = vector.extract_strided_slice %138 {offsets = [0, 0], sizes = [1, 256], strides = [1, 1]} : vector<2x256xf32> to vector<1x256xf32>
    %140 = vector.shape_cast %139 : vector<1x256xf32> to vector<1x256xf32>
    %141 = vector.broadcast %140 : vector<1x256xf32> to vector<16x256xf32>
    %142 = vector.extract_strided_slice %138 {offsets = [1, 0], sizes = [1, 256], strides = [1, 1]} : vector<2x256xf32> to vector<1x256xf32>
    %143 = vector.shape_cast %142 : vector<1x256xf32> to vector<1x256xf32>
    %144 = vector.broadcast %143 : vector<1x256xf32> to vector<16x256xf32>
    %145 = tpu.concatenate %141, %144 in 0 : vector<16x256xf32>, vector<16x256xf32> -> vector<32x256xf32>
    %146 = arith.mulf %85, %135 : vector<32x256xf32>
    %147 = arith.addf %146, %145 : vector<32x256xf32>
    %cst_69 = arith.constant 0.000000e+00 : f32
    %148 = vector.broadcast %cst_69 : f32 to vector<32x256xf32>
    %149 = arith.maximumf %147, %148 : vector<32x256xf32>
    %150 = arith.addf %149, %61 : vector<32x256xf32>
    %151 = arith.truncf %150 : vector<32x256xf32> to vector<32x256xbf16>
    %c1_70 = arith.constant 1 : index
    %c0_71 = arith.constant 0 : index
    %c0_72 = arith.constant 0 : index
    %152 = vector.load %arg10[%c1_70, %c0_71, %c0_72] : memref<3x256x256xbf16, #tpu.memory_space<vmem>>, vector<1x256x256xbf16>
    %153 = vector.shape_cast %152 : vector<1x256x256xbf16> to vector<256x256xbf16>
    %cst_73 = arith.constant dense<0.000000e+00> : vector<32x256xf32>
    %154 = tpu.matmul %151, %153, %cst_73 {dimension_numbers = #tpu.dot_dimension_numbers<[1], [0], [0], [1], [0, 0, 1, 1], [], []>} : vector<32x256xbf16>, vector<256x256xbf16>, vector<32x256xf32> -> vector<32x256xf32>
    %c1_74 = arith.constant 1 : index
    %c0_75 = arith.constant 0 : index
    %c0_76 = arith.constant 0 : index
    %155 = vector.load %arg9[%c1_74, %c0_75, %c0_76] : memref<3x16x256xf32, #tpu.memory_space<vmem>>, vector<1x16x256xf32>
    %156 = vector.shape_cast %155 : vector<1x16x256xf32> to vector<16x256xf32>
    %157 = tpu.concatenate %156, %156 in 0 : vector<16x256xf32>, vector<16x256xf32> -> vector<32x256xf32>
    %158 = arith.addf %154, %157 : vector<32x256xf32>
    %cst_77 = arith.constant 0.000000e+00 : f32
    %159 = vector.broadcast %cst_77 : f32 to vector<32x256xf32>
    %160 = arith.maximumf %158, %159 : vector<32x256xf32>
    %c1_i32_78 = arith.constant 1 : i32
    %161 = tpu.dynamic_rotate %160 by %c1_i32_78 dim 0 : vector<32x256xf32>, i32 -> vector<32x256xf32>
    %c0_79 = arith.constant 0 : index
    %c0_80 = arith.constant 0 : index
    %c0_81 = arith.constant 0 : index
    %162 = vector.load %arg6[%c0_79, %c0_80, %c0_81] : memref<3x32x1xf32, #tpu.memory_space<vmem>>, vector<1x32x1xf32>
    %163 = vector.shape_cast %162 : vector<1x32x1xf32> to vector<32x1xf32>
    %164 = vector.broadcast %163 : vector<32x1xf32> to vector<32x256xf32>
    %165 = arith.mulf %161, %164 : vector<32x256xf32>
    %166 = arith.truncf %165 : vector<32x256xf32> to vector<32x256xbf16>
    %c3 = arith.constant 3 : index
    %c0_82 = arith.constant 0 : index
    %c0_83 = arith.constant 0 : index
    %167 = vector.load %arg11[%c3, %c0_82, %c0_83] : memref<9x256x256xbf16, #tpu.memory_space<vmem>>, vector<1x256x256xbf16>
    %168 = vector.shape_cast %167 : vector<1x256x256xbf16> to vector<256x256xbf16>
    %cst_84 = arith.constant dense<0.000000e+00> : vector<32x256xf32>
    %169 = tpu.matmul %166, %168, %cst_84 {dimension_numbers = #tpu.dot_dimension_numbers<[1], [0], [0], [1], [0, 0, 1, 1], [], []>} : vector<32x256xbf16>, vector<256x256xbf16>, vector<32x256xf32> -> vector<32x256xf32>
    %170 = arith.truncf %160 : vector<32x256xf32> to vector<32x256xbf16>
    %c4 = arith.constant 4 : index
    %c0_85 = arith.constant 0 : index
    %c0_86 = arith.constant 0 : index
    %171 = vector.load %arg11[%c4, %c0_85, %c0_86] : memref<9x256x256xbf16, #tpu.memory_space<vmem>>, vector<1x256x256xbf16>
    %172 = vector.shape_cast %171 : vector<1x256x256xbf16> to vector<256x256xbf16>
    %cst_87 = arith.constant dense<0.000000e+00> : vector<32x256xf32>
    %173 = tpu.matmul %170, %172, %cst_87 {dimension_numbers = #tpu.dot_dimension_numbers<[1], [0], [0], [1], [0, 0, 1, 1], [], []>} : vector<32x256xbf16>, vector<256x256xbf16>, vector<32x256xf32> -> vector<32x256xf32>
    %174 = arith.addf %169, %173 : vector<32x256xf32>
    %c31_i32_88 = arith.constant 31 : i32
    %175 = tpu.dynamic_rotate %160 by %c31_i32_88 dim 0 : vector<32x256xf32>, i32 -> vector<32x256xf32>
    %c2_89 = arith.constant 2 : index
    %c0_90 = arith.constant 0 : index
    %c0_91 = arith.constant 0 : index
    %176 = vector.load %arg6[%c2_89, %c0_90, %c0_91] : memref<3x32x1xf32, #tpu.memory_space<vmem>>, vector<1x32x1xf32>
    %177 = vector.shape_cast %176 : vector<1x32x1xf32> to vector<32x1xf32>
    %178 = vector.broadcast %177 : vector<32x1xf32> to vector<32x256xf32>
    %179 = arith.mulf %175, %178 : vector<32x256xf32>
    %180 = arith.truncf %179 : vector<32x256xf32> to vector<32x256xbf16>
    %c5 = arith.constant 5 : index
    %c0_92 = arith.constant 0 : index
    %c0_93 = arith.constant 0 : index
    %181 = vector.load %arg11[%c5, %c0_92, %c0_93] : memref<9x256x256xbf16, #tpu.memory_space<vmem>>, vector<1x256x256xbf16>
    %182 = vector.shape_cast %181 : vector<1x256x256xbf16> to vector<256x256xbf16>
    %cst_94 = arith.constant dense<0.000000e+00> : vector<32x256xf32>
    %183 = tpu.matmul %180, %182, %cst_94 {dimension_numbers = #tpu.dot_dimension_numbers<[1], [0], [0], [1], [0, 0, 1, 1], [], []>} : vector<32x256xbf16>, vector<256x256xbf16>, vector<32x256xf32> -> vector<32x256xf32>
    %184 = arith.addf %174, %183 : vector<32x256xf32>
    %cst_95 = arith.constant dense<0.000000e+00> : vector<256xf32>
    %185 = vector.multi_reduction <add>, %184, %cst_95 [0] : vector<32x256xf32> to vector<256xf32>
    %186 = vector.shape_cast %185 : vector<256xf32> to vector<1x256xf32>
    %c16_i32_96 = arith.constant 16 : i32
    %187 = tpu.dynamic_rotate %186 by %c16_i32_96 dim 1 : vector<1x256xf32>, i32 -> vector<1x256xf32>
    %188 = arith.addf %186, %187 : vector<1x256xf32>
    %c32_i32_97 = arith.constant 32 : i32
    %189 = tpu.dynamic_rotate %188 by %c32_i32_97 dim 1 : vector<1x256xf32>, i32 -> vector<1x256xf32>
    %190 = arith.addf %188, %189 : vector<1x256xf32>
    %c64_i32_98 = arith.constant 64 : i32
    %191 = tpu.dynamic_rotate %190 by %c64_i32_98 dim 1 : vector<1x256xf32>, i32 -> vector<1x256xf32>
    %192 = arith.addf %190, %191 : vector<1x256xf32>
    %c128_i32_99 = arith.constant 128 : i32
    %193 = tpu.dynamic_rotate %192 by %c128_i32_99 dim 1 : vector<1x256xf32>, i32 -> vector<1x256xf32>
    %194 = arith.addf %192, %193 : vector<1x256xf32>
    %cst_100 = arith.constant 0.001953125 : f32
    %195 = vector.broadcast %cst_100 : f32 to vector<1x256xf32>
    %196 = arith.mulf %194, %195 : vector<1x256xf32>
    %197 = arith.mulf %184, %184 : vector<32x256xf32>
    %cst_101 = arith.constant dense<0.000000e+00> : vector<256xf32>
    %198 = vector.multi_reduction <add>, %197, %cst_101 [0] : vector<32x256xf32> to vector<256xf32>
    %199 = vector.shape_cast %198 : vector<256xf32> to vector<1x256xf32>
    %c16_i32_102 = arith.constant 16 : i32
    %200 = tpu.dynamic_rotate %199 by %c16_i32_102 dim 1 : vector<1x256xf32>, i32 -> vector<1x256xf32>
    %201 = arith.addf %199, %200 : vector<1x256xf32>
    %c32_i32_103 = arith.constant 32 : i32
    %202 = tpu.dynamic_rotate %201 by %c32_i32_103 dim 1 : vector<1x256xf32>, i32 -> vector<1x256xf32>
    %203 = arith.addf %201, %202 : vector<1x256xf32>
    %c64_i32_104 = arith.constant 64 : i32
    %204 = tpu.dynamic_rotate %203 by %c64_i32_104 dim 1 : vector<1x256xf32>, i32 -> vector<1x256xf32>
    %205 = arith.addf %203, %204 : vector<1x256xf32>
    %c128_i32_105 = arith.constant 128 : i32
    %206 = tpu.dynamic_rotate %205 by %c128_i32_105 dim 1 : vector<1x256xf32>, i32 -> vector<1x256xf32>
    %207 = arith.addf %205, %206 : vector<1x256xf32>
    %cst_106 = arith.constant 0.001953125 : f32
    %208 = vector.broadcast %cst_106 : f32 to vector<1x256xf32>
    %209 = arith.mulf %207, %208 : vector<1x256xf32>
    %210 = arith.mulf %196, %196 : vector<1x256xf32>
    %211 = arith.subf %209, %210 : vector<1x256xf32>
    %cst_107 = arith.constant 0.000000e+00 : f32
    %212 = vector.broadcast %cst_107 : f32 to vector<1x256xf32>
    %213 = arith.maximumf %211, %212 : vector<1x256xf32>
    %cst_108 = arith.constant 9.99999974E-6 : f32
    %214 = vector.broadcast %cst_108 : f32 to vector<1x256xf32>
    %215 = arith.addf %213, %214 : vector<1x256xf32>
    %216 = math.rsqrt %215 : vector<1x256xf32>
    %c1_109 = arith.constant 1 : index
    %c0_110 = arith.constant 0 : index
    %c0_111 = arith.constant 0 : index
    %217 = vector.load %arg12[%c1_109, %c0_110, %c0_111] : memref<3x1x256xf32, #tpu.memory_space<vmem>>, vector<1x1x256xf32>
    %218 = vector.shape_cast %217 : vector<1x1x256xf32> to vector<1x256xf32>
    %219 = arith.mulf %218, %216 : vector<1x256xf32>
    %c1_112 = arith.constant 1 : index
    %c0_113 = arith.constant 0 : index
    %c0_114 = arith.constant 0 : index
    %220 = vector.load %arg13[%c1_112, %c0_113, %c0_114] : memref<3x1x256xf32, #tpu.memory_space<vmem>>, vector<1x1x256xf32>
    %221 = vector.shape_cast %220 : vector<1x1x256xf32> to vector<1x256xf32>
    %222 = arith.mulf %196, %219 : vector<1x256xf32>
    %223 = arith.subf %221, %222 : vector<1x256xf32>
    %224 = vector.extract_strided_slice %5 {offsets = [0, 512], sizes = [2, 256], strides = [1, 1]} : vector<2x1536xf32> to vector<2x256xf32>
    %225 = vector.extract_strided_slice %5 {offsets = [0, 768], sizes = [2, 256], strides = [1, 1]} : vector<2x1536xf32> to vector<2x256xf32>
    %226 = vector.broadcast %219 : vector<1x256xf32> to vector<2x256xf32>
    %227 = arith.mulf %224, %226 : vector<2x256xf32>
    %228 = vector.extract_strided_slice %227 {offsets = [0, 0], sizes = [1, 256], strides = [1, 1]} : vector<2x256xf32> to vector<1x256xf32>
    %229 = vector.shape_cast %228 : vector<1x256xf32> to vector<1x256xf32>
    %230 = vector.broadcast %229 : vector<1x256xf32> to vector<16x256xf32>
    %231 = vector.extract_strided_slice %227 {offsets = [1, 0], sizes = [1, 256], strides = [1, 1]} : vector<2x256xf32> to vector<1x256xf32>
    %232 = vector.shape_cast %231 : vector<1x256xf32> to vector<1x256xf32>
    %233 = vector.broadcast %232 : vector<1x256xf32> to vector<16x256xf32>
    %234 = tpu.concatenate %230, %233 in 0 : vector<16x256xf32>, vector<16x256xf32> -> vector<32x256xf32>
    %235 = vector.broadcast %223 : vector<1x256xf32> to vector<2x256xf32>
    %236 = arith.mulf %224, %235 : vector<2x256xf32>
    %237 = arith.addf %236, %225 : vector<2x256xf32>
    %238 = vector.extract_strided_slice %237 {offsets = [0, 0], sizes = [1, 256], strides = [1, 1]} : vector<2x256xf32> to vector<1x256xf32>
    %239 = vector.shape_cast %238 : vector<1x256xf32> to vector<1x256xf32>
    %240 = vector.broadcast %239 : vector<1x256xf32> to vector<16x256xf32>
    %241 = vector.extract_strided_slice %237 {offsets = [1, 0], sizes = [1, 256], strides = [1, 1]} : vector<2x256xf32> to vector<1x256xf32>
    %242 = vector.shape_cast %241 : vector<1x256xf32> to vector<1x256xf32>
    %243 = vector.broadcast %242 : vector<1x256xf32> to vector<16x256xf32>
    %244 = tpu.concatenate %240, %243 in 0 : vector<16x256xf32>, vector<16x256xf32> -> vector<32x256xf32>
    %245 = arith.mulf %184, %234 : vector<32x256xf32>
    %246 = arith.addf %245, %244 : vector<32x256xf32>
    %cst_115 = arith.constant 0.000000e+00 : f32
    %247 = vector.broadcast %cst_115 : f32 to vector<32x256xf32>
    %248 = arith.maximumf %246, %247 : vector<32x256xf32>
    %249 = arith.addf %248, %160 : vector<32x256xf32>
    %250 = arith.truncf %249 : vector<32x256xf32> to vector<32x256xbf16>
    %c2_116 = arith.constant 2 : index
    %c0_117 = arith.constant 0 : index
    %c0_118 = arith.constant 0 : index
    %251 = vector.load %arg10[%c2_116, %c0_117, %c0_118] : memref<3x256x256xbf16, #tpu.memory_space<vmem>>, vector<1x256x256xbf16>
    %252 = vector.shape_cast %251 : vector<1x256x256xbf16> to vector<256x256xbf16>
    %cst_119 = arith.constant dense<0.000000e+00> : vector<32x256xf32>
    %253 = tpu.matmul %250, %252, %cst_119 {dimension_numbers = #tpu.dot_dimension_numbers<[1], [0], [0], [1], [0, 0, 1, 1], [], []>} : vector<32x256xbf16>, vector<256x256xbf16>, vector<32x256xf32> -> vector<32x256xf32>
    %c2_120 = arith.constant 2 : index
    %c0_121 = arith.constant 0 : index
    %c0_122 = arith.constant 0 : index
    %254 = vector.load %arg9[%c2_120, %c0_121, %c0_122] : memref<3x16x256xf32, #tpu.memory_space<vmem>>, vector<1x16x256xf32>
    %255 = vector.shape_cast %254 : vector<1x16x256xf32> to vector<16x256xf32>
    %256 = tpu.concatenate %255, %255 in 0 : vector<16x256xf32>, vector<16x256xf32> -> vector<32x256xf32>
    %257 = arith.addf %253, %256 : vector<32x256xf32>
    %cst_123 = arith.constant 0.000000e+00 : f32
    %258 = vector.broadcast %cst_123 : f32 to vector<32x256xf32>
    %259 = arith.maximumf %257, %258 : vector<32x256xf32>
    %c1_i32_124 = arith.constant 1 : i32
    %260 = tpu.dynamic_rotate %259 by %c1_i32_124 dim 0 : vector<32x256xf32>, i32 -> vector<32x256xf32>
    %c0_125 = arith.constant 0 : index
    %c0_126 = arith.constant 0 : index
    %c0_127 = arith.constant 0 : index
    %261 = vector.load %arg6[%c0_125, %c0_126, %c0_127] : memref<3x32x1xf32, #tpu.memory_space<vmem>>, vector<1x32x1xf32>
    %262 = vector.shape_cast %261 : vector<1x32x1xf32> to vector<32x1xf32>
    %263 = vector.broadcast %262 : vector<32x1xf32> to vector<32x256xf32>
    %264 = arith.mulf %260, %263 : vector<32x256xf32>
    %265 = arith.truncf %264 : vector<32x256xf32> to vector<32x256xbf16>
    %c6 = arith.constant 6 : index
    %c0_128 = arith.constant 0 : index
    %c0_129 = arith.constant 0 : index
    %266 = vector.load %arg11[%c6, %c0_128, %c0_129] : memref<9x256x256xbf16, #tpu.memory_space<vmem>>, vector<1x256x256xbf16>
    %267 = vector.shape_cast %266 : vector<1x256x256xbf16> to vector<256x256xbf16>
    %cst_130 = arith.constant dense<0.000000e+00> : vector<32x256xf32>
    %268 = tpu.matmul %265, %267, %cst_130 {dimension_numbers = #tpu.dot_dimension_numbers<[1], [0], [0], [1], [0, 0, 1, 1], [], []>} : vector<32x256xbf16>, vector<256x256xbf16>, vector<32x256xf32> -> vector<32x256xf32>
    %269 = arith.truncf %259 : vector<32x256xf32> to vector<32x256xbf16>
    %c7 = arith.constant 7 : index
    %c0_131 = arith.constant 0 : index
    %c0_132 = arith.constant 0 : index
    %270 = vector.load %arg11[%c7, %c0_131, %c0_132] : memref<9x256x256xbf16, #tpu.memory_space<vmem>>, vector<1x256x256xbf16>
    %271 = vector.shape_cast %270 : vector<1x256x256xbf16> to vector<256x256xbf16>
    %cst_133 = arith.constant dense<0.000000e+00> : vector<32x256xf32>
    %272 = tpu.matmul %269, %271, %cst_133 {dimension_numbers = #tpu.dot_dimension_numbers<[1], [0], [0], [1], [0, 0, 1, 1], [], []>} : vector<32x256xbf16>, vector<256x256xbf16>, vector<32x256xf32> -> vector<32x256xf32>
    %273 = arith.addf %268, %272 : vector<32x256xf32>
    %c31_i32_134 = arith.constant 31 : i32
    %274 = tpu.dynamic_rotate %259 by %c31_i32_134 dim 0 : vector<32x256xf32>, i32 -> vector<32x256xf32>
    %c2_135 = arith.constant 2 : index
    %c0_136 = arith.constant 0 : index
    %c0_137 = arith.constant 0 : index
    %275 = vector.load %arg6[%c2_135, %c0_136, %c0_137] : memref<3x32x1xf32, #tpu.memory_space<vmem>>, vector<1x32x1xf32>
    %276 = vector.shape_cast %275 : vector<1x32x1xf32> to vector<32x1xf32>
    %277 = vector.broadcast %276 : vector<32x1xf32> to vector<32x256xf32>
    %278 = arith.mulf %274, %277 : vector<32x256xf32>
    %279 = arith.truncf %278 : vector<32x256xf32> to vector<32x256xbf16>
    %c8 = arith.constant 8 : index
    %c0_138 = arith.constant 0 : index
    %c0_139 = arith.constant 0 : index
    %280 = vector.load %arg11[%c8, %c0_138, %c0_139] : memref<9x256x256xbf16, #tpu.memory_space<vmem>>, vector<1x256x256xbf16>
    %281 = vector.shape_cast %280 : vector<1x256x256xbf16> to vector<256x256xbf16>
    %cst_140 = arith.constant dense<0.000000e+00> : vector<32x256xf32>
    %282 = tpu.matmul %279, %281, %cst_140 {dimension_numbers = #tpu.dot_dimension_numbers<[1], [0], [0], [1], [0, 0, 1, 1], [], []>} : vector<32x256xbf16>, vector<256x256xbf16>, vector<32x256xf32> -> vector<32x256xf32>
    %283 = arith.addf %273, %282 : vector<32x256xf32>
    %cst_141 = arith.constant dense<0.000000e+00> : vector<256xf32>
    %284 = vector.multi_reduction <add>, %283, %cst_141 [0] : vector<32x256xf32> to vector<256xf32>
    %285 = vector.shape_cast %284 : vector<256xf32> to vector<1x256xf32>
    %c16_i32_142 = arith.constant 16 : i32
    %286 = tpu.dynamic_rotate %285 by %c16_i32_142 dim 1 : vector<1x256xf32>, i32 -> vector<1x256xf32>
    %287 = arith.addf %285, %286 : vector<1x256xf32>
    %c32_i32_143 = arith.constant 32 : i32
    %288 = tpu.dynamic_rotate %287 by %c32_i32_143 dim 1 : vector<1x256xf32>, i32 -> vector<1x256xf32>
    %289 = arith.addf %287, %288 : vector<1x256xf32>
    %c64_i32_144 = arith.constant 64 : i32
    %290 = tpu.dynamic_rotate %289 by %c64_i32_144 dim 1 : vector<1x256xf32>, i32 -> vector<1x256xf32>
    %291 = arith.addf %289, %290 : vector<1x256xf32>
    %c128_i32_145 = arith.constant 128 : i32
    %292 = tpu.dynamic_rotate %291 by %c128_i32_145 dim 1 : vector<1x256xf32>, i32 -> vector<1x256xf32>
    %293 = arith.addf %291, %292 : vector<1x256xf32>
    %cst_146 = arith.constant 0.001953125 : f32
    %294 = vector.broadcast %cst_146 : f32 to vector<1x256xf32>
    %295 = arith.mulf %293, %294 : vector<1x256xf32>
    %296 = arith.mulf %283, %283 : vector<32x256xf32>
    %cst_147 = arith.constant dense<0.000000e+00> : vector<256xf32>
    %297 = vector.multi_reduction <add>, %296, %cst_147 [0] : vector<32x256xf32> to vector<256xf32>
    %298 = vector.shape_cast %297 : vector<256xf32> to vector<1x256xf32>
    %c16_i32_148 = arith.constant 16 : i32
    %299 = tpu.dynamic_rotate %298 by %c16_i32_148 dim 1 : vector<1x256xf32>, i32 -> vector<1x256xf32>
    %300 = arith.addf %298, %299 : vector<1x256xf32>
    %c32_i32_149 = arith.constant 32 : i32
    %301 = tpu.dynamic_rotate %300 by %c32_i32_149 dim 1 : vector<1x256xf32>, i32 -> vector<1x256xf32>
    %302 = arith.addf %300, %301 : vector<1x256xf32>
    %c64_i32_150 = arith.constant 64 : i32
    %303 = tpu.dynamic_rotate %302 by %c64_i32_150 dim 1 : vector<1x256xf32>, i32 -> vector<1x256xf32>
    %304 = arith.addf %302, %303 : vector<1x256xf32>
    %c128_i32_151 = arith.constant 128 : i32
    %305 = tpu.dynamic_rotate %304 by %c128_i32_151 dim 1 : vector<1x256xf32>, i32 -> vector<1x256xf32>
    %306 = arith.addf %304, %305 : vector<1x256xf32>
    %cst_152 = arith.constant 0.001953125 : f32
    %307 = vector.broadcast %cst_152 : f32 to vector<1x256xf32>
    %308 = arith.mulf %306, %307 : vector<1x256xf32>
    %309 = arith.mulf %295, %295 : vector<1x256xf32>
    %310 = arith.subf %308, %309 : vector<1x256xf32>
    %cst_153 = arith.constant 0.000000e+00 : f32
    %311 = vector.broadcast %cst_153 : f32 to vector<1x256xf32>
    %312 = arith.maximumf %310, %311 : vector<1x256xf32>
    %cst_154 = arith.constant 9.99999974E-6 : f32
    %313 = vector.broadcast %cst_154 : f32 to vector<1x256xf32>
    %314 = arith.addf %312, %313 : vector<1x256xf32>
    %315 = math.rsqrt %314 : vector<1x256xf32>
    %c2_155 = arith.constant 2 : index
    %c0_156 = arith.constant 0 : index
    %c0_157 = arith.constant 0 : index
    %316 = vector.load %arg12[%c2_155, %c0_156, %c0_157] : memref<3x1x256xf32, #tpu.memory_space<vmem>>, vector<1x1x256xf32>
    %317 = vector.shape_cast %316 : vector<1x1x256xf32> to vector<1x256xf32>
    %318 = arith.mulf %317, %315 : vector<1x256xf32>
    %c2_158 = arith.constant 2 : index
    %c0_159 = arith.constant 0 : index
    %c0_160 = arith.constant 0 : index
    %319 = vector.load %arg13[%c2_158, %c0_159, %c0_160] : memref<3x1x256xf32, #tpu.memory_space<vmem>>, vector<1x1x256xf32>
    %320 = vector.shape_cast %319 : vector<1x1x256xf32> to vector<1x256xf32>
    %321 = arith.mulf %295, %318 : vector<1x256xf32>
    %322 = arith.subf %320, %321 : vector<1x256xf32>
    %323 = vector.extract_strided_slice %5 {offsets = [0, 1024], sizes = [2, 256], strides = [1, 1]} : vector<2x1536xf32> to vector<2x256xf32>
    %324 = vector.extract_strided_slice %5 {offsets = [0, 1280], sizes = [2, 256], strides = [1, 1]} : vector<2x1536xf32> to vector<2x256xf32>
    %325 = vector.broadcast %318 : vector<1x256xf32> to vector<2x256xf32>
    %326 = arith.mulf %323, %325 : vector<2x256xf32>
    %327 = vector.extract_strided_slice %326 {offsets = [0, 0], sizes = [1, 256], strides = [1, 1]} : vector<2x256xf32> to vector<1x256xf32>
    %328 = vector.shape_cast %327 : vector<1x256xf32> to vector<1x256xf32>
    %329 = vector.broadcast %328 : vector<1x256xf32> to vector<16x256xf32>
    %330 = vector.extract_strided_slice %326 {offsets = [1, 0], sizes = [1, 256], strides = [1, 1]} : vector<2x256xf32> to vector<1x256xf32>
    %331 = vector.shape_cast %330 : vector<1x256xf32> to vector<1x256xf32>
    %332 = vector.broadcast %331 : vector<1x256xf32> to vector<16x256xf32>
    %333 = tpu.concatenate %329, %332 in 0 : vector<16x256xf32>, vector<16x256xf32> -> vector<32x256xf32>
    %334 = vector.broadcast %322 : vector<1x256xf32> to vector<2x256xf32>
    %335 = arith.mulf %323, %334 : vector<2x256xf32>
    %336 = arith.addf %335, %324 : vector<2x256xf32>
    %337 = vector.extract_strided_slice %336 {offsets = [0, 0], sizes = [1, 256], strides = [1, 1]} : vector<2x256xf32> to vector<1x256xf32>
    %338 = vector.shape_cast %337 : vector<1x256xf32> to vector<1x256xf32>
    %339 = vector.broadcast %338 : vector<1x256xf32> to vector<16x256xf32>
    %340 = vector.extract_strided_slice %336 {offsets = [1, 0], sizes = [1, 256], strides = [1, 1]} : vector<2x256xf32> to vector<1x256xf32>
    %341 = vector.shape_cast %340 : vector<1x256xf32> to vector<1x256xf32>
    %342 = vector.broadcast %341 : vector<1x256xf32> to vector<16x256xf32>
    %343 = tpu.concatenate %339, %342 in 0 : vector<16x256xf32>, vector<16x256xf32> -> vector<32x256xf32>
    %344 = arith.mulf %283, %333 : vector<32x256xf32>
    %345 = arith.addf %344, %343 : vector<32x256xf32>
    %cst_161 = arith.constant 0.000000e+00 : f32
    %346 = vector.broadcast %cst_161 : f32 to vector<32x256xf32>
    %347 = arith.maximumf %345, %346 : vector<32x256xf32>
    %348 = arith.addf %347, %259 : vector<32x256xf32>
    %349 = arith.truncf %348 : vector<32x256xf32> to vector<32x256xbf16>
    %c0_162 = arith.constant 0 : index
    %c0_163 = arith.constant 0 : index
    %c0_164 = arith.constant 0 : index
    %350 = vector.load %arg14[%c0_162, %c0_163, %c0_164] : memref<3x256x128xbf16, #tpu.memory_space<vmem>>, vector<1x256x128xbf16>
    %351 = vector.shape_cast %350 : vector<1x256x128xbf16> to vector<256x128xbf16>
    %cst_165 = arith.constant dense<0.000000e+00> : vector<32x128xf32>
    %352 = tpu.matmul %349, %351, %cst_165 {dimension_numbers = #tpu.dot_dimension_numbers<[1], [0], [0], [1], [0, 0, 1, 1], [], []>} : vector<32x256xbf16>, vector<256x128xbf16>, vector<32x128xf32> -> vector<32x128xf32>
    %c31_i32_166 = arith.constant 31 : i32
    %353 = tpu.dynamic_rotate %348 by %c31_i32_166 dim 0 : vector<32x256xf32>, i32 -> vector<32x256xf32>
    %354 = arith.truncf %353 : vector<32x256xf32> to vector<32x256xbf16>
    %c1_167 = arith.constant 1 : index
    %c0_168 = arith.constant 0 : index
    %c0_169 = arith.constant 0 : index
    %355 = vector.load %arg14[%c1_167, %c0_168, %c0_169] : memref<3x256x128xbf16, #tpu.memory_space<vmem>>, vector<1x256x128xbf16>
    %356 = vector.shape_cast %355 : vector<1x256x128xbf16> to vector<256x128xbf16>
    %cst_170 = arith.constant dense<0.000000e+00> : vector<32x128xf32>
    %357 = tpu.matmul %354, %356, %cst_170 {dimension_numbers = #tpu.dot_dimension_numbers<[1], [0], [0], [1], [0, 0, 1, 1], [], []>} : vector<32x256xbf16>, vector<256x128xbf16>, vector<32x128xf32> -> vector<32x128xf32>
    %358 = arith.addf %352, %357 : vector<32x128xf32>
    %c30_i32 = arith.constant 30 : i32
    %359 = tpu.dynamic_rotate %348 by %c30_i32 dim 0 : vector<32x256xf32>, i32 -> vector<32x256xf32>
    %360 = arith.truncf %359 : vector<32x256xf32> to vector<32x256xbf16>
    %c2_171 = arith.constant 2 : index
    %c0_172 = arith.constant 0 : index
    %c0_173 = arith.constant 0 : index
    %361 = vector.load %arg14[%c2_171, %c0_172, %c0_173] : memref<3x256x128xbf16, #tpu.memory_space<vmem>>, vector<1x256x128xbf16>
    %362 = vector.shape_cast %361 : vector<1x256x128xbf16> to vector<256x128xbf16>
    %cst_174 = arith.constant dense<0.000000e+00> : vector<32x128xf32>
    %363 = tpu.matmul %360, %362, %cst_174 {dimension_numbers = #tpu.dot_dimension_numbers<[1], [0], [0], [1], [0, 0, 1, 1], [], []>} : vector<32x256xbf16>, vector<256x128xbf16>, vector<32x128xf32> -> vector<32x128xf32>
    %364 = arith.addf %358, %363 : vector<32x128xf32>
    %c0_175 = arith.constant 0 : index
    %c0_176 = arith.constant 0 : index
    %365 = vector.load %arg15[%c0_175, %c0_176] : memref<16x128xf32, #tpu.memory_space<vmem>>, vector<16x128xf32>
    %366 = tpu.concatenate %365, %365 in 0 : vector<16x128xf32>, vector<16x128xf32> -> vector<32x128xf32>
    %367 = arith.addf %364, %366 : vector<32x128xf32>
    %c0_177 = arith.constant 0 : index
    %c0_178 = arith.constant 0 : index
    %368 = vector.load %arg16[%c0_177, %c0_178] : memref<32x128xf32, #tpu.memory_space<vmem>>, vector<32x128xf32>
    tpu.vector_store %arg16[%c0_177, %c0_178], %367 {strides = array<i32>} : memref<32x128xf32, #tpu.memory_space<vmem>>, vector<32x128xf32>,
    return
  }
  func.func @transform_0(%arg0: i32) -> (i32, i32) {
    %c0_i32 = arith.constant 0 : i32
    %c0_i32_0 = arith.constant 0 : i32
    %c0_i32_1 = arith.constant 0 : i32
    return %c0_i32, %c0_i32_0 : i32, i32
  }
  func.func @transform_1(%arg0: i32) -> (i32, i32) {
    %c0_i32 = arith.constant 0 : i32
    %c0_i32_0 = arith.constant 0 : i32
    %c0_i32_1 = arith.constant 0 : i32
    return %c0_i32, %c0_i32_0 : i32, i32
  }
  func.func @transform_2(%arg0: i32) -> (i32, i32) {
    %c0_i32 = arith.constant 0 : i32
    %c0_i32_0 = arith.constant 0 : i32
    %c0_i32_1 = arith.constant 0 : i32
    return %c0_i32, %c0_i32_0 : i32, i32
  }
  func.func @transform_3(%arg0: i32) -> (i32, i32) {
    %c0_i32 = arith.constant 0 : i32
    %c0_i32_0 = arith.constant 0 : i32
    %c0_i32_1 = arith.constant 0 : i32
    return %c0_i32, %c0_i32_0 : i32, i32
  }
  func.func @transform_4(%arg0: i32) -> (i32, i32) {
    %c0_i32 = arith.constant 0 : i32
    %c0_i32_0 = arith.constant 0 : i32
    %c0_i32_1 = arith.constant 0 : i32
    return %c0_i32, %c0_i32_0 : i32, i32
  }
  func.func @transform_5(%arg0: i32) -> (i32, i32, i32) {
    %c0_i32 = arith.constant 0 : i32
    %c0_i32_0 = arith.constant 0 : i32
    %c0_i32_1 = arith.constant 0 : i32
    %c0_i32_2 = arith.constant 0 : i32
    return %c0_i32, %c0_i32_0, %c0_i32_1 : i32, i32, i32
  }
  func.func @transform_6(%arg0: i32) -> (i32, i32) {
    %c0_i32 = arith.constant 0 : i32
    %c0_i32_0 = arith.constant 0 : i32
    %c0_i32_1 = arith.constant 0 : i32
    return %c0_i32, %c0_i32_0 : i32, i32
  }
  func.func @transform_7(%arg0: i32) -> (i32, i32) {
    %c0_i32 = arith.constant 0 : i32
    %c0_i32_0 = arith.constant 0 : i32
    %c0_i32_1 = arith.constant 0 : i32
    return %c0_i32, %c0_i32_0 : i32, i32
  }
  func.func @transform_8(%arg0: i32) -> (i32, i32, i32) {
    %c0_i32 = arith.constant 0 : i32
    %c0_i32_0 = arith.constant 0 : i32
    %c0_i32_1 = arith.constant 0 : i32
    %c0_i32_2 = arith.constant 0 : i32
    return %c0_i32, %c0_i32_0, %c0_i32_1 : i32, i32, i32
  }
  func.func @transform_9(%arg0: i32) -> (i32, i32, i32) {
    %c0_i32 = arith.constant 0 : i32
    %c0_i32_0 = arith.constant 0 : i32
    %c0_i32_1 = arith.constant 0 : i32
    %c0_i32_2 = arith.constant 0 : i32
    return %c0_i32, %c0_i32_0, %c0_i32_1 : i32, i32, i32
  }
  func.func @transform_10(%arg0: i32) -> (i32, i32, i32) {
    %c0_i32 = arith.constant 0 : i32
    %c0_i32_0 = arith.constant 0 : i32
    %c0_i32_1 = arith.constant 0 : i32
    %c0_i32_2 = arith.constant 0 : i32
    return %c0_i32, %c0_i32_0, %c0_i32_1 : i32, i32, i32
  }
  func.func @transform_11(%arg0: i32) -> (i32, i32, i32) {
    %c0_i32 = arith.constant 0 : i32
    %c0_i32_0 = arith.constant 0 : i32
    %c0_i32_1 = arith.constant 0 : i32
    %c0_i32_2 = arith.constant 0 : i32
    return %c0_i32, %c0_i32_0, %c0_i32_1 : i32, i32, i32
  }
  func.func @transform_12(%arg0: i32) -> (i32, i32, i32) {
    %c0_i32 = arith.constant 0 : i32
    %c0_i32_0 = arith.constant 0 : i32
    %c0_i32_1 = arith.constant 0 : i32
    %c0_i32_2 = arith.constant 0 : i32
    return %c0_i32, %c0_i32_0, %c0_i32_1 : i32, i32, i32
  }
  func.func @transform_13(%arg0: i32) -> (i32, i32, i32) {
    %c0_i32 = arith.constant 0 : i32
    %c0_i32_0 = arith.constant 0 : i32
    %c0_i32_1 = arith.constant 0 : i32
    %c0_i32_2 = arith.constant 0 : i32
    return %c0_i32, %c0_i32_0, %c0_i32_1 : i32, i32, i32
  }
  func.func @transform_14(%arg0: i32) -> (i32, i32) {
    %c0_i32 = arith.constant 0 : i32
    %c0_i32_0 = arith.constant 0 : i32
    %c0_i32_1 = arith.constant 0 : i32
    return %c0_i32, %c0_i32_0 : i32, i32
  }
  func.func @transform_15(%arg0: i32) -> (i32, i32) {
    %c0_i32 = arith.constant 0 : i32
    %c0_i32_0 = arith.constant 0 : i32
    %c0_i32_1 = arith.constant 0 : i32
    return %c0_i32, %c0_i32_0 : i32, i32
  }
}

</mosaic_0001>

<bundles_post_ra>
// kernel: film_module_forward.1
= control target key start
LH: loop header
LB: loop body
LE: loop exit
PB: predicated region body
PF: predicated region fallthrough
CT: control target
= control target key end

     0   :  { %v7081_v1 = vmov 0   ;;  %vm260_vm0 = vcmask 261120   ;;  %vm572_vm1 = vcmask 523264   ;;  %v80_v36 = vlaneseq  ;;  %s7082_s24 = smov 16   ;;  %s7083_s18 = smov 32   ;;  %s9671_s6 = inlined_call_operand.vmem [shape: bf16[32,1536], index: 6, kind: input, shape index: {}]   ;;  %s9672_s1 = inlined_call_operand.vmem [shape: bf16[2,32], index: 1, kind: input, shape index: {}]   ;;  %s9673_s2 = inlined_call_operand.vmem [shape: bf16[64,256], index: 2, kind: input, shape index: {}]   ;;  %s9674_s0 = inlined_call_operand.vmem [shape: bf16[32,64], index: 0, kind: input, shape index: {}]   ;;  %s9675_s7 = inlined_call_operand.vmem [shape: f32[1,1536], index: 7, kind: input, shape index: {}]   ;;  %s9676_s9 = inlined_call_operand.vmem [shape: bf16[3,256,256], index: 9, kind: input, shape index: {}]   ;;  %s9677_s5 = inlined_call_operand.vmem [shape: f32[3,32,1], index: 5, kind: input, shape index: {}]   ;;  %s9678_s10 = inlined_call_operand.vmem [shape: bf16[9,256,256], index: 10, kind: input, shape index: {}]   ;;  %s9679_s3 = inlined_call_operand.vmem [shape: f32[1,256], index: 3, kind: input, shape index: {}]   ;;  %s9680_s4 = inlined_call_operand.vmem [shape: f32[1,256], index: 4, kind: input, shape index: {}]   ;;  %s9681_s8 = inlined_call_operand.vmem [shape: f32[3,16,256], index: 8, kind: input, shape index: {}]   ;;  %s9682_s11 = inlined_call_operand.vmem [shape: f32[3,1,256], index: 11, kind: input, shape index: {}]   ;;  %s9683_s12 = inlined_call_operand.vmem [shape: f32[3,1,256], index: 12, kind: input, shape index: {}]   ;;  %s9684_s13 = inlined_call_operand.vmem [shape: bf16[3,256,128], index: 13, kind: input, shape index: {}]   ;;  %s9685_s14 = inlined_call_operand.vmem [shape: f32[16,128], index: 14, kind: input, shape index: {}]   ;;  %s9686_s15 = inlined_call_operand.vmem [shape: f32[32,128], index: 15, kind: output, shape index: {}]  }
   0x1   :  { %v6397_v0 = vld [vmem:[%s9671_s6 + $0x4] ss:$48 sps:$4 sm:$0xff]   ;;  %296 = vmatprep.mubr.bf16.mxu1 %v7081_v1  ;;  %6396 = vset.pattern.permute.xlu1 %v7081_v1  ;;  %v6399_v2 = vld [vmem:[%s9671_s6] ss:$48 sps:$4 sm:$0xff]   ;;  %v6405_v5 = vld [vmem:[%s9671_s6 + $0xc] ss:$48 sps:$4 sm:$0xff]  }
   0x2   :  { %6395 = vset.pattern.permute.xlu0 %v7081_v1  ;;  %378 = vmatprep.mubr.bf16.mxu0 %v7081_v1  ;;  %v6400_v3 = vld [vmem:[%s9671_s6 + $0x64] ss:$48 sps:$4 sm:$0xff]   ;;  %v6402_v4 = vld [vmem:[%s9671_s6 + $0x60] ss:$48 sps:$4 sm:$0xff]   ;;  %v6403_v7 = vld [vmem:[%s9671_s6 + $0x8] ss:$48 sps:$4 sm:$0xff]  }
   0x3   :  { %264 = vmatprep.subr.bf16.mxu1 %v6397_v0  ;;  %v7188_v6 = vld [vmem:[%s9672_s1] sm:$0x1]  ;;  %v6408_v8 = vld [vmem:[%s9671_s6 + $0x6c] ss:$48 sps:$4 sm:$0xff]   ;;  %v6406_v9 = vld [vmem:[%s9671_s6 + $0x68] ss:$48 sps:$4 sm:$0xff]  }
   0x4   :  { %265 = vmatpush1.bf16.msra.mxu1 %v6399_v2  ;;  %v6411_v10 = vld [vmem:[%s9671_s6 + $0x1c] ss:$48 sps:$4 sm:$0xff]   ;;  %v6409_v11 = vld [vmem:[%s9671_s6 + $0x18] ss:$48 sps:$4 sm:$0xff]   ;;  %v6433_v26 = vld [vmem:[%s9674_s0] sm:$0xff]   ;;  %v7277_v38 = vshrl.u32 %v80_v36, 7 }
   0x5   :  { %266 = vmatprep.subr.bf16.mxu1 %v6400_v3  ;;  %v6414_v12 = vld [vmem:[%s9671_s6 + $0x7c] ss:$48 sps:$4 sm:$0xff]   ;;  %v6412_v13 = vld [vmem:[%s9671_s6 + $0x78] ss:$48 sps:$4 sm:$0xff]   ;;  %s7084_s19 = smov 64  }
   0x6   :  { %v6417_v14 = vld [vmem:[%s9671_s6 + $0x2c] ss:$48 sps:$4 sm:$0xff]   ;;  %v6415_v15 = vld [vmem:[%s9671_s6 + $0x28] ss:$48 sps:$4 sm:$0xff]   ;;  %v9688_v42 = vsub.s32 2, %v7277_v38  ;;  %v9687_v44 = vsub.s32 3, %v7277_v38 }
   0x7   :  { %v6420_v16 = vld [vmem:[%s9671_s6 + $0x8c] ss:$48 sps:$4 sm:$0xff]   ;;  %v6418_v17 = vld [vmem:[%s9671_s6 + $0x88] ss:$48 sps:$4 sm:$0xff]   ;;  %vm1096_vm5 = vcmp.lt.s32.totalorder %v7277_v38, 1  ;;  %vm1644_vm6 = vcmp.lt.s32.totalorder %v7277_v38, 7 }
   0x8   :  { %267 = vmatpush1.bf16.msra.mxu1 %v6402_v4  ;;  %v6423_v18 = vld [vmem:[%s9673_s2 + $0x4] ss:$8 sps:$4 sm:$0xff]   ;;  %v6421_v19 = vld [vmem:[%s9673_s2] ss:$8 sps:$4 sm:$0xff]   ;;  %v6426_v20 = vld [vmem:[%s9673_s2 + $0x14] ss:$8 sps:$4 sm:$0xff]  }
   0x9   :  { %305 = vmatprep.subr.bf16.mxu1 %v6405_v5  ;;  %v6424_v21 = vld [vmem:[%s9673_s2 + $0x10] ss:$8 sps:$4 sm:$0xff]   ;;  %v6429_v22 = vld [vmem:[%s9673_s2 + $0x24] ss:$8 sps:$4 sm:$0xff]   ;;  %v6427_v23 = vld [vmem:[%s9673_s2 + $0x20] ss:$8 sps:$4 sm:$0xff]  }
   0xa   :  { %v6432_v24 = vld [vmem:[%s9673_s2 + $0x34] ss:$8 sps:$4 sm:$0xff]   ;;  %v6430_v25 = vld [vmem:[%s9673_s2 + $0x30] ss:$8 sps:$4 sm:$0xff]   ;;  %v6434_v27 = vld [vmem:[%s9674_s0 + $0x8] sm:$0xff]   ;;  %vm5175_vm7 = vcmp.lt.s32.totalorder %v7277_v38, 6 }
   0xb   :  { %5408 = vmatmul.mubr.msk.bf16.vlgmr.msra.gmra.mrb[0].mxu1 %vm260_vm0, %v7188_v6  ;;  %v77_v41 = vld [vmem:[%s9675_s7 + $0x8] sm:$0xf] }
   0xc   :  { %306 = vmatpush1.bf16.msra.mxu1 %v6403_v7  ;;  %337 = vmatprep.mubr.bf16.mxu1 %v7081_v1  ;;  %v123_v45 = vrot.slane %v77_v41, %v9688_v42  ;;  %v127_v46 = vrot.slane %v77_v41, %v9687_v44 }
   0xd   :  { %307 = vmatprep.subr.bf16.mxu1 %v6408_v8 }
  0x10   :  { %308 = vmatpush1.bf16.msra.mxu1 %v6406_v9 }
  0x11   :  { %387 = vmatprep.subr.bf16.mxu1 %v6411_v10 }
  0x13   :  { %5409 = vmatmul.mubr.msk.bf16.vlgmr.msra.gmra.mrb[4].mxu1 %vm260_vm0, %v7188_v6 }
  0x14   :  { %388 = vmatpush1.bf16.msra.mxu1 %v6409_v11  ;;  %419 = vmatprep.mubr.bf16.mxu1 %v7081_v1 }
  0x15   :  { %389 = vmatprep.subr.bf16.mxu1 %v6414_v12 }
  0x18   :  { %390 = vmatpush1.bf16.msra.mxu1 %v6412_v13 }
  0x19   :  { %469 = vmatprep.subr.bf16.mxu1 %v6417_v14 }
  0x1b   :  { %5411 = vmatmul.mubr.msk.bf16.vlgmr.msra.gmra.mrb[8].mxu1 %vm260_vm0, %v7188_v6 }
  0x1c   :  { %470 = vmatpush1.bf16.msra.mxu1 %v6415_v15  ;;  %501 = vmatprep.mubr.bf16.mxu1 %v7081_v1 }
  0x1d   :  { %471 = vmatprep.subr.bf16.mxu1 %v6420_v16 }
  0x20   :  { %472 = vmatpush1.bf16.msra.mxu1 %v6418_v17 }
  0x21   :  { %579 = vmatprep.subr.bf16.mxu1 %v6423_v18 }
  0x23   :  { %5413 = vmatmul.mubr.msk.bf16.vlgmr.msra.gmra.mrb[12].mxu1 %vm260_vm0, %v7188_v6 }
  0x24   :  { %580 = vmatpush1.bf16.msra.mxu1 %v6421_v19  ;;  %611 = vmatprep.mubr.bf16.mxu1 %v7081_v1 }
  0x25   :  { %581 = vmatprep.subr.bf16.mxu1 %v6426_v20 }
  0x28   :  { %582 = vmatpush1.bf16.msra.mxu1 %v6424_v21 }
  0x29   :  { %583 = vmatprep.subr.bf16.mxu1 %v6429_v22 }
  0x2c   :  { %584 = vmatpush1.bf16.msra.mxu1 %v6427_v23 }
  0x2d   :  { %585 = vmatprep.subr.bf16.mxu1 %v6432_v24 }
  0x30   :  { %586 = vmatpush1.bf16.msra.mxu1 %v6430_v25 }
  0x33   :  { %5424 = vmatmul.mubr.msk.bf16.vlgmr.msra.gmra.mrb[16].mxu1 %vm572_vm1, %v6433_v26 }
  0x34   :  { %621 = vmatprep.mubr.bf16.mxu1 %v7081_v1 }
  0x3b   :  { %5425 = vmatmul.mubr.msk.bf16.gmra.mrb[20].mxu1 %vm572_vm1, %v6434_v27 }
  0xde   :  { %v7266_v28 = vpop.f32.mrb[0].mxu1 }
  0xdf   :  { %v7268_v29 = vpop.f32.mrb[1].mxu1 }
  0xe0   :  { %v302_v30 = vpop.f32.mrb[2].mxu1 }
  0xe1   :  { %v303_v31 = vpop.f32.mrb[3].mxu1 }
  0xe6   :  { %v7270_v32 = vpop.f32.mrb[4].mxu1 }
  0xe7   :  { %v7272_v33 = vpop.f32.mrb[5].mxu1 }
  0xe8   :  { %v343_v34 = vpop.f32.mrb[6].mxu1 }
  0xe9   :  { %v344_v35 = vpop.f32.mrb[7].mxu1 }
  0xee   :  { %v7274_v37 = vpop.f32.mrb[8].mxu1 }
  0xef   :  { %v7279_v39 = vpop.f32.mrb[9].mxu1 }
  0xf0   :  { %v425_v40 = vpop.f32.mrb[10].mxu1 }
  0xf1   :  { %v426_v43 = vpop.f32.mrb[11].mxu1 }
  0xf6   :  { %v503_v47 = vpop.f32.mrb[12].mxu1 }
  0xf7   :  { %v7290_v48 = vadd.f32 %v503_v47, %v123_v45  ;;  %v505_v49 = vpop.f32.mrb[13].mxu1 }
  0xf8   :  { %v7292_v50 = vadd.f32 %v505_v49, %v127_v46  ;;  %v507_v51 = vpop.f32.mrb[14].mxu1 }
  0xf9   :  { %9689 = vst [vmem:[#allocation2_spill] sm:$0xff] %v7290_v48  ;;  %v508_v52 = vpop.f32.mrb[15].mxu1 }
  0xfa   :  { %9690 = vst [vmem:[#allocation3_spill] sm:$0xff] %v7292_v50 }
 0x106   :  { %v7294_v53 = vpop.f32.mrb[16].mxu1 }
 0x107   :  { %v7296_v54 = vpop.f32.mrb[17].mxu1  ;;  %v681_v56 = vmul.f32 %v7294_v53, %v7294_v53 }
 0x108   :  { %v7298_v55 = vpop.f32.mrb[18].mxu1  ;;  %v682_v60 = vmul.f32 %v7296_v54, %v7296_v54 }
 0x109   :  { %v632_v57 = vadd.f32 %v7298_v55, %v7294_v53  ;;  %v683_v58 = vmul.f32 %v7298_v55, %v7298_v55  ;;  %v7306_v59 = vpop.f32.mrb[19].mxu1 }
 0x10a   :  { %v641_v61 = vadd.f32 %v7306_v59, %v7296_v54  ;;  %v684_v62 = vmul.f32 %v7306_v59, %v7306_v59 }
 0x10b   :  { %v689_v63 = vadd.f32 %v683_v58, %v681_v56  ;;  %v7339_v58 = vand.u32 127, %v80_v36 }
 0x10c   :  { %v698_v0 = vadd.f32 %v684_v62, %v682_v60  ;;  %v6435_v62 = vld [vmem:[%s9676_s9] ss:$8 sps:$4 sm:$0xff]  }
 0x10d   :  { %vm656_vm2 = vcmp.lt.s32.totalorder %v7339_v58, 16  ;;  %vm665_vm3 = vcmp.lt.s32.totalorder %v7339_v58, 32  ;;  %vm674_vm4 = vcmp.lt.s32.totalorder %v7339_v58, 64  ;;  %v7080_v58 = vld [vmem:[%s9675_s7 + $0x8] sm:$0xf] }
 0x10e   :  { %v7314_v2 = vpop.f32.mrb[20].mxu1 }
 0x10f   :  { %v633_v3 = vadd.f32 %v632_v57, %v7314_v2  ;;  %v685_v4 = vmul.f32 %v7314_v2, %v7314_v2  ;;  %v7319_v5 = vpop.f32.mrb[21].mxu1 }
 0x110   :  { %v642_v7 = vadd.f32 %v641_v61, %v7319_v5  ;;  %v686_v8 = vmul.f32 %v7319_v5, %v7319_v5  ;;  %v7324_v9 = vpop.f32.mrb[22].mxu1 }
 0x111   :  { %v690_v10 = vadd.f32 %v689_v63, %v685_v4  ;;  %v634_v11 = vadd.f32 %v633_v3, %v7324_v9  ;;  %v687_v12 = vmul.f32 %v7324_v9, %v7324_v9  ;;  %v7329_v13 = vpop.f32.mrb[23].mxu1  ;;  %v6438_v4 = vld [vmem:[%s9676_s9 + $0x10] ss:$8 sps:$4 sm:$0xff]  }
 0x112   :  { %v699_v14 = vadd.f32 %v698_v0, %v686_v8  ;;  %v643_v15 = vadd.f32 %v642_v7, %v7329_v13  ;;  %v688_v16 = vmul.f32 %v7329_v13, %v7329_v13  ;;  %v6437_v0 = vld [vmem:[%s9676_s9 + $0x4] ss:$8 sps:$4 sm:$0xff]   ;;  %v6440_v7 = vld [vmem:[%s9676_s9 + $0x14] ss:$8 sps:$4 sm:$0xff]  }
 0x113   :  { %v635_v17 = vrot.slane %v634_v11, 4  ;;  %v691_v18 = vadd.f32 %v690_v10, %v687_v12  ;;  %1025 = vmatprep.subr.bf16.mxu1 %v6437_v0  ;;  %v6470_v0 = vld [vmem:[%s9676_s9 + $0xb4] ss:$8 sps:$4 sm:$0xff]  }
 0x114   :  { %v644_v19 = vrot.slane %v643_v15, 4  ;;  %v700_v20 = vadd.f32 %v699_v14, %v688_v16  ;;  %1026 = vmatpush1.bf16.msra.mxu1 %v6435_v62  ;;  %v6467_v62 = vld [vmem:[%s9676_s9 + $0xa4] ss:$8 sps:$4 sm:$0xff]  }
 0x115   :  { %v636_v21 = vadd.f32 %v635_v17, %v634_v11  ;;  %v692_v22 = vrot.slane %v691_v18, 4  ;;  %1027 = vmatprep.subr.bf16.mxu1 %v6440_v7  ;;  %v6443_v17 = vld [vmem:[%s9676_s9 + $0x24] ss:$8 sps:$4 sm:$0xff]   ;;  %v6476_v7 = vld [vmem:[%s9676_s9 + $0xd4] ss:$8 sps:$4 sm:$0xff]  }
 0x116   :  { %v645_v23 = vadd.f32 %v644_v19, %v643_v15  ;;  %v701_v24 = vrot.slane %v700_v20, 4  ;;  %v6446_v19 = vld [vmem:[%s9676_s9 + $0x34] ss:$8 sps:$4 sm:$0xff]  }
 0x117   :  { %v637_v25 = vrot.slane %v636_v21, 2  ;;  %v693_v26 = vadd.f32 %v692_v22, %v691_v18  ;;  %v6441_v18 = vld [vmem:[%s9676_s9 + $0x20] ss:$8 sps:$4 sm:$0xff]  }
 0x118   :  { %v646_v27 = vrot.slane %v645_v23, 2  ;;  %v702_v30 = vadd.f32 %v701_v24, %v700_v20  ;;  %1028 = vmatpush1.bf16.msra.mxu1 %v6438_v4  ;;  %v6444_v20 = vld [vmem:[%s9676_s9 + $0x30] ss:$8 sps:$4 sm:$0xff]   ;;  %v6447_v22 = vld [vmem:[%s9676_s9 + $0x40] ss:$8 sps:$4 sm:$0xff]  }
 0x119   :  { %v638_v31 = vadd.f32 %v637_v25, %v636_v21  ;;  %v694_v34 = vrot.slane %v693_v26, 2  ;;  %1029 = vmatprep.subr.bf16.mxu1 %v6443_v17  ;;  %v6449_v21 = vld [vmem:[%s9676_s9 + $0x44] ss:$8 sps:$4 sm:$0xff]   ;;  %v6471_v4 = vld [vmem:[%s9676_s9 + $0xc0] ss:$8 sps:$4 sm:$0xff]  }
 0x11a   :  { %v647_v35 = vadd.f32 %v646_v27, %v645_v23  ;;  %v703_v40 = vrot.slane %v702_v30, 2  ;;  %v1106_v17 = vld [vmem:[%s9677_s5 + $0x8] sm:$0xff] }
 0x11b   :  { %v639_v41 = vrot.slane %v638_v31, 1  ;;  %v695_v43 = vadd.f32 %v694_v34, %v693_v26  ;;  %v6450_v34 = vld [vmem:[%s9676_s9 + $0x50] ss:$8 sps:$4 sm:$0xff]  }
 0x11c   :  { %v704_v45 = vadd.f32 %v703_v40, %v702_v30  ;;  %v648_v49 = vrot.slane %v647_v35, 1  ;;  %1030 = vmatpush1.bf16.msra.mxu1 %v6441_v18  ;;  %v1105_v18 = vld [vmem:[%s9677_s5] sm:$0xff] }
 0x11d   :  { %v640_v46 = vadd.f32 %v639_v41, %v638_v31  ;;  %v696_v47 = vrot.slane %v695_v43, 1  ;;  %1031 = vmatprep.subr.bf16.mxu1 %v6446_v19  ;;  %v6452_v31 = vld [vmem:[%s9676_s9 + $0x54] ss:$8 sps:$4 sm:$0xff]  }
 0x11e   :  { %v705_v52 = vrot.slane %v704_v45, 1  ;;  %v649_v56 = vadd.f32 %v648_v49, %v647_v35  ;;  %v6453_v49 = vld [vmem:[%s9676_s9 + $0x60] ss:$8 sps:$4 sm:$0xff]   ;;  %v6486_v19 = vld [vmem:[%s9671_s6 + $0x74] ss:$48 sps:$4 sm:$0xff]  }
 0x11f   :  { %650 = vrot.lane.b32.xlu0 %v640_v46, %s7082_s24  ;;  %v697_v51 = vadd.f32 %v696_v47, %v695_v43  ;;  %v6455_v47 = vld [vmem:[%s9676_s9 + $0x64] ss:$8 sps:$4 sm:$0xff]  }
 0x120   :  { %v706_v57 = vadd.f32 %v705_v52, %v704_v45  ;;  %1032 = vmatpush1.bf16.msra.mxu1 %v6444_v20  ;;  %v6456_v52 = vld [vmem:[%s9676_s9 + $0x70] ss:$8 sps:$4 sm:$0xff]  }
 0x121   :  { %707 = vrot.lane.b32.xlu1 %v697_v51, %s7082_s24  ;;  %1033 = vmatprep.subr.bf16.mxu1 %v6449_v21  ;;  %v1107_v20 = vld [vmem:[%s9677_s5 + $0x10] sm:$0xff]  ;;  %v1108_v21 = vld [vmem:[%s9677_s5 + $0x18] sm:$0xff] }
 0x123   :  { %652 = vrot.lane.b32.xlu0 %v649_v56, %s7082_s24 }
 0x124   :  { %1034 = vmatpush1.bf16.msra.mxu1 %v6447_v22  ;;  %v6488_v22 = vld [vmem:[%s9671_s6 + $0x70] ss:$48 sps:$4 sm:$0xff]  }
 0x125   :  { %709 = vrot.lane.b32.xlu1 %v706_v57, %s7082_s24  ;;  %1035 = vmatprep.subr.bf16.mxu1 %v6452_v31  ;;  %v6494_v31 = vld [vmem:[%s9671_s6 + $0x84] ss:$48 sps:$4 sm:$0xff]  }
 0x128   :  { %1036 = vmatpush1.bf16.msra.mxu1 %v6450_v34  ;;  %v5557_v34 = vld [vmem:[%s9677_s5 + $0x58] sm:$0xff] }
 0x129   :  { %1037 = vmatprep.subr.bf16.mxu1 %v6455_v47  ;;  %v6500_v47 = vld [vmem:[%s9678_s10 + $0x114] ss:$8 sps:$4 sm:$0xff]  }
 0x12c   :  { %1038 = vmatpush1.bf16.msra.mxu1 %v6453_v49  ;;  %v6503_v49 = vld [vmem:[%s9678_s10 + $0x124] ss:$8 sps:$4 sm:$0xff]  }
 0x191   :  { %v651_v60 = vpop.permute.xlu0 %650 }
 0x193   :  { %v708_v61 = vpop.permute.xlu1 %707 }
 0x195   :  { %v653_v63 = vpop.permute.xlu0 %652 }
 0x196   :  { %v657_v3 = vsel %vm656_vm2, %v651_v60, %v653_v63  ;;  %v658_v36 = vsel %vm656_vm2, %v653_v63, %v651_v60  ;;  %v6464_v60 = vld [vmem:[%s9676_s9 + $0x94] ss:$8 sps:$4 sm:$0xff]   ;;  %v6465_v63 = vld [vmem:[%s9676_s9 + $0xa0] ss:$8 sps:$4 sm:$0xff]  }
 0x197   :  { %v659_v8 = vadd.f32 %v658_v36, %v640_v46  ;;  %v660_v10 = vadd.f32 %v657_v3, %v649_v56  ;;  %v710_v11 = vpop.permute.xlu1 %709  ;;  %v6461_v56 = vld [vmem:[%s9676_s9 + $0x84] ss:$8 sps:$4 sm:$0xff]   ;;  %v6468_v3 = vld [vmem:[%s9676_s9 + $0xb0] ss:$8 sps:$4 sm:$0xff]  }
 0x198   :  { %v711_v12 = vsel %vm656_vm2, %v708_v61, %v710_v11  ;;  %v712_v14 = vsel %vm656_vm2, %v710_v11, %v708_v61  ;;  %v6462_v61 = vld [vmem:[%s9676_s9 + $0x90] ss:$8 sps:$4 sm:$0xff]   ;;  %v6473_v36 = vld [vmem:[%s9676_s9 + $0xc4] ss:$8 sps:$4 sm:$0xff]   ;;  %v6477_v11 = vld [vmem:[%s9676_s9 + $0xe0] ss:$8 sps:$4 sm:$0xff]  }
 0x199   :  { %661 = vrot.lane.b32.xlu0 %v659_v8, %s7083_s18  ;;  %663 = vrot.lane.b32.xlu1 %v660_v10, %s7083_s18  ;;  %v713_v15 = vadd.f32 %v712_v14, %v697_v51  ;;  %v714_v16 = vadd.f32 %v711_v12, %v706_v57  ;;  %v6458_v51 = vld [vmem:[%s9676_s9 + $0x74] ss:$8 sps:$4 sm:$0xff]   ;;  %v6459_v57 = vld [vmem:[%s9676_s9 + $0x80] ss:$8 sps:$4 sm:$0xff]  }
 0x19a   :  { %1039 = vmatprep.subr.bf16.mxu1 %v6458_v51  ;;  %v6482_v12 = vld [vmem:[%s9676_s9 + $0xf4] ss:$8 sps:$4 sm:$0xff]   ;;  %v6480_v14 = vld [vmem:[%s9676_s9 + $0xf0] ss:$8 sps:$4 sm:$0xff]   ;;  %v6501_v51 = vld [vmem:[%s9678_s10 + $0x120] ss:$8 sps:$4 sm:$0xff]  }
 0x19b   :  { %1040 = vmatpush1.bf16.msra.mxu1 %v6456_v52  ;;  %v6506_v52 = vld [vmem:[%s9678_s10 + $0x134] ss:$8 sps:$4 sm:$0xff]  }
 0x19c   :  { %1041 = vmatprep.subr.bf16.mxu1 %v6461_v56  ;;  %v6509_v56 = vld [vmem:[%s9678_s10 + $0x144] ss:$8 sps:$4 sm:$0xff]  }
 0x19d   :  { %715 = vrot.lane.b32.xlu0 %v713_v15, %s7083_s18  ;;  %717 = vrot.lane.b32.xlu1 %v714_v16, %s7083_s18 }
 0x19f   :  { %1042 = vmatpush1.bf16.msra.mxu1 %v6459_v57  ;;  %v6507_v57 = vld [vmem:[%s9678_s10 + $0x140] ss:$8 sps:$4 sm:$0xff]  }
 0x1a0   :  { %1043 = vmatprep.subr.bf16.mxu1 %v6464_v60  ;;  %v6512_v60 = vld [vmem:[%s9678_s10 + $0x154] ss:$8 sps:$4 sm:$0xff]  }
 0x1a3   :  { %1044 = vmatpush1.bf16.msra.mxu1 %v6462_v61  ;;  %v6510_v61 = vld [vmem:[%s9678_s10 + $0x150] ss:$8 sps:$4 sm:$0xff]  }
 0x1a4   :  { %1045 = vmatprep.subr.bf16.mxu1 %v6467_v62  ;;  %v6515_v62 = vld [vmem:[%s9678_s10 + $0x164] ss:$8 sps:$4 sm:$0xff]  }
 0x1a7   :  { %1046 = vmatpush1.bf16.msra.mxu1 %v6465_v63  ;;  %v6513_v63 = vld [vmem:[%s9678_s10 + $0x160] ss:$8 sps:$4 sm:$0xff]  }
 0x1a8   :  { %1047 = vmatprep.subr.bf16.mxu1 %v6470_v0  ;;  %v6518_v0 = vld [vmem:[%s9678_s10 + $0x174] ss:$8 sps:$4 sm:$0xff]  }
 0x1ab   :  { %1048 = vmatpush1.bf16.msra.mxu1 %v6468_v3  ;;  %v6516_v3 = vld [vmem:[%s9678_s10 + $0x170] ss:$8 sps:$4 sm:$0xff]  }
 0x1ac   :  { %1049 = vmatprep.subr.bf16.mxu1 %v6473_v36  ;;  %v6521_v36 = vld [vmem:[%s9678_s10 + $0x184] ss:$8 sps:$4 sm:$0xff]  }
 0x1af   :  { %1050 = vmatpush1.bf16.msra.mxu1 %v6471_v4  ;;  %v6519_v4 = vld [vmem:[%s9678_s10 + $0x180] ss:$8 sps:$4 sm:$0xff]  }
 0x1b0   :  { %1051 = vmatprep.subr.bf16.mxu1 %v6476_v7  ;;  %v6524_v7 = vld [vmem:[%s9678_s10 + $0x194] ss:$8 sps:$4 sm:$0xff]  }
 0x20b   :  { %v662_v23 = vpop.permute.xlu0 %661  ;;  %v664_v24 = vpop.permute.xlu1 %663 }
 0x20c   :  { %v666_v25 = vsel %vm665_vm3, %v662_v23, %v664_v24  ;;  %v667_v26 = vsel %vm665_vm3, %v664_v24, %v662_v23  ;;  %v6491_v23 = vld [vmem:[%s9671_s6 + $0x24] ss:$48 sps:$4 sm:$0xff]  }
 0x20d   :  { %v7389_v27 = vadd.f32 %v667_v26, %v659_v8  ;;  %v7391_v30 = vadd.f32 %v666_v25, %v660_v10  ;;  %v6474_v8 = vld [vmem:[%s9676_s9 + $0xd0] ss:$8 sps:$4 sm:$0xff]   ;;  %v6479_v10 = vld [vmem:[%s9676_s9 + $0xe4] ss:$8 sps:$4 sm:$0xff]  }
 0x20e   :  { %1052 = vmatpush1.bf16.msra.mxu1 %v6474_v8  ;;  %v5554_v24 = vld [vmem:[%s9677_s5 + $0x40] sm:$0xff]  ;;  %v5555_v25 = vld [vmem:[%s9677_s5 + $0x48] sm:$0xff]  ;;  %v6522_v8 = vld [vmem:[%s9678_s10 + $0x190] ss:$8 sps:$4 sm:$0xff]  }
 0x20f   :  { %v716_v35 = vpop.permute.xlu0 %715  ;;  %670 = vrot.lane.b32.xlu0 %v7389_v27, %s7084_s19  ;;  %672 = vrot.lane.b32.xlu1 %v7391_v30, %s7084_s19  ;;  %v718_v40 = vpop.permute.xlu1 %717  ;;  %v6489_v26 = vld [vmem:[%s9671_s6 + $0x20] ss:$48 sps:$4 sm:$0xff]  }
 0x210   :  { %v719_v41 = vsel %vm665_vm3, %v716_v35, %v718_v40  ;;  %v720_v43 = vsel %vm665_vm3, %v718_v40, %v716_v35  ;;  %1053 = vmatprep.subr.bf16.mxu1 %v6479_v10  ;;  %v5556_v35 = vld [vmem:[%s9677_s5 + $0x50] sm:$0xff]  ;;  %v6527_v10 = vld [vmem:[%s9678_s10 + $0x1a4] ss:$8 sps:$4 sm:$0xff]  }
 0x211   :  { %v7407_v45 = vadd.f32 %v720_v43, %v713_v15  ;;  %v7409_v46 = vadd.f32 %v719_v41, %v714_v16  ;;  %v6483_v15 = vld [vmem:[%s9671_s6 + $0x14] ss:$48 sps:$4 sm:$0xff]   ;;  %v6485_v16 = vld [vmem:[%s9671_s6 + $0x10] ss:$48 sps:$4 sm:$0xff]  }
 0x212   :  { %1054 = vmatpush1.bf16.msra.mxu1 %v6477_v11  ;;  %346 = vmatprep.subr.bf16.mxu0 %v6483_v15  ;;  %v6492_v40 = vld [vmem:[%s9671_s6 + $0x80] ss:$48 sps:$4 sm:$0xff]   ;;  %v6497_v41 = vld [vmem:[%s9678_s10 + $0x104] ss:$8 sps:$4 sm:$0xff]  }
 0x213   :  { %723 = vrot.lane.b32.xlu0 %v7407_v45, %s7084_s19  ;;  %725 = vrot.lane.b32.xlu1 %v7409_v46, %s7084_s19  ;;  %v6495_v43 = vld [vmem:[%s9678_s10 + $0x100] ss:$8 sps:$4 sm:$0xff]   ;;  %v6533_v15 = vld [vmem:[%s9678_s10 + $0x1c4] ss:$8 sps:$4 sm:$0xff]  }
 0x214   :  { %1055 = vmatprep.subr.bf16.mxu1 %v6482_v12  ;;  %347 = vmatpush1.bf16.msra.mxu0 %v6485_v16  ;;  %v6525_v11 = vld [vmem:[%s9678_s10 + $0x1a0] ss:$8 sps:$4 sm:$0xff]   ;;  %v6530_v12 = vld [vmem:[%s9678_s10 + $0x1b4] ss:$8 sps:$4 sm:$0xff]  }
 0x215   :  { %348 = vmatprep.subr.bf16.mxu0 %v6486_v19 }
 0x216   :  { %1056 = vmatpush1.bf16.msra.mxu1 %v6480_v14  ;;  %v6528_v14 = vld [vmem:[%s9678_s10 + $0x1b0] ss:$8 sps:$4 sm:$0xff]  }
 0x217   :  { %1116 = vperm.xlu1 %6396, %v1106_v17   ;;  %1111 = vperm.xlu0 %6395, %v1105_v18   ;;  %v6531_v18 = vld [vmem:[%s9678_s10 + $0x1c0] ss:$8 sps:$4 sm:$0xff]  }
 0x218   :  { %349 = vmatpush1.bf16.msra.mxu0 %v6488_v22 }
 0x219   :  { %428 = vmatprep.subr.bf16.mxu0 %v6491_v23 }
 0x21b   :  { %1121 = vperm.xlu1 %6396, %v1107_v20   ;;  %1126 = vperm.xlu0 %6395, %v1108_v21   ;;  %v6536_v21 = vld [vmem:[%s9678_s10 + $0x1d4] ss:$8 sps:$4 sm:$0xff]  }
 0x21c   :  { %5410 = vmatmul.mubr.msk.bf16.vlgmr.msra.gmra.mrb[0].mxu0 %vm260_vm0, %v7188_v6 }
 0x21d   :  { %429 = vmatpush1.bf16.msra.mxu0 %v6489_v26  ;;  %460 = vmatprep.mubr.bf16.mxu0 %v7081_v1  ;;  %v6498_v1 = vld [vmem:[%s9678_s10 + $0x110] ss:$8 sps:$4 sm:$0xff]  }
 0x21e   :  { %430 = vmatprep.subr.bf16.mxu0 %v6494_v31  ;;  %v6534_v31 = vld [vmem:[%s9678_s10 + $0x1d0] ss:$8 sps:$4 sm:$0xff]  }
 0x21f   :  { %1660 = vperm.xlu1 %6396, %v5554_v24   ;;  %1665 = vperm.xlu0 %6395, %v5555_v25  }
 0x221   :  { %431 = vmatpush1.bf16.msra.mxu0 %v6492_v40 }
 0x222   :  { %1370 = vmatprep.subr.bf16.mxu0 %v6497_v41 }
 0x223   :  { %1675 = vperm.xlu0 %6395, %v5557_v34   ;;  %1670 = vperm.xlu1 %6396, %v5556_v35  }
 0x224   :  { %5412 = vmatmul.mubr.msk.bf16.vlgmr.msra.gmra.mrb[4].mxu0 %vm260_vm0, %v7188_v6  ;;  %v6504_v6 = vld [vmem:[%s9678_s10 + $0x130] ss:$8 sps:$4 sm:$0xff]  }
 0x225   :  { %1371 = vmatpush1.bf16.msra.mxu0 %v6495_v43 }
 0x226   :  { %1372 = vmatprep.subr.bf16.mxu0 %v6500_v47 }
 0x229   :  { %1373 = vmatpush1.bf16.msra.mxu0 %v6498_v1 }
 0x22a   :  { %1374 = vmatprep.subr.bf16.mxu0 %v6503_v49 }
 0x22d   :  { %1375 = vmatpush1.bf16.msra.mxu0 %v6501_v51 }
 0x22e   :  { %1376 = vmatprep.subr.bf16.mxu0 %v6506_v52  ;;  %v7085_v52 = vmov 1966171168  }
 0x231   :  { %1377 = vmatpush1.bf16.msra.mxu0 %v6504_v6  ;;  %v742_v6 = vunpack.c.l.s4 %v7085_v52  ;;  %v6537_v52 = vld [vmem:[%s9678_s10 + $0x1e0] ss:$8 sps:$4 sm:$0xff]  }
 0x232   :  { %1378 = vmatprep.subr.bf16.mxu0 %v6509_v56 }
 0x233   :  { %v743_v56 = vunpack.c.0.s8 %v742_v6  ;;  %v6542_v6 = vld [vmem:[%s9678_s10 + $0x1f4] ss:$8 sps:$4 sm:$0xff]  }
 0x235   :  { %1379 = vmatpush1.bf16.msra.mxu0 %v6507_v57  ;;  %v7626_v57 = vsub.s32 %v743_v56, %v7277_v38  ;;  %v6540_v56 = vld [vmem:[%s9678_s10 + $0x1f0] ss:$8 sps:$4 sm:$0xff]  }
 0x236   :  { %1380 = vmatprep.subr.bf16.mxu0 %v6512_v60 }
 0x239   :  { %1381 = vmatpush1.bf16.msra.mxu0 %v6510_v61 }
 0x23a   :  { %1382 = vmatprep.subr.bf16.mxu0 %v6515_v62 }
 0x23d   :  { %1383 = vmatpush1.bf16.msra.mxu0 %v6513_v63  ;;  %v7634_v63 = vsub.s32 0, %v7277_v38 }
 0x23e   :  { %1384 = vmatprep.subr.bf16.mxu0 %v6518_v0  ;;  %v7637_v0 = vsub.s32 1, %v7277_v38 }
 0x241   :  { %1385 = vmatpush1.bf16.msra.mxu0 %v6516_v3 }
 0x242   :  { %1386 = vmatprep.subr.bf16.mxu0 %v6521_v36 }
 0x245   :  { %1387 = vmatpush1.bf16.msra.mxu0 %v6519_v4 }
 0x246   :  { %1388 = vmatprep.subr.bf16.mxu0 %v6524_v7 }
 0x249   :  { %1389 = vmatpush1.bf16.msra.mxu0 %v6522_v8 }
 0x24a   :  { %1390 = vmatprep.subr.bf16.mxu0 %v6527_v10 }
 0x24d   :  { %1391 = vmatpush1.bf16.msra.mxu0 %v6525_v11  ;;  %v757_v11 = vld [vmem:[%s9680_s4] sm:$0x3] }
 0x24e   :  { %1392 = vmatprep.subr.bf16.mxu0 %v6530_v12 }
 0x251   :  { %1393 = vmatpush1.bf16.msra.mxu0 %v6528_v14 }
 0x252   :  { %1394 = vmatprep.subr.bf16.mxu0 %v6533_v15 }
 0x255   :  { %1395 = vmatpush1.bf16.msra.mxu0 %v6531_v18 }
 0x256   :  { %1396 = vmatprep.subr.bf16.mxu0 %v6536_v21 }
 0x259   :  { %1397 = vmatpush1.bf16.msra.mxu0 %v6534_v31 }
 0x281   :  { %v671_v16 = vpop.permute.xlu0 %670  ;;  %v673_v17 = vpop.permute.xlu1 %672 }
 0x282   :  { %v675_v19 = vsel %vm674_vm4, %v671_v16, %v673_v17  ;;  %v676_v20 = vsel %vm674_vm4, %v673_v17, %v671_v16 }
 0x283   :  { %v677_v22 = vadd.f32 %v676_v20, %v7389_v27  ;;  %v678_v23 = vadd.f32 %v675_v19, %v7391_v30 }
 0x285   :  { %v679_v24 = vadd.f32 %v678_v23, %v677_v22  ;;  %v724_v25 = vpop.permute.xlu0 %723  ;;  %v726_v26 = vpop.permute.xlu1 %725 }
 0x286   :  { %v727_v34 = vsel %vm674_vm4, %v724_v25, %v726_v26  ;;  %v728_v35 = vsel %vm674_vm4, %v726_v26, %v724_v25 }
 0x287   :  { %v680_v40 = vmul.f32 0.001953125, %v679_v24  ;;  %v729_v27 = vadd.f32 %v728_v35, %v7407_v45  ;;  %v730_v30 = vadd.f32 %v727_v34, %v7409_v46  ;;  %v738_v46 = vld [vmem:[%s9679_s3] sm:$0x3] }
 0x289   :  { %v731_v41 = vadd.f32 %v730_v30, %v729_v27  ;;  %v733_v43 = vmul.f32 %v680_v40, %v680_v40 }
 0x28b   :  { %v732_v47 = vmul.f32 0.001953125, %v731_v41 }
 0x28d   :  { %v734_v1 = vsub.f32 %v732_v47, %v733_v43 }
 0x28f   :  { %v735_v49 = vmax.f32 %v734_v1, 0.0 }
 0x291   :  { %v736_v51 = vadd.f32 1e-05, %v735_v49 }
 0x293   :  { %7071 = vrsqrt.f32 %v736_v51  ;;  %v6539_v51 = vld [vmem:[%s9678_s10 + $0x1e4] ss:$8 sps:$4 sm:$0xff]  }
 0x294   :  { %1398 = vmatprep.subr.bf16.mxu0 %v6539_v51 }
 0x295   :  { %1399 = vmatpush1.bf16.msra.mxu0 %v6537_v52 }
 0x296   :  { %1400 = vmatprep.subr.bf16.mxu0 %v6542_v6 }
 0x299   :  { %1401 = vmatpush1.bf16.msra.mxu0 %v6540_v56 }
 0x29d   :  { %v7072_v60 = vpop.eup %7071 }
 0x29e   :  { %v740_v45 = vcombine.low %v7072_v60, %v7072_v60  ;;  %v6545_v60 = vld [vmem:[%s9678_s10 + $0x4] ss:$8 sps:$4 sm:$0xff]  }
 0x29f   :  { %1583 = vmatprep.subr.bf16.mxu0 %v6545_v60  ;;  %v6552_v60 = vld [vmem:[%s9678_s10 + $0x30] ss:$8 sps:$4 sm:$0xff]  }
 0x2a0   :  { %v747_v61 = vrot.slane %v740_v45, %v7626_v57  ;;  %v862_v45 = vld [vmem:[%s9681_s8 + $0x8] sm:$0xff] }
 0x2a2   :  { %v754_v62 = vrot.slane %v747_v61, %v7626_v57 }
 0x2a4   :  { %v756_v3 = vmul.f32 %v754_v62, %v738_v46  ;;  %v861_v46 = vld [vmem:[%s9681_s8] sm:$0xff]  ;;  %v863_v62 = vld [vmem:[%s9681_s8 + $0x10] sm:$0xff] }
 0x2a6   :  { %v762_v36 = vrot.slane %v756_v3, %v7634_v63  ;;  %v766_v4 = vrot.slane %v756_v3, %v7637_v0 }
 0x2a8   :  { %v769_v7 = vmul.f32 %v762_v36, %v680_v40  ;;  %v770_v8 = vmul.f32 %v766_v4, %v680_v40  ;;  %v791_v16 = vmul.f32 %v766_v4, %v7296_v54  ;;  %v793_v17 = vmul.f32 %v766_v4, %v7306_v59 }
 0x2a9   :  { %v790_v20 = vmul.f32 %v762_v36, %v7294_v53  ;;  %v792_v21 = vmul.f32 %v762_v36, %v7298_v55  ;;  %v795_v22 = vmul.f32 %v766_v4, %v7319_v5  ;;  %v797_v23 = vmul.f32 %v766_v4, %v7329_v13 }
 0x2aa   :  { %v773_v10 = vcombine.low %v769_v7, %v770_v8  ;;  %v794_v24 = vmul.f32 %v762_v36, %v7314_v2  ;;  %v796_v25 = vmul.f32 %v762_v36, %v7324_v9  ;;  %v864_v36 = vld [vmem:[%s9681_s8 + $0x18] sm:$0xff] }
 0x2ac   :  { %v780_v12 = vrot.slane %v773_v10, %v7626_v57 }
 0x2ae   :  { %v787_v14 = vrot.slane %v780_v12, %v7626_v57 }
 0x2b0   :  { %v789_v15 = vsub.f32 %v757_v11, %v787_v14 }
 0x2b2   :  { %v802_v18 = vrot.slane %v789_v15, %v7634_v63  ;;  %v806_v19 = vrot.slane %v789_v15, %v7637_v0 }
 0x2b4   :  { %v810_v26 = vadd.f32 %v806_v19, %v791_v16  ;;  %v812_v54 = vadd.f32 %v806_v19, %v793_v17  ;;  %v809_v31 = vadd.f32 %v802_v18, %v790_v20  ;;  %v811_v59 = vadd.f32 %v802_v18, %v792_v21  ;;  %v6543_v20 = vld [vmem:[%s9678_s10] ss:$8 sps:$4 sm:$0xff]  }
 0x2b5   :  { %v814_v34 = vadd.f32 %v806_v19, %v795_v22  ;;  %v816_v35 = vadd.f32 %v806_v19, %v797_v23  ;;  %v813_v40 = vadd.f32 %v802_v18, %v794_v24  ;;  %v815_v27 = vadd.f32 %v802_v18, %v796_v25  ;;  %v6548_v23 = vld [vmem:[%s9678_s10 + $0x14] ss:$8 sps:$4 sm:$0xff]  }
 0x2b6   :  { %v818_v30 = vmax.f32 %v810_v26, 0.0  ;;  %v820_v53 = vmax.f32 %v812_v54, 0.0  ;;  %v817_v41 = vmax.f32 %v809_v31, 0.0  ;;  %v819_v55 = vmax.f32 %v811_v59, 0.0 }
 0x2b7   :  { %v822_v43 = vmax.f32 %v814_v34, 0.0  ;;  %v824_v5 = vmax.f32 %v816_v35, 0.0  ;;  %v821_v47 = vmax.f32 %v813_v40, 0.0  ;;  %v823_v13 = vmax.f32 %v815_v27, 0.0  ;;  %v6546_v35 = vld [vmem:[%s9678_s10 + $0x10] ss:$8 sps:$4 sm:$0xff]  }
 0x2b8   :  { %v826_v1 = vpack.c.bf16 %v820_v53, %v818_v30  ;;  %v825_v2 = vpack.c.bf16 %v819_v55, %v817_v41  ;;  %v6551_v27 = vld [vmem:[%s9678_s10 + $0x24] ss:$8 sps:$4 sm:$0xff]  }
 0x2b9   :  { %v828_v49 = vpack.c.bf16 %v824_v5, %v822_v43  ;;  %v827_v9 = vpack.c.bf16 %v823_v13, %v821_v47  ;;  %v6549_v47 = vld [vmem:[%s9678_s10 + $0x20] ss:$8 sps:$4 sm:$0xff]  }
 0x2ba   :  { %1057 = vmatprep.mubr.bf16.mxu1 %v826_v1 }
 0x2bb   :  { %1058 = vmatmul.mubr.bf16.vlgmr.msra.gmra.mrb[24].mxu1 %v825_v2  ;;  %v6554_v2 = vld [vmem:[%s9678_s10 + $0x34] ss:$8 sps:$4 sm:$0xff]  }
 0x2bc   :  { %1067 = vmatprep.mubr.bf16.mxu1 %v828_v49  ;;  %v7733_v49 = vpop.permute.xlu1 %1116 }
 0x2c3   :  { %1068 = vmatmul.mubr.bf16.gmra.mrb[28].mxu1 %v827_v9  ;;  %v7735_v9 = vpop.permute.xlu0 %1111 }
 0x2ef   :  { %v7743_v56 = vpop.f32.mrb[0].mxu0 }
 0x38e   :  { %v1059_v61 = vpop.f32.mrb[24].mxu1 }
 0x38f   :  { %v1061_v3 = vpop.f32.mrb[25].mxu1  ;;  %v1060_v8 = vadd.f32 %v1059_v61, %v861_v46  ;;  %v6557_v61 = vld [vmem:[%s9678_s10 + $0x44] ss:$8 sps:$4 sm:$0xff]  }
 0x390   :  { %v1062_v4 = vadd.f32 %v1061_v3, %v862_v45  ;;  %v1063_v7 = vpop.f32.mrb[26].mxu1 }
 0x391   :  { %v1064_v10 = vadd.f32 %v1063_v7, %v863_v62  ;;  %v1065_v11 = vpop.f32.mrb[27].mxu1  ;;  %v7689_v17 = vmax.f32 %v1060_v8, 0.0  ;;  %v6560_v8 = vld [vmem:[%s9678_s10 + $0x54] ss:$8 sps:$4 sm:$0xff]  }
 0x392   :  { %v1066_v12 = vadd.f32 %v1065_v11, %v864_v36  ;;  %v7685_v15 = vmax.f32 %v1062_v4, 0.0  ;;  %v6555_v4 = vld [vmem:[%s9678_s10 + $0x40] ss:$8 sps:$4 sm:$0xff]  }
 0x393   :  { %v7683_v14 = vmax.f32 %v1064_v10, 0.0 }
 0x394   :  { %v7687_v16 = vmax.f32 %v1066_v12, 0.0  ;;  %v1087_v30 = vrot.slane %v7685_v15, 7  ;;  %v6558_v12 = vld [vmem:[%s9678_s10 + $0x50] ss:$8 sps:$4 sm:$0xff]  }
 0x395   :  { %v1173_v22 = vpack.c.bf16 %v7683_v14, %v7689_v17 }
 0x396   :  { %v1069_v18 = vpop.f32.mrb[28].mxu1  ;;  %v1174_v19 = vpack.c.bf16 %v7687_v16, %v7685_v15  ;;  %v1089_v59 = vrot.slane %v7687_v16, 7 }
 0x397   :  { %v1071_v21 = vpop.f32.mrb[29].mxu1  ;;  %v1070_v26 = vadd.f32 %v1069_v18, %v861_v46  ;;  %v6563_v18 = vld [vmem:[%s9678_s10 + $0x64] ss:$8 sps:$4 sm:$0xff]  }
 0x398   :  { %v1072_v24 = vadd.f32 %v1071_v21, %v862_v45  ;;  %v1073_v25 = vpop.f32.mrb[30].mxu1  ;;  %1402 = vmatprep.mubr.bf16.mxu0 %v1174_v19  ;;  %v1102_v13 = vsel %vm1096_vm5, %v1087_v30, %v1089_v59  ;;  %v7748_v45 = vpop.f32.mrb[1].mxu0  ;;  %v6561_v19 = vld [vmem:[%s9678_s10 + $0x60] ss:$8 sps:$4 sm:$0xff]   ;;  %v6564_v21 = vld [vmem:[%s9678_s10 + $0x70] ss:$8 sps:$4 sm:$0xff]  }
 0x399   :  { %v1074_v54 = vadd.f32 %v1073_v25, %v863_v62  ;;  %v1075_v31 = vpop.f32.mrb[31].mxu1  ;;  %1403 = vmatmul.mubr.bf16.vlgmr.msra.gmra.mrb[8].mxu0 %v1173_v22  ;;  %v7716_v55 = vmax.f32 %v1070_v26, 0.0  ;;  %v1132_v6 = vmul.f32 %v7733_v49, %v1102_v13  ;;  %v384_v62 = vpop.f32.mrb[2].mxu0  ;;  %v6569_v22 = vld [vmem:[%s9678_s10 + $0x84] ss:$8 sps:$4 sm:$0xff]  }
 0x39a   :  { %v1076_v34 = vadd.f32 %v1075_v31, %v864_v36  ;;  %1584 = vmatpush1.bf16.msra.mxu0 %v6543_v20  ;;  %v7712_v53 = vmax.f32 %v1072_v24, 0.0  ;;  %v385_v3 = vpop.f32.mrb[3].mxu0  ;;  %v6566_v20 = vld [vmem:[%s9678_s10 + $0x74] ss:$8 sps:$4 sm:$0xff]   ;;  %v6570_v25 = vld [vmem:[%s9678_s10 + $0x90] ss:$8 sps:$4 sm:$0xff]  }
 0x39b   :  { %v7706_v40 = vmax.f32 %v1074_v54, 0.0  ;;  %1585 = vmatprep.subr.bf16.mxu0 %v6548_v23  ;;  %v7753_v36 = vpop.f32.mrb[4].mxu0  ;;  %v6567_v23 = vld [vmem:[%s9678_s10 + $0x80] ss:$8 sps:$4 sm:$0xff]   ;;  %v6572_v24 = vld [vmem:[%s9678_s10 + $0x94] ss:$8 sps:$4 sm:$0xff]   ;;  %v7838_v3 = vpop.permute.xlu0 %1126 }
 0x39c   :  { %v7714_v41 = vmax.f32 %v1076_v34, 0.0  ;;  %9691 = vst [vmem:[#allocation4_spill] sm:$0xff] %v7753_v36  ;;  %v7758_v7 = vpop.f32.mrb[5].mxu0  ;;  %v6575_v26 = vld [vmem:[%s9678_s10 + $0xa4] ss:$8 sps:$4 sm:$0xff]  }
 0x39d   :  { %v1175_v1 = vpack.c.bf16 %v7706_v40, %v7716_v55  ;;  %9692 = vst [vmem:[#allocation5_spill] sm:$0xff] %v7758_v7  ;;  %v466_v10 = vpop.f32.mrb[6].mxu0  ;;  %v6573_v54 = vld [vmem:[%s9678_s10 + $0xa0] ss:$8 sps:$4 sm:$0xff]   ;;  %v6578_v31 = vld [vmem:[%s9678_s10 + $0xb4] ss:$8 sps:$4 sm:$0xff]  }
 0x39e   :  { %v1093_v43 = vrot.slane %v7714_v41, 7  ;;  %1586 = vmatpush1.bf16.msra.mxu0 %v6546_v35  ;;  %v1176_v5 = vpack.c.bf16 %v7714_v41, %v7712_v53  ;;  %v467_v11 = vpop.f32.mrb[7].mxu0  ;;  %v6576_v34 = vld [vmem:[%s9678_s10 + $0xb0] ss:$8 sps:$4 sm:$0xff]   ;;  %v6581_v35 = vld [vmem:[%s9678_s10 + $0xc4] ss:$8 sps:$4 sm:$0xff]  }
 0x39f   :  { %1587 = vmatprep.subr.bf16.mxu0 %v6551_v27  ;;  %v6579_v27 = vld [vmem:[%s9678_s10 + $0xc0] ss:$8 sps:$4 sm:$0xff]   ;;  %v1092_v13 = vrot.slane %v7706_v40, 7  ;;  %v6588_v62 = vld [vmem:[%s9678_s10 + $0xf0] ss:$8 sps:$4 sm:$0xff]   ;;  %v7849_v11 = vpop.permute.xlu1 %1121 }
 0x3a0   :  { %1412 = vmatprep.mubr.bf16.mxu0 %v1176_v5  ;;  %v1104_v51 = vsel %vm1096_vm5, %v1093_v43, %v1087_v30  ;;  %v6584_v30 = vld [vmem:[%s9678_s10 + $0xd4] ss:$8 sps:$4 sm:$0xff]   ;;  %v6582_v5 = vld [vmem:[%s9678_s10 + $0xd0] ss:$8 sps:$4 sm:$0xff]  }
 0x3a1   :  { %1413 = vmatmul.mubr.bf16.gmra.mrb[12].mxu0 %v1175_v1  ;;  %v1130_v52 = vmul.f32 %v7735_v9, %v1104_v51  ;;  %v1086_v1 = vrot.slane %v7689_v17, 7  ;;  %v6585_v51 = vld [vmem:[%s9678_s10 + $0xe0] ss:$8 sps:$4 sm:$0xff]  }
 0x3a2   :  { %1588 = vmatpush1.bf16.msra.mxu0 %v6549_v47  ;;  %v6587_v47 = vld [vmem:[%s9678_s10 + $0xe4] ss:$8 sps:$4 sm:$0xff]  }
 0x3a3   :  { %1589 = vmatprep.subr.bf16.mxu0 %v6554_v2  ;;  %v1138_v46 = vpack.c.bf16 %v1132_v6, %v1130_v52  ;;  %v1088_v2 = vrot.slane %v7683_v14, 7  ;;  %v1091_v52 = vrot.slane %v7712_v53, 7  ;;  %v6590_v6 = vld [vmem:[%s9678_s10 + $0xf4] ss:$8 sps:$4 sm:$0xff]  }
 0x3a5   :  { %1615 = vmatprep.mubr.bf16.mxu0 %v1138_v46  ;;  %v1098_v46 = vsel %vm1096_vm5, %v1091_v52, %v1093_v43  ;;  %v1100_v43 = vsel %vm1096_vm5, %v1089_v59, %v1091_v52 }
 0x3a6   :  { %1590 = vmatpush1.bf16.msra.mxu0 %v6552_v60  ;;  %v1103_v60 = vsel %vm1096_vm5, %v1092_v13, %v1086_v1  ;;  %v1136_v10 = vmul.f32 %v7838_v3, %v1098_v46  ;;  %v6600_v46 = vld [vmem:[%s9678_s10 + $0x230] ss:$8 sps:$4 sm:$0xff]  }
 0x3a7   :  { %1591 = vmatprep.subr.bf16.mxu0 %v6557_v61  ;;  %v1101_v61 = vsel %vm1096_vm5, %v1086_v1, %v1088_v2 }
 0x3aa   :  { %1592 = vmatpush1.bf16.msra.mxu0 %v6555_v4  ;;  %v1129_v4 = vmul.f32 %v7735_v9, %v1103_v60 }
 0x3ab   :  { %1593 = vmatprep.subr.bf16.mxu0 %v6560_v8  ;;  %v6593_v8 = vld [vmem:[%s9678_s10 + $0x204] ss:$8 sps:$4 sm:$0xff]  }
 0x3ae   :  { %1594 = vmatpush1.bf16.msra.mxu0 %v6558_v12  ;;  %v1641_v12 = vrot.slane %v7712_v53, 1 }
 0x3af   :  { %1595 = vmatprep.subr.bf16.mxu0 %v6563_v18  ;;  %v1131_v18 = vmul.f32 %v7733_v49, %v1101_v61  ;;  %v6605_v61 = vld [vmem:[%s9678_s10 + $0x244] ss:$8 sps:$4 sm:$0xff]  }
 0x3b1   :  { %v1137_v59 = vpack.c.bf16 %v1131_v18, %v1129_v4  ;;  %v6608_v4 = vld [vmem:[%s9678_s10 + $0x254] ss:$8 sps:$4 sm:$0xff]  }
 0x3b2   :  { %1596 = vmatpush1.bf16.msra.mxu0 %v6561_v19  ;;  %v1090_v19 = vrot.slane %v7716_v55, 7  ;;  %v6614_v18 = vld [vmem:[%s9678_s10 + $0x274] ss:$8 sps:$4 sm:$0xff]  }
 0x3b3   :  { %1597 = vmatprep.subr.bf16.mxu0 %v6566_v20  ;;  %v6591_v20 = vld [vmem:[%s9678_s10 + $0x200] ss:$8 sps:$4 sm:$0xff]  }
 0x3b6   :  { %1598 = vmatpush1.bf16.msra.mxu0 %v6564_v21  ;;  %v1134_v21 = vmul.f32 %v7849_v11, %v1100_v43  ;;  %v6611_v43 = vld [vmem:[%s9678_s10 + $0x264] ss:$8 sps:$4 sm:$0xff]  }
 0x3b7   :  { %1599 = vmatprep.subr.bf16.mxu0 %v6569_v22  ;;  %v1639_v22 = vrot.slane %v7687_v16, 1 }
 0x3ba   :  { %1600 = vmatpush1.bf16.msra.mxu0 %v6567_v23  ;;  %v6596_v23 = vld [vmem:[%s9678_s10 + $0x214] ss:$8 sps:$4 sm:$0xff]  }
 0x3bb   :  { %1601 = vmatprep.subr.bf16.mxu0 %v6572_v24  ;;  %v1140_v24 = vpack.c.bf16 %v1136_v10, %v1134_v21  ;;  %v6609_v10 = vld [vmem:[%s9678_s10 + $0x260] ss:$8 sps:$4 sm:$0xff]  }
 0x3bc   :  { %v6615_v21 = vld [vmem:[%s9678_s10 + $0x280] ss:$8 sps:$4 sm:$0xff]  }
 0x3be   :  { %1602 = vmatpush1.bf16.msra.mxu0 %v6570_v25  ;;  %v1097_v25 = vsel %vm1096_vm5, %v1090_v19, %v1092_v13 }
 0x3bf   :  { %1603 = vmatprep.subr.bf16.mxu0 %v6575_v26  ;;  %v1637_v26 = vrot.slane %v7685_v15, 1 }
 0x3c2   :  { %1604 = vmatpush1.bf16.msra.mxu0 %v6573_v54  ;;  %v1648_v54 = vsel %vm1644_vm6, %v1639_v22, %v1641_v12 }
 0x3c3   :  { %1605 = vmatprep.subr.bf16.mxu0 %v6578_v31  ;;  %v6594_v31 = vld [vmem:[%s9678_s10 + $0x210] ss:$8 sps:$4 sm:$0xff]  }
 0x3c6   :  { %1606 = vmatpush1.bf16.msra.mxu0 %v6576_v34  ;;  %v1099_v34 = vsel %vm1096_vm5, %v1088_v2, %v1090_v19  ;;  %v6597_v2 = vld [vmem:[%s9678_s10 + $0x220] ss:$8 sps:$4 sm:$0xff]   ;;  %v6612_v19 = vld [vmem:[%s9678_s10 + $0x270] ss:$8 sps:$4 sm:$0xff]  }
 0x3c7   :  { %1607 = vmatprep.subr.bf16.mxu0 %v6581_v35  ;;  %v7875_v35 = vpop.permute.xlu1 %1660  ;;  %v1133_v1 = vmul.f32 %v7849_v11, %v1099_v34  ;;  %v6627_v34 = vld [vmem:[%s9678_s10 + $0x2c0] ss:$8 sps:$4 sm:$0xff]  }
 0x3ca   :  { %1608 = vmatpush1.bf16.msra.mxu0 %v6579_v27  ;;  %v7877_v27 = vpop.permute.xlu0 %1665 }
 0x3cb   :  { %1609 = vmatprep.subr.bf16.mxu0 %v6584_v30  ;;  %v1135_v30 = vmul.f32 %v7838_v3, %v1097_v25  ;;  %v1681_v13 = vmul.f32 %v7877_v27, %v1648_v54  ;;  %v6626_v25 = vld [vmem:[%s9678_s10 + $0x2b4] ss:$8 sps:$4 sm:$0xff]   ;;  %v6624_v54 = vld [vmem:[%s9678_s10 + $0x2b0] ss:$8 sps:$4 sm:$0xff]  }
 0x3cd   :  { %v1139_v52 = vpack.c.bf16 %v1135_v30, %v1133_v1  ;;  %v6632_v30 = vld [vmem:[%s9678_s10 + $0x2d4] ss:$8 sps:$4 sm:$0xff]   ;;  %v1643_v1 = vrot.slane %v7714_v41, 1 }
 0x3ce   :  { %1610 = vmatpush1.bf16.msra.mxu0 %v6582_v5  ;;  %v6599_v5 = vld [vmem:[%s9678_s10 + $0x224] ss:$8 sps:$4 sm:$0xff]  }
 0x3cf   :  { %1611 = vmatprep.subr.bf16.mxu0 %v6587_v47  ;;  %v1650_v47 = vsel %vm1644_vm6, %v1637_v26, %v1639_v22  ;;  %v6620_v22 = vld [vmem:[%s9678_s10 + $0x294] ss:$8 sps:$4 sm:$0xff]  }
 0x3d2   :  { %1612 = vmatpush1.bf16.msra.mxu0 %v6585_v51  ;;  %v1679_v51 = vmul.f32 %v7875_v35, %v1650_v47  ;;  %v6635_v47 = vld [vmem:[%s9678_s10 + $0x2e4] ss:$8 sps:$4 sm:$0xff]  }
 0x3d3   :  { %1613 = vmatprep.subr.bf16.mxu0 %v6590_v6  ;;  %v6602_v6 = vld [vmem:[%s9678_s10 + $0x234] ss:$8 sps:$4 sm:$0xff]  }
 0x3d4   :  { %v1687_v60 = vpack.c.bf16 %v1681_v13, %v1679_v51  ;;  %v1640_v13 = vrot.slane %v7716_v55, 1  ;;  %v6633_v51 = vld [vmem:[%s9678_s10 + $0x2e0] ss:$8 sps:$4 sm:$0xff]  }
 0x3d6   :  { %1614 = vmatpush1.bf16.msra.mxu0 %v6588_v62  ;;  %v6603_v62 = vld [vmem:[%s9678_s10 + $0x240] ss:$8 sps:$4 sm:$0xff]  }
 0x3d7   :  { %1883 = vmatprep.subr.bf16.mxu0 %v6593_v8  ;;  %v6606_v8 = vld [vmem:[%s9678_s10 + $0x250] ss:$8 sps:$4 sm:$0xff]  }
 0x3d9   :  { %1616 = vmatmul.mubr.bf16.vlgmr.msra.gmra.mrb[8].mxu0 %v1137_v59  ;;  %v6618_v59 = vld [vmem:[%s9678_s10 + $0x290] ss:$8 sps:$4 sm:$0xff]  }
 0x3da   :  { %1625 = vmatprep.mubr.bf16.mxu0 %v1140_v24  ;;  %1884 = vmatpush1.bf16.msra.mxu0 %v6591_v20  ;;  %v6617_v20 = vld [vmem:[%s9678_s10 + $0x284] ss:$8 sps:$4 sm:$0xff]   ;;  %v6621_v24 = vld [vmem:[%s9678_s10 + $0x2a0] ss:$8 sps:$4 sm:$0xff]  }
 0x3db   :  { %1885 = vmatprep.subr.bf16.mxu0 %v6596_v23  ;;  %v6623_v23 = vld [vmem:[%s9678_s10 + $0x2a4] ss:$8 sps:$4 sm:$0xff]  }
 0x3de   :  { %1886 = vmatpush1.bf16.msra.mxu0 %v6594_v31  ;;  %v6629_v31 = vld [vmem:[%s9678_s10 + $0x2c4] ss:$8 sps:$4 sm:$0xff]  }
 0x3df   :  { %1887 = vmatprep.subr.bf16.mxu0 %v6599_v5  ;;  %v6630_v5 = vld [vmem:[%s9678_s10 + $0x2d0] ss:$8 sps:$4 sm:$0xff]  }
 0x3e1   :  { %1626 = vmatmul.mubr.bf16.gmra.mrb[12].mxu0 %v1139_v52  ;;  %v6638_v52 = vld [vmem:[%s9678_s10 + $0x2f4] ss:$8 sps:$4 sm:$0xff]  }
 0x3e2   :  { %1888 = vmatpush1.bf16.msra.mxu0 %v6597_v2  ;;  %1915 = vmatprep.mubr.bf16.mxu0 %v1687_v60  ;;  %v1638_v2 = vrot.slane %v7683_v14, 1 }
 0x3e3   :  { %1889 = vmatprep.subr.bf16.mxu0 %v6602_v6  ;;  %v1636_v6 = vrot.slane %v7689_v17, 1 }
 0x3e4   :  { %v1647_v60 = vsel %vm1644_vm6, %v1638_v2, %v1640_v13 }
 0x3e6   :  { %1890 = vmatpush1.bf16.msra.mxu0 %v6600_v46  ;;  %v7974_v46 = vpop.permute.xlu0 %1675 }
 0x3e7   :  { %1891 = vmatprep.subr.bf16.mxu0 %v6605_v61  ;;  %v7976_v61 = vpop.permute.xlu1 %1670 }
 0x3ea   :  { %1892 = vmatpush1.bf16.msra.mxu0 %v6603_v62  ;;  %v1646_v62 = vsel %vm1644_vm6, %v1641_v12, %v1643_v1 }
 0x3eb   :  { %1893 = vmatprep.subr.bf16.mxu0 %v6608_v4  ;;  %v1652_v4 = vsel %vm1644_vm6, %v1643_v1, %v1637_v26  ;;  %v1683_v12 = vmul.f32 %v7976_v61, %v1646_v62 }
 0x3ee   :  { %1894 = vmatpush1.bf16.msra.mxu0 %v6606_v8  ;;  %v1649_v8 = vsel %vm1644_vm6, %v1636_v6, %v1638_v2 }
 0x3ef   :  { %1895 = vmatprep.subr.bf16.mxu0 %v6611_v43  ;;  %v6636_v43 = vld [vmem:[%s9678_s10 + $0x2f0] ss:$8 sps:$4 sm:$0xff]  }
 0x3f2   :  { %1896 = vmatpush1.bf16.msra.mxu0 %v6609_v10  ;;  %v1680_v10 = vmul.f32 %v7877_v27, %v1647_v60 }
 0x3f3   :  { %1897 = vmatprep.subr.bf16.mxu0 %v6614_v18  ;;  %v1642_v18 = vrot.slane %v7706_v40, 1 }
 0x3f6   :  { %1898 = vmatpush1.bf16.msra.mxu0 %v6612_v19  ;;  %v1685_v19 = vmul.f32 %v7974_v46, %v1652_v4 }
 0x3f7   :  { %1899 = vmatprep.subr.bf16.mxu0 %v6617_v20  ;;  %v1678_v20 = vmul.f32 %v7875_v35, %v1649_v8 }
 0x3f9   :  { %v1686_v26 = vpack.c.bf16 %v1680_v10, %v1678_v20 }
 0x3fa   :  { %1900 = vmatpush1.bf16.msra.mxu0 %v6615_v21  ;;  %v1689_v21 = vpack.c.bf16 %v1685_v19, %v1683_v12 }
 0x3fb   :  { %1901 = vmatprep.subr.bf16.mxu0 %v6620_v22  ;;  %v1645_v22 = vsel %vm1644_vm6, %v1640_v13, %v1642_v18 }
 0x3fe   :  { %1902 = vmatpush1.bf16.msra.mxu0 %v6618_v59  ;;  %v1651_v59 = vsel %vm1644_vm6, %v1642_v18, %v1636_v6 }
 0x3ff   :  { %1903 = vmatprep.subr.bf16.mxu0 %v6623_v23  ;;  %v1682_v23 = vmul.f32 %v7976_v61, %v1645_v22 }
 0x402   :  { %1904 = vmatpush1.bf16.msra.mxu0 %v6621_v24  ;;  %v1684_v24 = vmul.f32 %v7974_v46, %v1651_v59 }
 0x403   :  { %1905 = vmatprep.subr.bf16.mxu0 %v6626_v25 }
 0x404   :  { %v1688_v25 = vpack.c.bf16 %v1684_v24, %v1682_v23 }
 0x406   :  { %1906 = vmatpush1.bf16.msra.mxu0 %v6624_v54 }
 0x407   :  { %1907 = vmatprep.subr.bf16.mxu0 %v6629_v31 }
 0x40a   :  { %1908 = vmatpush1.bf16.msra.mxu0 %v6627_v34 }
 0x40b   :  { %1909 = vmatprep.subr.bf16.mxu0 %v6632_v30 }
 0x40e   :  { %1910 = vmatpush1.bf16.msra.mxu0 %v6630_v5 }
 0x40f   :  { %1911 = vmatprep.subr.bf16.mxu0 %v6635_v47 }
 0x412   :  { %1912 = vmatpush1.bf16.msra.mxu0 %v6633_v51 }
 0x413   :  { %1913 = vmatprep.subr.bf16.mxu0 %v6638_v52 }
 0x416   :  { %1914 = vmatpush1.bf16.msra.mxu0 %v6636_v43 }
 0x419   :  { %1916 = vmatmul.mubr.bf16.vlgmr.msra.gmra.mrb[8].mxu0 %v1686_v26 }
 0x41a   :  { %1925 = vmatprep.mubr.bf16.mxu0 %v1689_v21 }
 0x421   :  { %1926 = vmatmul.mubr.bf16.gmra.mrb[12].mxu0 %v1688_v25 }
 0x4ec   :  { %v8002_v54 = vpop.f32.mrb[8].mxu0 }
 0x4ed   :  { %v8004_v31 = vpop.f32.mrb[9].mxu0  ;;  %v1988_v30 = vmul.f32 %v8002_v54, %v8002_v54 }
 0x4ee   :  { %v8006_v34 = vpop.f32.mrb[10].mxu0  ;;  %v1989_v1 = vmul.f32 %v8004_v31, %v8004_v31 }
 0x4ef   :  { %v1944_v5 = vadd.f32 %v8006_v34, %v8002_v54  ;;  %v1990_v47 = vmul.f32 %v8006_v34, %v8006_v34  ;;  %v8014_v13 = vpop.f32.mrb[11].mxu0 }
 0x4f0   :  { %v1953_v2 = vadd.f32 %v8014_v13, %v8004_v31  ;;  %v1991_v51 = vmul.f32 %v8014_v13, %v8014_v13 }
 0x4f1   :  { %v1996_v52 = vadd.f32 %v1990_v47, %v1988_v30 }
 0x4f2   :  { %v2005_v6 = vadd.f32 %v1991_v51, %v1989_v1 }
 0x4f4   :  { %v8022_v60 = vpop.f32.mrb[12].mxu0 }
 0x4f5   :  { %v1945_v62 = vadd.f32 %v1944_v5, %v8022_v60  ;;  %v1992_v4 = vmul.f32 %v8022_v60, %v8022_v60  ;;  %v8027_v8 = vpop.f32.mrb[13].mxu0 }
 0x4f6   :  { %v1954_v43 = vadd.f32 %v1953_v2, %v8027_v8  ;;  %v1993_v10 = vmul.f32 %v8027_v8, %v8027_v8  ;;  %v8032_v18 = vpop.f32.mrb[14].mxu0 }
 0x4f7   :  { %v1997_v12 = vadd.f32 %v1996_v52, %v1992_v4  ;;  %v1946_v19 = vadd.f32 %v1945_v62, %v8032_v18  ;;  %v1994_v20 = vmul.f32 %v8032_v18, %v8032_v18  ;;  %v8037_v26 = vpop.f32.mrb[15].mxu0 }
 0x4f8   :  { %v2006_v21 = vadd.f32 %v2005_v6, %v1993_v10  ;;  %v1955_v22 = vadd.f32 %v1954_v43, %v8037_v26  ;;  %v1995_v59 = vmul.f32 %v8037_v26, %v8037_v26 }
 0x4f9   :  { %v1947_v23 = vrot.slane %v1946_v19, 4  ;;  %v1998_v24 = vadd.f32 %v1997_v12, %v1994_v20 }
 0x4fa   :  { %v1956_v25 = vrot.slane %v1955_v22, 4  ;;  %v2007_v30 = vadd.f32 %v2006_v21, %v1995_v59 }
 0x4fb   :  { %v1948_v5 = vadd.f32 %v1947_v23, %v1946_v19  ;;  %v1999_v47 = vrot.slane %v1998_v24, 4 }
 0x4fc   :  { %v1957_v1 = vadd.f32 %v1956_v25, %v1955_v22  ;;  %v2008_v2 = vrot.slane %v2007_v30, 4 }
 0x4fd   :  { %v1949_v51 = vrot.slane %v1948_v5, 2  ;;  %v2000_v52 = vadd.f32 %v1999_v47, %v1998_v24 }
 0x4fe   :  { %v1958_v62 = vrot.slane %v1957_v1, 2  ;;  %v2009_v4 = vadd.f32 %v2008_v2, %v2007_v30  ;;  %v6644_v2 = vld [vmem:[%s9676_s9 + $0x114] ss:$8 sps:$4 sm:$0xff]  }
 0x4ff   :  { %v1950_v44 = vadd.f32 %v1949_v51, %v1948_v5  ;;  %v2001_v42 = vrot.slane %v2000_v52, 2  ;;  %v6642_v51 = vld [vmem:[%s9676_s9 + $0x110] ss:$8 sps:$4 sm:$0xff]  }
 0x500   :  { %v1959_v6 = vadd.f32 %v1958_v62, %v1957_v1  ;;  %v2010_v10 = vrot.slane %v2009_v4, 2  ;;  %v6639_v1 = vld [vmem:[%s9676_s9 + $0x100] ss:$8 sps:$4 sm:$0xff]  }
 0x501   :  { %v1951_v43 = vrot.slane %v1950_v44, 1  ;;  %v2002_v48 = vadd.f32 %v2001_v42, %v2000_v52 }
 0x502   :  { %v1960_v50 = vrot.slane %v1959_v6, 1  ;;  %v2011_v7 = vadd.f32 %v2010_v10, %v2009_v4 }
 0x503   :  { %v1952_v36 = vadd.f32 %v1951_v43, %v1950_v44  ;;  %v2003_v12 = vrot.slane %v2002_v48, 1 }
 0x504   :  { %v1961_v20 = vadd.f32 %v1960_v50, %v1959_v6  ;;  %v2012_v21 = vrot.slane %v2011_v7, 1 }
 0x505   :  { %1962 = vrot.lane.b32.xlu1 %v1952_v36, %s7082_s24  ;;  %v2004_v19 = vadd.f32 %v2003_v12, %v2002_v48  ;;  %v6647_v12 = vld [vmem:[%s9676_s9 + $0x124] ss:$8 sps:$4 sm:$0xff]  }
 0x506   :  { %1964 = vrot.lane.b32.xlu0 %v1961_v20, %s7082_s24  ;;  %v2013_v22 = vadd.f32 %v2012_v21, %v2011_v7 }
 0x509   :  { %2014 = vrot.lane.b32.xlu1 %v2004_v19, %s7082_s24 }
 0x50a   :  { %2016 = vrot.lane.b32.xlu0 %v2013_v22, %s7082_s24 }
 0x577   :  { %v1963_v59 = vpop.permute.xlu1 %1962 }
 0x578   :  { %v1965_v23 = vpop.permute.xlu0 %1964 }
 0x579   :  { %v1966_v42 = vsel %vm656_vm2, %v1963_v59, %v1965_v23  ;;  %v1967_v44 = vsel %vm656_vm2, %v1965_v23, %v1963_v59 }
 0x57a   :  { %v1968_v50 = vadd.f32 %v1967_v44, %v1952_v36  ;;  %v1969_v24 = vadd.f32 %v1966_v42, %v1961_v20  ;;  %v6641_v36 = vld [vmem:[%s9676_s9 + $0x104] ss:$8 sps:$4 sm:$0xff]   ;;  %v6645_v20 = vld [vmem:[%s9676_s9 + $0x120] ss:$8 sps:$4 sm:$0xff]   ;;  %v6650_v44 = vld [vmem:[%s9676_s9 + $0x134] ss:$8 sps:$4 sm:$0xff]  }
 0x57b   :  { %v2015_v25 = vpop.permute.xlu1 %2014  ;;  %2380 = vmatprep.subr.bf16.mxu1 %v6641_v36  ;;  %v6660_v36 = vld [vmem:[%s9676_s9 + $0x170] ss:$8 sps:$4 sm:$0xff]  }
 0x57c   :  { %1970 = vrot.lane.b32.xlu1 %v1968_v50, %s7083_s18  ;;  %1972 = vrot.lane.b32.xlu0 %v1969_v24, %s7083_s18  ;;  %v2017_v48 = vpop.permute.xlu0 %2016 }
 0x57d   :  { %v2018_v7 = vsel %vm656_vm2, %v2015_v25, %v2017_v48  ;;  %v2019_v30 = vsel %vm656_vm2, %v2017_v48, %v2015_v25  ;;  %2381 = vmatpush1.bf16.msra.mxu1 %v6639_v1  ;;  %v6651_v25 = vld [vmem:[%s9676_s9 + $0x140] ss:$8 sps:$4 sm:$0xff]   ;;  %v6656_v48 = vld [vmem:[%s9676_s9 + $0x154] ss:$8 sps:$4 sm:$0xff]   ;;  %v6665_v1 = vld [vmem:[%s9676_s9 + $0x184] ss:$8 sps:$4 sm:$0xff]  }
 0x57e   :  { %v2020_v5 = vadd.f32 %v2019_v30, %v2004_v19  ;;  %v2021_v47 = vadd.f32 %v2018_v7, %v2013_v22  ;;  %2382 = vmatprep.subr.bf16.mxu1 %v6644_v2  ;;  %v6654_v7 = vld [vmem:[%s9676_s9 + $0x150] ss:$8 sps:$4 sm:$0xff]   ;;  %v6659_v30 = vld [vmem:[%s9676_s9 + $0x164] ss:$8 sps:$4 sm:$0xff]   ;;  %v6663_v2 = vld [vmem:[%s9676_s9 + $0x180] ss:$8 sps:$4 sm:$0xff]  }
 0x580   :  { %2022 = vrot.lane.b32.xlu1 %v2020_v5, %s7083_s18  ;;  %2024 = vrot.lane.b32.xlu0 %v2021_v47, %s7083_s18 }
 0x581   :  { %2383 = vmatpush1.bf16.msra.mxu1 %v6642_v51  ;;  %v6668_v51 = vld [vmem:[%s9676_s9 + $0x194] ss:$8 sps:$4 sm:$0xff]  }
 0x582   :  { %2384 = vmatprep.subr.bf16.mxu1 %v6647_v12  ;;  %v6672_v12 = vld [vmem:[%s9676_s9 + $0x1b0] ss:$8 sps:$4 sm:$0xff]  }
 0x585   :  { %2385 = vmatpush1.bf16.msra.mxu1 %v6645_v20  ;;  %v6677_v20 = vld [vmem:[%s9676_s9 + $0x1c4] ss:$8 sps:$4 sm:$0xff]  }
 0x586   :  { %2386 = vmatprep.subr.bf16.mxu1 %v6650_v44  ;;  %v6681_v44 = vld [vmem:[%s9676_s9 + $0x1e0] ss:$8 sps:$4 sm:$0xff]  }
 0x5ee   :  { %v1971_v52 = vpop.permute.xlu1 %1970  ;;  %v1973_v62 = vpop.permute.xlu0 %1972 }
 0x5ef   :  { %v1974_v4 = vsel %vm665_vm3, %v1971_v52, %v1973_v62  ;;  %v1975_v6 = vsel %vm665_vm3, %v1973_v62, %v1971_v52  ;;  %v6666_v52 = vld [vmem:[%s9676_s9 + $0x190] ss:$8 sps:$4 sm:$0xff]   ;;  %v6671_v62 = vld [vmem:[%s9676_s9 + $0x1a4] ss:$8 sps:$4 sm:$0xff]  }
 0x5f0   :  { %v8074_v10 = vadd.f32 %v1975_v6, %v1968_v50  ;;  %v8076_v43 = vadd.f32 %v1974_v4, %v1969_v24  ;;  %v6648_v50 = vld [vmem:[%s9676_s9 + $0x130] ss:$8 sps:$4 sm:$0xff]   ;;  %v6653_v24 = vld [vmem:[%s9676_s9 + $0x144] ss:$8 sps:$4 sm:$0xff]   ;;  %v6669_v4 = vld [vmem:[%s9676_s9 + $0x1a0] ss:$8 sps:$4 sm:$0xff]  }
 0x5f1   :  { %2387 = vmatpush1.bf16.msra.mxu1 %v6648_v50  ;;  %v6674_v6 = vld [vmem:[%s9676_s9 + $0x1b4] ss:$8 sps:$4 sm:$0xff]  }
 0x5f2   :  { %v2023_v21 = vpop.permute.xlu1 %2022  ;;  %1978 = vrot.lane.b32.xlu1 %v8074_v10, %s7084_s19  ;;  %1980 = vrot.lane.b32.xlu0 %v8076_v43, %s7084_s19  ;;  %v2025_v19 = vpop.permute.xlu0 %2024  ;;  %v6686_v50 = vld [vmem:[%s9676_s9 + $0x1f4] ss:$8 sps:$4 sm:$0xff]  }
 0x5f3   :  { %v2026_v22 = vsel %vm665_vm3, %v2023_v21, %v2025_v19  ;;  %v2027_v59 = vsel %vm665_vm3, %v2025_v19, %v2023_v21  ;;  %2388 = vmatprep.subr.bf16.mxu1 %v6653_v24  ;;  %v6675_v21 = vld [vmem:[%s9676_s9 + $0x1c0] ss:$8 sps:$4 sm:$0xff]   ;;  %v6680_v19 = vld [vmem:[%s9676_s9 + $0x1d4] ss:$8 sps:$4 sm:$0xff]   ;;  %v6684_v24 = vld [vmem:[%s9676_s9 + $0x1f0] ss:$8 sps:$4 sm:$0xff]  }
 0x5f4   :  { %v8092_v23 = vadd.f32 %v2027_v59, %v2020_v5  ;;  %v8094_v42 = vadd.f32 %v2026_v22, %v2021_v47  ;;  %v6657_v5 = vld [vmem:[%s9676_s9 + $0x160] ss:$8 sps:$4 sm:$0xff]   ;;  %v6662_v47 = vld [vmem:[%s9676_s9 + $0x174] ss:$8 sps:$4 sm:$0xff]   ;;  %v6678_v22 = vld [vmem:[%s9676_s9 + $0x1d0] ss:$8 sps:$4 sm:$0xff]  }
 0x5f5   :  { %2389 = vmatpush1.bf16.msra.mxu1 %v6651_v25  ;;  %v6683_v59 = vld [vmem:[%s9676_s9 + $0x1e4] ss:$8 sps:$4 sm:$0xff]  }
 0x5f6   :  { %2030 = vrot.lane.b32.xlu1 %v8092_v23, %s7084_s19  ;;  %2032 = vrot.lane.b32.xlu0 %v8094_v42, %s7084_s19  ;;  %v6689_v25 = vld [vmem:[%s9678_s10 + $0x404] ss:$8 sps:$4 sm:$0xff]  }
 0x5f7   :  { %2390 = vmatprep.subr.bf16.mxu1 %v6656_v48 }
 0x5f9   :  { %2391 = vmatpush1.bf16.msra.mxu1 %v6654_v7 }
 0x5fa   :  { %2392 = vmatprep.subr.bf16.mxu1 %v6659_v30 }
 0x5fd   :  { %2393 = vmatpush1.bf16.msra.mxu1 %v6657_v5 }
 0x5fe   :  { %2394 = vmatprep.subr.bf16.mxu1 %v6662_v47 }
 0x601   :  { %2395 = vmatpush1.bf16.msra.mxu1 %v6660_v36 }
 0x602   :  { %2396 = vmatprep.subr.bf16.mxu1 %v6665_v1 }
 0x605   :  { %2397 = vmatpush1.bf16.msra.mxu1 %v6663_v2 }
 0x606   :  { %2398 = vmatprep.subr.bf16.mxu1 %v6668_v51 }
 0x609   :  { %2399 = vmatpush1.bf16.msra.mxu1 %v6666_v52 }
 0x60a   :  { %2400 = vmatprep.subr.bf16.mxu1 %v6671_v62 }
 0x60d   :  { %2401 = vmatpush1.bf16.msra.mxu1 %v6669_v4 }
 0x60e   :  { %2402 = vmatprep.subr.bf16.mxu1 %v6674_v6 }
 0x611   :  { %2403 = vmatpush1.bf16.msra.mxu1 %v6672_v12 }
 0x612   :  { %2404 = vmatprep.subr.bf16.mxu1 %v6677_v20 }
 0x615   :  { %2405 = vmatpush1.bf16.msra.mxu1 %v6675_v21 }
 0x616   :  { %2406 = vmatprep.subr.bf16.mxu1 %v6680_v19 }
 0x619   :  { %2407 = vmatpush1.bf16.msra.mxu1 %v6678_v22 }
 0x61a   :  { %2408 = vmatprep.subr.bf16.mxu1 %v6683_v59 }
 0x61d   :  { %2409 = vmatpush1.bf16.msra.mxu1 %v6681_v44 }
 0x61e   :  { %2410 = vmatprep.subr.bf16.mxu1 %v6686_v50  ;;  %v76_v50 = vld [vmem:[%s9675_s7] sm:$0xff] }
 0x621   :  { %2411 = vmatpush1.bf16.msra.mxu1 %v6684_v24 }
 0x622   :  { %2699 = vmatprep.subr.bf16.mxu1 %v6689_v25  ;;  %v87_v25 = vrot.slane %v76_v50, %v7637_v0 }
 0x664   :  { %v1979_v48 = vpop.permute.xlu1 %1978  ;;  %v1981_v7 = vpop.permute.xlu0 %1980 }
 0x665   :  { %v1982_v30 = vsel %vm674_vm4, %v1979_v48, %v1981_v7  ;;  %v1983_v5 = vsel %vm674_vm4, %v1981_v7, %v1979_v48 }
 0x666   :  { %v1984_v47 = vadd.f32 %v1983_v5, %v8074_v10  ;;  %v1985_v36 = vadd.f32 %v1982_v30, %v8076_v43  ;;  %v301_v5 = vadd.f32 %v7268_v29, %v87_v25 }
 0x668   :  { %v1986_v1 = vadd.f32 %v1985_v36, %v1984_v47  ;;  %v2031_v2 = vpop.permute.xlu1 %2030  ;;  %v2033_v51 = vpop.permute.xlu0 %2032 }
 0x669   :  { %v2034_v52 = vsel %vm674_vm4, %v2031_v2, %v2033_v51  ;;  %v2035_v62 = vsel %vm674_vm4, %v2033_v51, %v2031_v2 }
 0x66a   :  { %v1987_v4 = vmul.f32 0.001953125, %v1986_v1  ;;  %v2036_v6 = vadd.f32 %v2035_v62, %v8092_v23  ;;  %v2037_v12 = vadd.f32 %v2034_v52, %v8094_v42  ;;  %v2045_v23 = vld [vmem:[%s9682_s11] sm:$0x3]  ;;  %v83_v42 = vrot.slane %v76_v50, %v7634_v63 }
 0x66c   :  { %v2038_v20 = vadd.f32 %v2037_v12, %v2036_v6  ;;  %v2040_v21 = vmul.f32 %v1987_v4, %v1987_v4  ;;  %v299_v30 = vadd.f32 %v7266_v28, %v83_v42 }
 0x66e   :  { %v2039_v19 = vmul.f32 0.001953125, %v2038_v20 }
 0x670   :  { %v2041_v10 = vsub.f32 %v2039_v19, %v2040_v21 }
 0x672   :  { %v2042_v22 = vmax.f32 %v2041_v10, 0.0 }
 0x674   :  { %v2043_v43 = vadd.f32 1e-05, %v2042_v22 }
 0x676   :  { %7073 = vrsqrt.f32 %v2043_v43 }
 0x680   :  { %v7074_v59 = vpop.eup %7073 }
 0x681   :  { %v2047_v44 = vcombine.low %v7074_v59, %v7074_v59 }
 0x683   :  { %v2054_v24 = vrot.slane %v2047_v44, %v7626_v57 }
 0x685   :  { %v2061_v48 = vrot.slane %v2054_v24, %v7626_v57 }
 0x687   :  { %v2063_v7 = vmul.f32 %v2061_v48, %v2045_v23 }
 0x689   :  { %v2069_v47 = vrot.slane %v2063_v7, %v7634_v63  ;;  %v2073_v36 = vrot.slane %v2063_v7, %v7637_v0 }
 0x68b   :  { %v2076_v1 = vmul.f32 %v2069_v47, %v1987_v4  ;;  %v2097_v2 = vmul.f32 %v2069_v47, %v299_v30  ;;  %v2077_v51 = vmul.f32 %v2073_v36, %v1987_v4  ;;  %v2098_v52 = vmul.f32 %v2073_v36, %v301_v5  ;;  %v2064_v4 = vld [vmem:[%s9683_s12] sm:$0x3] }
 0x68d   :  { %v2080_v62 = vcombine.low %v2076_v1, %v2077_v51  ;;  %v2106_v6 = vrot.slane %v2098_v52, %v7634_v63  ;;  %v2102_v12 = vrot.slane %v2097_v2, %v7634_v63  ;;  %v2114_v20 = vrot.slane %v2098_v52, %v7637_v0 }
 0x68e   :  { %v2110_v21 = vrot.slane %v2097_v2, %v7637_v0 }
 0x68f   :  { %v2087_v28 = vrot.slane %v2080_v62, %v7626_v57  ;;  %v2147_v29 = vmul.f32 %v2106_v6, %v8004_v31  ;;  %v2149_v19 = vmul.f32 %v2106_v6, %v8014_v13  ;;  %v2146_v10 = vmul.f32 %v2102_v12, %v8002_v54 }
 0x690   :  { %v2148_v22 = vmul.f32 %v2102_v12, %v8006_v34  ;;  %v2151_v43 = vmul.f32 %v2114_v20, %v8027_v8  ;;  %v2153_v59 = vmul.f32 %v2114_v20, %v8037_v26  ;;  %v2150_v44 = vmul.f32 %v2110_v21, %v8022_v60 }
 0x691   :  { %v2094_v24 = vrot.slane %v2087_v28, %v7626_v57  ;;  %v2152_v31 = vmul.f32 %v2110_v21, %v8032_v18  ;;  %v9693_v13 = vsub.s32 2, %v7277_v38  ;;  %v9694_v54 = vsub.s32 3, %v7277_v38 }
 0x693   :  { %v91_v23 = vrot.slane %v76_v50, %v9693_v13  ;;  %v95_v42 = vrot.slane %v76_v50, %v9694_v54  ;;  %v2096_v25 = vsub.f32 %v2064_v4, %v2094_v24 }
 0x695   :  { %v2119_v48 = vrot.slane %v2096_v25, %v7634_v63  ;;  %v2123_v34 = vrot.slane %v2096_v25, %v7637_v0  ;;  %v340_v8 = vadd.f32 %v7270_v32, %v91_v23  ;;  %v342_v26 = vadd.f32 %v7272_v33, %v95_v42 }
 0x697   :  { %v2127_v60 = vmul.f32 %v2123_v34, %v301_v5  ;;  %v2126_v7 = vmul.f32 %v2119_v48, %v299_v30  ;;  %v6701_v48 = vld [vmem:[%s9678_s10 + $0x444] ss:$8 sps:$4 sm:$0xff]   ;;  %v6699_v34 = vld [vmem:[%s9678_s10 + $0x440] ss:$8 sps:$4 sm:$0xff]  }
 0x699   :  { %v2129_v47 = vadd.f32 %v2127_v60, %v342_v26  ;;  %v2128_v36 = vadd.f32 %v2126_v7, %v340_v8  ;;  %v6704_v8 = vld [vmem:[%s9678_s10 + $0x454] ss:$8 sps:$4 sm:$0xff]   ;;  %v6702_v26 = vld [vmem:[%s9678_s10 + $0x450] ss:$8 sps:$4 sm:$0xff]   ;;  %v6707_v60 = vld [vmem:[%s9678_s10 + $0x464] ss:$8 sps:$4 sm:$0xff]  }
 0x69a   :  { %v6705_v7 = vld [vmem:[%s9678_s10 + $0x460] ss:$8 sps:$4 sm:$0xff]  }
 0x69b   :  { %v2137_v18 = vrot.slane %v2129_v47, %v7634_v63  ;;  %v2133_v1 = vrot.slane %v2128_v36, %v7634_v63  ;;  %v2145_v2 = vrot.slane %v2129_v47, %v7637_v0  ;;  %v2141_v50 = vrot.slane %v2128_v36, %v7637_v0  ;;  %v6710_v47 = vld [vmem:[%s9678_s10 + $0x474] ss:$8 sps:$4 sm:$0xff]   ;;  %v6708_v36 = vld [vmem:[%s9678_s10 + $0x470] ss:$8 sps:$4 sm:$0xff]  }
 0x69d   :  { %v2155_v51 = vadd.f32 %v2147_v29, %v2137_v18  ;;  %v2157_v52 = vadd.f32 %v2149_v19, %v2137_v18  ;;  %v2154_v62 = vadd.f32 %v2146_v10, %v2133_v1  ;;  %v2156_v6 = vadd.f32 %v2148_v22, %v2133_v1  ;;  %v6713_v18 = vld [vmem:[%s9678_s10 + $0x484] ss:$8 sps:$4 sm:$0xff]   ;;  %v6711_v1 = vld [vmem:[%s9678_s10 + $0x480] ss:$8 sps:$4 sm:$0xff]  }
 0x69e   :  { %v2159_v12 = vadd.f32 %v2151_v43, %v2145_v2  ;;  %v2161_v32 = vadd.f32 %v2153_v59, %v2145_v2  ;;  %v2158_v20 = vadd.f32 %v2150_v44, %v2141_v50  ;;  %v2160_v33 = vadd.f32 %v2152_v31, %v2141_v50  ;;  %v6716_v2 = vld [vmem:[%s9678_s10 + $0x494] ss:$8 sps:$4 sm:$0xff]   ;;  %v6714_v50 = vld [vmem:[%s9678_s10 + $0x490] ss:$8 sps:$4 sm:$0xff]  }
 0x69f   :  { %v2163_v5 = vmax.f32 %v2155_v51, 0.0  ;;  %v2165_v30 = vmax.f32 %v2157_v52, 0.0  ;;  %v2162_v21 = vmax.f32 %v2154_v62, 0.0  ;;  %v2164_v28 = vmax.f32 %v2156_v6, 0.0  ;;  %v6719_v51 = vld [vmem:[%s9678_s10 + $0x4a4] ss:$8 sps:$4 sm:$0xff]  }
 0x6a0   :  { %v2167_v4 = vmax.f32 %v2159_v12, 0.0  ;;  %v2169_v24 = vmax.f32 %v2161_v32, 0.0  ;;  %v2166_v13 = vmax.f32 %v2158_v20, 0.0  ;;  %v2168_v23 = vmax.f32 %v2160_v33, 0.0  ;;  %v6717_v52 = vld [vmem:[%s9678_s10 + $0x4a0] ss:$8 sps:$4 sm:$0xff]  }
 0x6a1   :  { %v2171_v54 = vadd.f32 %v2163_v5, %v7685_v15  ;;  %v2173_v42 = vadd.f32 %v2165_v30, %v7687_v16  ;;  %v2170_v29 = vadd.f32 %v2162_v21, %v7689_v17  ;;  %v2172_v19 = vadd.f32 %v2164_v28, %v7683_v14  ;;  %v6687_v15 = vld [vmem:[%s9678_s10 + $0x400] ss:$8 sps:$4 sm:$0xff]   ;;  %v6692_v14 = vld [vmem:[%s9678_s10 + $0x414] ss:$8 sps:$4 sm:$0xff]   ;;  %v6690_v17 = vld [vmem:[%s9678_s10 + $0x410] ss:$8 sps:$4 sm:$0xff]  }
 0x6a2   :  { %v2175_v10 = vadd.f32 %v2167_v4, %v7712_v53  ;;  %v2177_v22 = vadd.f32 %v2169_v24, %v7714_v41  ;;  %v2174_v43 = vadd.f32 %v2166_v13, %v7716_v55  ;;  %v2176_v59 = vadd.f32 %v2168_v23, %v7706_v40  ;;  %v6695_v40 = vld [vmem:[%s9678_s10 + $0x424] ss:$8 sps:$4 sm:$0xff]   ;;  %v6693_v53 = vld [vmem:[%s9678_s10 + $0x420] ss:$8 sps:$4 sm:$0xff]   ;;  %v6698_v41 = vld [vmem:[%s9678_s10 + $0x434] ss:$8 sps:$4 sm:$0xff]  }
 0x6a3   :  { %v2179_v44 = vpack.c.bf16 %v2173_v42, %v2171_v54  ;;  %v2178_v31 = vpack.c.bf16 %v2172_v19, %v2170_v29  ;;  %v6696_v55 = vld [vmem:[%s9678_s10 + $0x430] ss:$8 sps:$4 sm:$0xff]   ;;  %v6722_v62 = vld [vmem:[%s9678_s10 + $0x4b4] ss:$8 sps:$4 sm:$0xff]   ;;  %v6725_v12 = vld [vmem:[%s9678_s10 + $0x4c4] ss:$8 sps:$4 sm:$0xff]  }
 0x6a4   :  { %v2181_v25 = vpack.c.bf16 %v2177_v22, %v2175_v10  ;;  %v2180_v16 = vpack.c.bf16 %v2176_v59, %v2174_v43  ;;  %v6720_v6 = vld [vmem:[%s9678_s10 + $0x4b0] ss:$8 sps:$4 sm:$0xff]   ;;  %v6723_v32 = vld [vmem:[%s9678_s10 + $0x4c0] ss:$8 sps:$4 sm:$0xff]   ;;  %v6728_v20 = vld [vmem:[%s9678_s10 + $0x4d4] ss:$8 sps:$4 sm:$0xff]  }
 0x6a5   :  { %2412 = vmatprep.mubr.bf16.mxu1 %v2179_v44  ;;  %v6726_v33 = vld [vmem:[%s9678_s10 + $0x4d0] ss:$8 sps:$4 sm:$0xff]   ;;  %v6731_v5 = vld [vmem:[%s9678_s10 + $0x4e4] ss:$8 sps:$4 sm:$0xff]   ;;  %v6729_v30 = vld [vmem:[%s9678_s10 + $0x4e0] ss:$8 sps:$4 sm:$0xff]  }
 0x6a6   :  { %2413 = vmatmul.mubr.bf16.vlgmr.msra.gmra.mrb[32].mxu1 %v2178_v31  ;;  %v6734_v21 = vld [vmem:[%s9678_s10 + $0x4f4] ss:$8 sps:$4 sm:$0xff]   ;;  %v6732_v28 = vld [vmem:[%s9678_s10 + $0x4f0] ss:$8 sps:$4 sm:$0xff]   ;;  %v6737_v4 = vld [vmem:[%s9678_s10 + $0x304] ss:$8 sps:$4 sm:$0xff]  }
 0x6a7   :  { %2422 = vmatprep.mubr.bf16.mxu1 %v2181_v25  ;;  %2700 = vmatpush1.bf16.msra.mxu1 %v6687_v15  ;;  %v5655_v24 = vld [vmem:[%s9681_s8 + $0x28] sm:$0xff]  ;;  %v5654_v13 = vld [vmem:[%s9681_s8 + $0x20] sm:$0xff]  ;;  %v5656_v54 = vld [vmem:[%s9681_s8 + $0x30] sm:$0xff] }
 0x6a8   :  { %2701 = vmatprep.subr.bf16.mxu1 %v6692_v14  ;;  %v5657_v29 = vld [vmem:[%s9681_s8 + $0x38] sm:$0xff] }
 0x6ab   :  { %2702 = vmatpush1.bf16.msra.mxu1 %v6690_v17 }
 0x6ac   :  { %2703 = vmatprep.subr.bf16.mxu1 %v6695_v40  ;;  %v6735_v40 = vld [vmem:[%s9678_s10 + $0x300] ss:$8 sps:$4 sm:$0xff]  }
 0x6ae   :  { %2423 = vmatmul.mubr.bf16.gmra.mrb[36].mxu1 %v2180_v16 }
 0x6af   :  { %2704 = vmatpush1.bf16.msra.mxu1 %v6693_v53 }
 0x6b0   :  { %2705 = vmatprep.subr.bf16.mxu1 %v6698_v41 }
 0x6b3   :  { %2706 = vmatpush1.bf16.msra.mxu1 %v6696_v55  ;;  %v6740_v55 = vld [vmem:[%s9678_s10 + $0x314] ss:$8 sps:$4 sm:$0xff]  }
 0x6b4   :  { %2707 = vmatprep.subr.bf16.mxu1 %v6701_v48 }
 0x6b7   :  { %2708 = vmatpush1.bf16.msra.mxu1 %v6699_v34 }
 0x6b8   :  { %2709 = vmatprep.subr.bf16.mxu1 %v6704_v8 }
 0x6bb   :  { %2710 = vmatpush1.bf16.msra.mxu1 %v6702_v26 }
 0x6bc   :  { %2711 = vmatprep.subr.bf16.mxu1 %v6707_v60 }
 0x6bf   :  { %2712 = vmatpush1.bf16.msra.mxu1 %v6705_v7 }
 0x6c0   :  { %2713 = vmatprep.subr.bf16.mxu1 %v6710_v47 }
 0x6c3   :  { %2714 = vmatpush1.bf16.msra.mxu1 %v6708_v36  ;;  %v6738_v36 = vld [vmem:[%s9678_s10 + $0x310] ss:$8 sps:$4 sm:$0xff]  }
 0x6c4   :  { %2715 = vmatprep.subr.bf16.mxu1 %v6713_v18 }
 0x6c7   :  { %2716 = vmatpush1.bf16.msra.mxu1 %v6711_v1  ;;  %v6743_v1 = vld [vmem:[%s9678_s10 + $0x324] ss:$8 sps:$4 sm:$0xff]  }
 0x6c8   :  { %2717 = vmatprep.subr.bf16.mxu1 %v6716_v2 }
 0x6cb   :  { %2718 = vmatpush1.bf16.msra.mxu1 %v6714_v50 }
 0x6cc   :  { %2719 = vmatprep.subr.bf16.mxu1 %v6719_v51 }
 0x6cf   :  { %2720 = vmatpush1.bf16.msra.mxu1 %v6717_v52 }
 0x6d0   :  { %2721 = vmatprep.subr.bf16.mxu1 %v6722_v62 }
 0x6d3   :  { %2722 = vmatpush1.bf16.msra.mxu1 %v6720_v6 }
 0x6d4   :  { %2723 = vmatprep.subr.bf16.mxu1 %v6725_v12  ;;  %v6741_v12 = vld [vmem:[%s9678_s10 + $0x320] ss:$8 sps:$4 sm:$0xff]  }
 0x6d7   :  { %2724 = vmatpush1.bf16.msra.mxu1 %v6723_v32 }
 0x6d8   :  { %2725 = vmatprep.subr.bf16.mxu1 %v6728_v20 }
 0x6db   :  { %2726 = vmatpush1.bf16.msra.mxu1 %v6726_v33  ;;  %v6746_v33 = vld [vmem:[%s9678_s10 + $0x334] ss:$8 sps:$4 sm:$0xff]  }
 0x6dc   :  { %2727 = vmatprep.subr.bf16.mxu1 %v6731_v5 }
 0x6df   :  { %2728 = vmatpush1.bf16.msra.mxu1 %v6729_v30 }
 0x6e0   :  { %2729 = vmatprep.subr.bf16.mxu1 %v6734_v21 }
 0x6e3   :  { %2730 = vmatpush1.bf16.msra.mxu1 %v6732_v28  ;;  %v6744_v28 = vld [vmem:[%s9678_s10 + $0x330] ss:$8 sps:$4 sm:$0xff]  }
 0x6e4   :  { %2912 = vmatprep.subr.bf16.mxu1 %v6737_v4 }
 0x779   :  { %v2414_v23 = vpop.f32.mrb[32].mxu1 }
 0x77a   :  { %v2416_v42 = vpop.f32.mrb[33].mxu1  ;;  %v2415_v22 = vadd.f32 %v5654_v13, %v2414_v23  ;;  %v6752_v23 = vld [vmem:[%s9678_s10 + $0x354] ss:$8 sps:$4 sm:$0xff]  }
 0x77b   :  { %v2417_v19 = vadd.f32 %v5655_v24, %v2416_v42  ;;  %v2418_v10 = vpop.f32.mrb[34].mxu1  ;;  %v6755_v42 = vld [vmem:[%s9678_s10 + $0x364] ss:$8 sps:$4 sm:$0xff]  }
 0x77c   :  { %v2419_v43 = vadd.f32 %v5656_v54, %v2418_v10  ;;  %v2420_v59 = vpop.f32.mrb[35].mxu1  ;;  %v8358_v16 = vmax.f32 %v2415_v22, 0.0  ;;  %v6756_v10 = vld [vmem:[%s9678_s10 + $0x370] ss:$8 sps:$4 sm:$0xff]   ;;  %v6761_v22 = vld [vmem:[%s9678_s10 + $0x384] ss:$8 sps:$4 sm:$0xff]  }
 0x77d   :  { %v2421_v44 = vadd.f32 %v5657_v29, %v2420_v59  ;;  %v8354_v15 = vmax.f32 %v2417_v19, 0.0  ;;  %v6758_v19 = vld [vmem:[%s9678_s10 + $0x374] ss:$8 sps:$4 sm:$0xff]  }
 0x77e   :  { %v8352_v31 = vmax.f32 %v2419_v43, 0.0  ;;  %v6759_v43 = vld [vmem:[%s9678_s10 + $0x380] ss:$8 sps:$4 sm:$0xff]   ;;  %v6764_v59 = vld [vmem:[%s9678_s10 + $0x394] ss:$8 sps:$4 sm:$0xff]  }
 0x77f   :  { %v8356_v25 = vmax.f32 %v2421_v44, 0.0  ;;  %v2442_v2 = vrot.slane %v8354_v15, 7  ;;  %v6762_v44 = vld [vmem:[%s9678_s10 + $0x390] ss:$8 sps:$4 sm:$0xff]  }
 0x780   :  { %v2502_v53 = vpack.c.bf16 %v8352_v31, %v8358_v16 }
 0x781   :  { %v2424_v14 = vpop.f32.mrb[36].mxu1  ;;  %v2503_v17 = vpack.c.bf16 %v8356_v25, %v8354_v15  ;;  %v2444_v7 = vrot.slane %v8356_v25, 7 }
 0x782   :  { %v2426_v41 = vpop.f32.mrb[37].mxu1  ;;  %v2425_v8 = vadd.f32 %v5654_v13, %v2424_v14  ;;  %v6747_v13 = vld [vmem:[%s9678_s10 + $0x340] ss:$8 sps:$4 sm:$0xff]   ;;  %v6767_v14 = vld [vmem:[%s9678_s10 + $0x3a4] ss:$8 sps:$4 sm:$0xff]  }
 0x783   :  { %v2427_v48 = vadd.f32 %v5655_v24, %v2426_v41  ;;  %v2428_v34 = vpop.f32.mrb[38].mxu1  ;;  %2731 = vmatprep.mubr.bf16.mxu1 %v2503_v17  ;;  %v2454_v32 = vsel %vm1096_vm5, %v2442_v2, %v2444_v7  ;;  %v6749_v24 = vld [vmem:[%s9678_s10 + $0x344] ss:$8 sps:$4 sm:$0xff]   ;;  %v6765_v17 = vld [vmem:[%s9678_s10 + $0x3a0] ss:$8 sps:$4 sm:$0xff]  }
 0x784   :  { %v2429_v26 = vadd.f32 %v5656_v54, %v2428_v34  ;;  %v2430_v60 = vpop.f32.mrb[39].mxu1  ;;  %2732 = vmatmul.mubr.bf16.vlgmr.msra.gmra.mrb[40].mxu1 %v2502_v53  ;;  %v8384_v52 = vmax.f32 %v2425_v8, 0.0  ;;  %v2460_v21 = vmul.f32 %v2454_v32, %v7733_v49  ;;  %v6750_v54 = vld [vmem:[%s9678_s10 + $0x350] ss:$8 sps:$4 sm:$0xff]   ;;  %v6773_v41 = vld [vmem:[%s9678_s10 + $0x3c4] ss:$8 sps:$4 sm:$0xff]  }
 0x785   :  { %v2431_v47 = vadd.f32 %v5657_v29, %v2430_v60  ;;  %2913 = vmatpush1.bf16.msra.mxu1 %v6735_v40  ;;  %v8380_v50 = vmax.f32 %v2427_v48, 0.0  ;;  %v6753_v29 = vld [vmem:[%s9678_s10 + $0x360] ss:$8 sps:$4 sm:$0xff]   ;;  %v6770_v40 = vld [vmem:[%s9678_s10 + $0x3b4] ss:$8 sps:$4 sm:$0xff]   ;;  %v2441_v60 = vrot.slane %v8358_v16, 7 }
 0x786   :  { %v8374_v18 = vmax.f32 %v2429_v26, 0.0  ;;  %2914 = vmatprep.subr.bf16.mxu1 %v6740_v55  ;;  %v6768_v53 = vld [vmem:[%s9678_s10 + $0x3b0] ss:$8 sps:$4 sm:$0xff]   ;;  %v6771_v55 = vld [vmem:[%s9678_s10 + $0x3c0] ss:$8 sps:$4 sm:$0xff]  }
 0x787   :  { %v8382_v51 = vmax.f32 %v2431_v47, 0.0  ;;  %v6776_v48 = vld [vmem:[%s9678_s10 + $0x3d4] ss:$8 sps:$4 sm:$0xff]   ;;  %v6774_v34 = vld [vmem:[%s9678_s10 + $0x3d0] ss:$8 sps:$4 sm:$0xff]   ;;  %v2443_v47 = vrot.slane %v8352_v31, 7 }
 0x788   :  { %v2504_v20 = vpack.c.bf16 %v8374_v18, %v8384_v52  ;;  %v6779_v8 = vld [vmem:[%s9678_s10 + $0x3e4] ss:$8 sps:$4 sm:$0xff]   ;;  %v2447_v26 = vrot.slane %v8374_v18, 7 }
 0x789   :  { %v2448_v62 = vrot.slane %v8382_v51, 7  ;;  %2915 = vmatpush1.bf16.msra.mxu1 %v6738_v36  ;;  %v2505_v6 = vpack.c.bf16 %v8382_v51, %v8380_v50  ;;  %v6777_v36 = vld [vmem:[%s9678_s10 + $0x3e0] ss:$8 sps:$4 sm:$0xff]   ;;  %v2453_v32 = vsel %vm1096_vm5, %v2441_v60, %v2443_v47 }
 0x78a   :  { %2916 = vmatprep.subr.bf16.mxu1 %v6743_v1  ;;  %v2446_v1 = vrot.slane %v8380_v50, 7 }
 0x78b   :  { %2741 = vmatprep.mubr.bf16.mxu1 %v2505_v6  ;;  %v2456_v5 = vsel %vm1096_vm5, %v2448_v62, %v2442_v2  ;;  %v6782_v2 = vld [vmem:[%s9678_s10 + $0x3f4] ss:$8 sps:$4 sm:$0xff]   ;;  %v2455_v6 = vsel %vm1096_vm5, %v2447_v26, %v2441_v60  ;;  %v6795_v60 = vld [vmem:[%s9678_s10 + $0x540] ss:$8 sps:$4 sm:$0xff]  }
 0x78c   :  { %2742 = vmatmul.mubr.bf16.gmra.mrb[44].mxu1 %v2504_v20  ;;  %v2458_v30 = vmul.f32 %v2456_v5, %v7735_v9  ;;  %v6780_v20 = vld [vmem:[%s9678_s10 + $0x3f0] ss:$8 sps:$4 sm:$0xff]   ;;  %v6785_v5 = vld [vmem:[%s9678_s10 + $0x504] ss:$8 sps:$4 sm:$0xff]  }
 0x78d   :  { %2917 = vmatpush1.bf16.msra.mxu1 %v6741_v12  ;;  %v2450_v12 = vsel %vm1096_vm5, %v2446_v1, %v2448_v62  ;;  %v2452_v62 = vsel %vm1096_vm5, %v2444_v7, %v2446_v1  ;;  %v6788_v7 = vld [vmem:[%s9678_s10 + $0x514] ss:$8 sps:$4 sm:$0xff]   ;;  %v6803_v1 = vld [vmem:[%s9678_s10 + $0x564] ss:$8 sps:$4 sm:$0xff]  }
 0x78e   :  { %2918 = vmatprep.subr.bf16.mxu1 %v6746_v33  ;;  %v2466_v4 = vpack.c.bf16 %v2460_v21, %v2458_v30  ;;  %v2457_v33 = vmul.f32 %v2455_v6, %v7735_v9  ;;  %v2464_v30 = vmul.f32 %v2450_v12, %v7838_v3  ;;  %v2970_v21 = vrot.slane %v8380_v50, 1  ;;  %v6806_v6 = vld [vmem:[%s9678_s10 + $0x574] ss:$8 sps:$4 sm:$0xff]   ;;  %v6804_v12 = vld [vmem:[%s9678_s10 + $0x570] ss:$8 sps:$4 sm:$0xff]  }
 0x790   :  { %2944 = vmatprep.mubr.bf16.mxu1 %v2466_v4  ;;  %v2445_v4 = vrot.slane %v8384_v52, 7 }
 0x791   :  { %2919 = vmatpush1.bf16.msra.mxu1 %v6744_v28  ;;  %v2459_v28 = vmul.f32 %v2453_v32, %v7733_v49  ;;  %v6809_v32 = vld [vmem:[%s9678_s10 + $0x584] ss:$8 sps:$4 sm:$0xff]  }
 0x792   :  { %2920 = vmatprep.subr.bf16.mxu1 %v6749_v24  ;;  %v6783_v24 = vld [vmem:[%s9678_s10 + $0x500] ss:$8 sps:$4 sm:$0xff]  }
 0x795   :  { %2921 = vmatpush1.bf16.msra.mxu1 %v6747_v13  ;;  %v2462_v13 = vmul.f32 %v2452_v62, %v7849_v11  ;;  %v6815_v62 = vld [vmem:[%s9678_s10 + $0x5a4] ss:$8 sps:$4 sm:$0xff]  }
 0x796   :  { %2922 = vmatprep.subr.bf16.mxu1 %v6752_v23  ;;  %v2968_v23 = vrot.slane %v8356_v25, 1 }
 0x799   :  { %2923 = vmatpush1.bf16.msra.mxu1 %v6750_v54  ;;  %v2465_v54 = vpack.c.bf16 %v2459_v28, %v2457_v33  ;;  %v6812_v33 = vld [vmem:[%s9678_s10 + $0x594] ss:$8 sps:$4 sm:$0xff]  }
 0x79a   :  { %2924 = vmatprep.subr.bf16.mxu1 %v6755_v42  ;;  %v2468_v42 = vpack.c.bf16 %v2464_v30, %v2462_v13  ;;  %v6813_v30 = vld [vmem:[%s9678_s10 + $0x5a0] ss:$8 sps:$4 sm:$0xff]   ;;  %v6818_v28 = vld [vmem:[%s9678_s10 + $0x5b4] ss:$8 sps:$4 sm:$0xff]  }
 0x79b   :  { %v6819_v13 = vld [vmem:[%s9678_s10 + $0x5c0] ss:$8 sps:$4 sm:$0xff]  }
 0x79d   :  { %2925 = vmatpush1.bf16.msra.mxu1 %v6753_v29  ;;  %v2449_v29 = vsel %vm1096_vm5, %v2445_v4, %v2447_v26  ;;  %v6797_v26 = vld [vmem:[%s9678_s10 + $0x544] ss:$8 sps:$4 sm:$0xff]  }
 0x79e   :  { %2926 = vmatprep.subr.bf16.mxu1 %v6758_v19  ;;  %v2966_v19 = vrot.slane %v8354_v15, 1 }
 0x7a1   :  { %2927 = vmatpush1.bf16.msra.mxu1 %v6756_v10  ;;  %v2976_v10 = vsel %vm1644_vm6, %v2968_v23, %v2970_v21 }
 0x7a2   :  { %2928 = vmatprep.subr.bf16.mxu1 %v6761_v22  ;;  %v6786_v22 = vld [vmem:[%s9678_s10 + $0x510] ss:$8 sps:$4 sm:$0xff]  }
 0x7a5   :  { %2929 = vmatpush1.bf16.msra.mxu1 %v6759_v43  ;;  %v2451_v43 = vsel %vm1096_vm5, %v2443_v47, %v2445_v4  ;;  %v6800_v47 = vld [vmem:[%s9678_s10 + $0x554] ss:$8 sps:$4 sm:$0xff]   ;;  %v6816_v4 = vld [vmem:[%s9678_s10 + $0x5b0] ss:$8 sps:$4 sm:$0xff]  }
 0x7a6   :  { %2930 = vmatprep.subr.bf16.mxu1 %v6764_v59  ;;  %v2463_v59 = vmul.f32 %v2449_v29, %v7838_v3  ;;  %v2972_v29 = vrot.slane %v8382_v51, 1 }
 0x7a9   :  { %2931 = vmatpush1.bf16.msra.mxu1 %v6762_v44  ;;  %v6791_v44 = vld [vmem:[%s9678_s10 + $0x524] ss:$8 sps:$4 sm:$0xff]  }
 0x7aa   :  { %2932 = vmatprep.subr.bf16.mxu1 %v6767_v14  ;;  %v2978_v14 = vsel %vm1644_vm6, %v2966_v19, %v2968_v23  ;;  %v6824_v23 = vld [vmem:[%s9678_s10 + $0x5d4] ss:$8 sps:$4 sm:$0xff]  }
 0x7ad   :  { %2933 = vmatpush1.bf16.msra.mxu1 %v6765_v17  ;;  %v2984_v17 = vmul.f32 %v2976_v10, %v7877_v27  ;;  %v2967_v10 = vrot.slane %v8352_v31, 1 }
 0x7ae   :  { %2934 = vmatprep.subr.bf16.mxu1 %v6770_v40  ;;  %v2461_v40 = vmul.f32 %v2451_v43, %v7849_v11  ;;  %v6830_v43 = vld [vmem:[%s9678_s10 + $0x5f4] ss:$8 sps:$4 sm:$0xff]  }
 0x7b1   :  { %2935 = vmatpush1.bf16.msra.mxu1 %v6768_v53  ;;  %v6789_v53 = vld [vmem:[%s9678_s10 + $0x520] ss:$8 sps:$4 sm:$0xff]  }
 0x7b2   :  { %2936 = vmatprep.subr.bf16.mxu1 %v6773_v41  ;;  %v2982_v41 = vmul.f32 %v2978_v14, %v7875_v35  ;;  %v2974_v14 = vsel %vm1644_vm6, %v2970_v21, %v2972_v29 }
 0x7b3   :  { %v2986_v21 = vmul.f32 %v2974_v14, %v7976_v61 }
 0x7b5   :  { %2937 = vmatpush1.bf16.msra.mxu1 %v6771_v55  ;;  %v2467_v55 = vpack.c.bf16 %v2463_v59, %v2461_v40  ;;  %v2965_v59 = vrot.slane %v8358_v16, 1 }
 0x7b6   :  { %2938 = vmatprep.subr.bf16.mxu1 %v6776_v48  ;;  %v6794_v48 = vld [vmem:[%s9678_s10 + $0x534] ss:$8 sps:$4 sm:$0xff]  }
 0x7b7   :  { %v2977_v40 = vsel %vm1644_vm6, %v2965_v59, %v2967_v10 }
 0x7b9   :  { %2939 = vmatpush1.bf16.msra.mxu1 %v6774_v34  ;;  %v2990_v34 = vpack.c.bf16 %v2984_v17, %v2982_v41  ;;  %v2980_v17 = vsel %vm1644_vm6, %v2972_v29, %v2966_v19 }
 0x7ba   :  { %2940 = vmatprep.subr.bf16.mxu1 %v6779_v8  ;;  %v6792_v8 = vld [vmem:[%s9678_s10 + $0x530] ss:$8 sps:$4 sm:$0xff]  }
 0x7bd   :  { %2941 = vmatpush1.bf16.msra.mxu1 %v6777_v36  ;;  %v6798_v36 = vld [vmem:[%s9678_s10 + $0x550] ss:$8 sps:$4 sm:$0xff]  }
 0x7be   :  { %2942 = vmatprep.subr.bf16.mxu1 %v6782_v2  ;;  %v6801_v2 = vld [vmem:[%s9678_s10 + $0x560] ss:$8 sps:$4 sm:$0xff]  }
 0x7c1   :  { %2943 = vmatpush1.bf16.msra.mxu1 %v6780_v20  ;;  %v6807_v20 = vld [vmem:[%s9678_s10 + $0x580] ss:$8 sps:$4 sm:$0xff]  }
 0x7c2   :  { %3186 = vmatprep.subr.bf16.mxu1 %v6785_v5  ;;  %v6810_v5 = vld [vmem:[%s9678_s10 + $0x590] ss:$8 sps:$4 sm:$0xff]  }
 0x7c4   :  { %2945 = vmatmul.mubr.bf16.vlgmr.msra.gmra.mrb[40].mxu1 %v2465_v54  ;;  %v6822_v54 = vld [vmem:[%s9678_s10 + $0x5d0] ss:$8 sps:$4 sm:$0xff]  }
 0x7c5   :  { %2954 = vmatprep.mubr.bf16.mxu1 %v2468_v42  ;;  %3187 = vmatpush1.bf16.msra.mxu1 %v6783_v24  ;;  %v6821_v24 = vld [vmem:[%s9678_s10 + $0x5c4] ss:$8 sps:$4 sm:$0xff]   ;;  %v2969_v42 = vrot.slane %v8384_v52, 1 }
 0x7c6   :  { %3188 = vmatprep.subr.bf16.mxu1 %v6788_v7  ;;  %v6827_v7 = vld [vmem:[%s9678_s10 + $0x5e4] ss:$8 sps:$4 sm:$0xff]  }
 0x7c9   :  { %3189 = vmatpush1.bf16.msra.mxu1 %v6786_v22  ;;  %v6825_v22 = vld [vmem:[%s9678_s10 + $0x5e0] ss:$8 sps:$4 sm:$0xff]  }
 0x7ca   :  { %3190 = vmatprep.subr.bf16.mxu1 %v6791_v44  ;;  %v2975_v44 = vsel %vm1644_vm6, %v2967_v10, %v2969_v42 }
 0x7cb   :  { %v2983_v41 = vmul.f32 %v2975_v44, %v7877_v27 }
 0x7cc   :  { %2955 = vmatmul.mubr.bf16.gmra.mrb[44].mxu1 %v2467_v55  ;;  %v2971_v55 = vrot.slane %v8374_v18, 1 }
 0x7cd   :  { %3191 = vmatpush1.bf16.msra.mxu1 %v6789_v53  ;;  %3218 = vmatprep.mubr.bf16.mxu1 %v2990_v34  ;;  %v6828_v53 = vld [vmem:[%s9678_s10 + $0x5f0] ss:$8 sps:$4 sm:$0xff]   ;;  %v2981_v34 = vmul.f32 %v2977_v40, %v7875_v35 }
 0x7ce   :  { %3192 = vmatprep.subr.bf16.mxu1 %v6794_v48  ;;  %v2988_v48 = vmul.f32 %v2980_v17, %v7974_v46 }
 0x7cf   :  { %v2989_v19 = vpack.c.bf16 %v2983_v41, %v2981_v34 }
 0x7d1   :  { %3193 = vmatpush1.bf16.msra.mxu1 %v6792_v8  ;;  %v2992_v8 = vpack.c.bf16 %v2988_v48, %v2986_v21 }
 0x7d2   :  { %3194 = vmatprep.subr.bf16.mxu1 %v6797_v26  ;;  %v2973_v26 = vsel %vm1644_vm6, %v2969_v42, %v2971_v55 }
 0x7d5   :  { %3195 = vmatpush1.bf16.msra.mxu1 %v6795_v60  ;;  %v2979_v60 = vsel %vm1644_vm6, %v2971_v55, %v2965_v59 }
 0x7d6   :  { %3196 = vmatprep.subr.bf16.mxu1 %v6800_v47  ;;  %v2985_v47 = vmul.f32 %v2973_v26, %v7976_v61 }
 0x7d9   :  { %3197 = vmatpush1.bf16.msra.mxu1 %v6798_v36  ;;  %v2987_v36 = vmul.f32 %v2979_v60, %v7974_v46 }
 0x7da   :  { %3198 = vmatprep.subr.bf16.mxu1 %v6803_v1 }
 0x7db   :  { %v2991_v1 = vpack.c.bf16 %v2987_v36, %v2985_v47 }
 0x7dd   :  { %3199 = vmatpush1.bf16.msra.mxu1 %v6801_v2 }
 0x7de   :  { %3200 = vmatprep.subr.bf16.mxu1 %v6806_v6 }
 0x7e1   :  { %3201 = vmatpush1.bf16.msra.mxu1 %v6804_v12 }
 0x7e2   :  { %3202 = vmatprep.subr.bf16.mxu1 %v6809_v32 }
 0x7e5   :  { %3203 = vmatpush1.bf16.msra.mxu1 %v6807_v20 }
 0x7e6   :  { %3204 = vmatprep.subr.bf16.mxu1 %v6812_v33 }
 0x7e9   :  { %3205 = vmatpush1.bf16.msra.mxu1 %v6810_v5 }
 0x7ea   :  { %3206 = vmatprep.subr.bf16.mxu1 %v6815_v62 }
 0x7ed   :  { %3207 = vmatpush1.bf16.msra.mxu1 %v6813_v30 }
 0x7ee   :  { %3208 = vmatprep.subr.bf16.mxu1 %v6818_v28 }
 0x7f1   :  { %3209 = vmatpush1.bf16.msra.mxu1 %v6816_v4 }
 0x7f2   :  { %3210 = vmatprep.subr.bf16.mxu1 %v6821_v24 }
 0x7f5   :  { %3211 = vmatpush1.bf16.msra.mxu1 %v6819_v13 }
 0x7f6   :  { %3212 = vmatprep.subr.bf16.mxu1 %v6824_v23 }
 0x7f9   :  { %3213 = vmatpush1.bf16.msra.mxu1 %v6822_v54 }
 0x7fa   :  { %3214 = vmatprep.subr.bf16.mxu1 %v6827_v7 }
 0x7fd   :  { %3215 = vmatpush1.bf16.msra.mxu1 %v6825_v22 }
 0x7fe   :  { %3216 = vmatprep.subr.bf16.mxu1 %v6830_v43 }
 0x801   :  { %3217 = vmatpush1.bf16.msra.mxu1 %v6828_v53 }
 0x804   :  { %3219 = vmatmul.mubr.bf16.vlgmr.msra.gmra.mrb[40].mxu1 %v2989_v19 }
 0x805   :  { %3228 = vmatprep.mubr.bf16.mxu1 %v2992_v8 }
 0x80c   :  { %3229 = vmatmul.mubr.bf16.gmra.mrb[44].mxu1 %v2991_v1 }
 0x8d7   :  { %v8645_v2 = vpop.f32.mrb[40].mxu1 }
 0x8d8   :  { %v8647_v6 = vpop.f32.mrb[41].mxu1  ;;  %v3291_v32 = vmul.f32 %v8645_v2, %v8645_v2 }
 0x8d9   :  { %v8649_v12 = vpop.f32.mrb[42].mxu1  ;;  %v3292_v62 = vmul.f32 %v8647_v6, %v8647_v6 }
 0x8da   :  { %v3247_v20 = vadd.f32 %v8649_v12, %v8645_v2  ;;  %v3293_v33 = vmul.f32 %v8649_v12, %v8649_v12  ;;  %v8657_v5 = vpop.f32.mrb[43].mxu1 }
 0x8db   :  { %v3256_v30 = vadd.f32 %v8657_v5, %v8647_v6  ;;  %v3294_v28 = vmul.f32 %v8657_v5, %v8657_v5 }
 0x8dc   :  { %v3299_v4 = vadd.f32 %v3293_v33, %v3291_v32 }
 0x8dd   :  { %v3308_v24 = vadd.f32 %v3294_v28, %v3292_v62 }
 0x8df   :  { %v8665_v13 = vpop.f32.mrb[44].mxu1 }
 0x8e0   :  { %v3248_v23 = vadd.f32 %v3247_v20, %v8665_v13  ;;  %v3295_v54 = vmul.f32 %v8665_v13, %v8665_v13  ;;  %v8670_v7 = vpop.f32.mrb[45].mxu1 }
 0x8e1   :  { %v3257_v42 = vadd.f32 %v3256_v30, %v8670_v7  ;;  %v3296_v29 = vmul.f32 %v8670_v7, %v8670_v7  ;;  %v8675_v10 = vpop.f32.mrb[46].mxu1 }
 0x8e2   :  { %v3300_v22 = vadd.f32 %v3299_v4, %v3295_v54  ;;  %v3249_v43 = vadd.f32 %v3248_v23, %v8675_v10  ;;  %v3297_v59 = vmul.f32 %v8675_v10, %v8675_v10  ;;  %v8680_v44 = vpop.f32.mrb[47].mxu1 }
 0x8e3   :  { %v3309_v14 = vadd.f32 %v3308_v24, %v3296_v29  ;;  %v3258_v17 = vadd.f32 %v3257_v42, %v8680_v44  ;;  %v3298_v40 = vmul.f32 %v8680_v44, %v8680_v44 }
 0x8e4   :  { %v3250_v53 = vrot.slane %v3249_v43, 4  ;;  %v3301_v41 = vadd.f32 %v3300_v22, %v3297_v59 }
 0x8e5   :  { %v3259_v55 = vrot.slane %v3258_v17, 4  ;;  %v3310_v21 = vadd.f32 %v3309_v14, %v3298_v40 }
 0x8e6   :  { %v3251_v48 = vadd.f32 %v3250_v53, %v3249_v43  ;;  %v3302_v34 = vrot.slane %v3301_v41, 4 }
 0x8e7   :  { %v3260_v19 = vadd.f32 %v3259_v55, %v3258_v17  ;;  %v3311_v8 = vrot.slane %v3310_v21, 4 }
 0x8e8   :  { %v3252_v26 = vrot.slane %v3251_v48, 2  ;;  %v3303_v60 = vadd.f32 %v3302_v34, %v3301_v41 }
 0x8e9   :  { %v3261_v47 = vrot.slane %v3260_v19, 2  ;;  %v3312_v36 = vadd.f32 %v3311_v8, %v3310_v21  ;;  %v6833_v8 = vld [vmem:[%s9676_s9 + $0x204] ss:$8 sps:$4 sm:$0xff]  }
 0x8ea   :  { %v3253_v1 = vadd.f32 %v3252_v26, %v3251_v48  ;;  %v3304_v32 = vrot.slane %v3303_v60, 2  ;;  %v6831_v26 = vld [vmem:[%s9676_s9 + $0x200] ss:$8 sps:$4 sm:$0xff]   ;;  %3685 = vmatprep.subr.bf16.mxu0 %v6833_v8  ;;  %v6858_v8 = vld [vmem:[%s9676_s9 + $0x290] ss:$8 sps:$4 sm:$0xff]  }
 0x8eb   :  { %v3262_v20 = vadd.f32 %v3261_v47, %v3260_v19  ;;  %v3313_v33 = vrot.slane %v3312_v36, 2  ;;  %3686 = vmatpush1.bf16.msra.mxu0 %v6831_v26  ;;  %v6863_v26 = vld [vmem:[%s9676_s9 + $0x2a4] ss:$8 sps:$4 sm:$0xff]  }
 0x8ec   :  { %v3254_v62 = vrot.slane %v3253_v1, 1  ;;  %v3305_v30 = vadd.f32 %v3304_v32, %v3303_v60  ;;  %v6836_v60 = vld [vmem:[%s9676_s9 + $0x214] ss:$8 sps:$4 sm:$0xff]  }
 0x8ed   :  { %v3263_v28 = vrot.slane %v3262_v20, 1  ;;  %v3314_v4 = vadd.f32 %v3313_v33, %v3312_v36  ;;  %3687 = vmatprep.subr.bf16.mxu0 %v6836_v60  ;;  %v6861_v60 = vld [vmem:[%s9676_s9 + $0x2a0] ss:$8 sps:$4 sm:$0xff]  }
 0x8ee   :  { %v3255_v24 = vadd.f32 %v3254_v62, %v3253_v1  ;;  %v3306_v23 = vrot.slane %v3305_v30, 1  ;;  %v6834_v1 = vld [vmem:[%s9676_s9 + $0x210] ss:$8 sps:$4 sm:$0xff]  }
 0x8ef   :  { %v3264_v54 = vadd.f32 %v3263_v28, %v3262_v20  ;;  %v3315_v42 = vrot.slane %v3314_v4, 1  ;;  %3688 = vmatpush1.bf16.msra.mxu0 %v6834_v1  ;;  %v6869_v1 = vld [vmem:[%s9676_s9 + $0x2c4] ss:$8 sps:$4 sm:$0xff]  }
 0x8f0   :  { %3265 = vrot.lane.b32.xlu1 %v3255_v24, %s7082_s24  ;;  %v3307_v29 = vadd.f32 %v3306_v23, %v3305_v30  ;;  %v6839_v30 = vld [vmem:[%s9676_s9 + $0x224] ss:$8 sps:$4 sm:$0xff]  }
 0x8f1   :  { %3267 = vrot.lane.b32.xlu0 %v3264_v54, %s7082_s24  ;;  %v3316_v22 = vadd.f32 %v3315_v42, %v3314_v4  ;;  %3689 = vmatprep.subr.bf16.mxu0 %v6839_v30  ;;  %v6870_v30 = vld [vmem:[%s9676_s9 + $0x2d0] ss:$8 sps:$4 sm:$0xff]  }
 0x8f4   :  { %3317 = vrot.lane.b32.xlu1 %v3307_v29, %s7082_s24 }
 0x8f5   :  { %3319 = vrot.lane.b32.xlu0 %v3316_v22, %s7082_s24 }
 0x962   :  { %v3266_v43 = vpop.permute.xlu1 %3265 }
 0x963   :  { %v3268_v59 = vpop.permute.xlu0 %3267 }
 0x964   :  { %v3269_v14 = vsel %vm656_vm2, %v3266_v43, %v3268_v59  ;;  %v3270_v17 = vsel %vm656_vm2, %v3268_v59, %v3266_v43  ;;  %v6840_v43 = vld [vmem:[%s9676_s9 + $0x230] ss:$8 sps:$4 sm:$0xff]   ;;  %v6845_v59 = vld [vmem:[%s9676_s9 + $0x244] ss:$8 sps:$4 sm:$0xff]  }
 0x965   :  { %v3271_v40 = vadd.f32 %v3270_v17, %v3255_v24  ;;  %v3272_v53 = vadd.f32 %v3269_v14, %v3264_v54  ;;  %v6837_v24 = vld [vmem:[%s9676_s9 + $0x220] ss:$8 sps:$4 sm:$0xff]   ;;  %v6848_v17 = vld [vmem:[%s9676_s9 + $0x254] ss:$8 sps:$4 sm:$0xff]  }
 0x966   :  { %v3318_v41 = vpop.permute.xlu1 %3317  ;;  %3690 = vmatpush1.bf16.msra.mxu0 %v6837_v24  ;;  %v6843_v14 = vld [vmem:[%s9676_s9 + $0x240] ss:$8 sps:$4 sm:$0xff]   ;;  %v6878_v24 = vld [vmem:[%s9676_s9 + $0x2f4] ss:$8 sps:$4 sm:$0xff]  }
 0x967   :  { %3273 = vrot.lane.b32.xlu1 %v3271_v40, %s7083_s18  ;;  %3275 = vrot.lane.b32.xlu0 %v3272_v53, %s7083_s18  ;;  %v3320_v55 = vpop.permute.xlu0 %3319 }
 0x968   :  { %v3321_v21 = vsel %vm656_vm2, %v3318_v41, %v3320_v55  ;;  %v3322_v48 = vsel %vm656_vm2, %v3320_v55, %v3318_v41  ;;  %v6849_v41 = vld [vmem:[%s9676_s9 + $0x260] ss:$8 sps:$4 sm:$0xff]   ;;  %v6854_v55 = vld [vmem:[%s9676_s9 + $0x274] ss:$8 sps:$4 sm:$0xff]  }
 0x969   :  { %v3323_v34 = vadd.f32 %v3322_v48, %v3307_v29  ;;  %v3324_v19 = vadd.f32 %v3321_v21, %v3316_v22  ;;  %v6842_v22 = vld [vmem:[%s9676_s9 + $0x234] ss:$8 sps:$4 sm:$0xff]   ;;  %v6852_v21 = vld [vmem:[%s9676_s9 + $0x270] ss:$8 sps:$4 sm:$0xff]   ;;  %v6857_v48 = vld [vmem:[%s9676_s9 + $0x284] ss:$8 sps:$4 sm:$0xff]  }
 0x96a   :  { %3691 = vmatprep.subr.bf16.mxu0 %v6842_v22 }
 0x96b   :  { %3325 = vrot.lane.b32.xlu1 %v3323_v34, %s7083_s18  ;;  %3327 = vrot.lane.b32.xlu0 %v3324_v19, %s7083_s18 }
 0x96c   :  { %3692 = vmatpush1.bf16.msra.mxu0 %v6840_v43 }
 0x96d   :  { %3693 = vmatprep.subr.bf16.mxu0 %v6845_v59 }
 0x970   :  { %3694 = vmatpush1.bf16.msra.mxu0 %v6843_v14 }
 0x971   :  { %3695 = vmatprep.subr.bf16.mxu0 %v6848_v17 }
 0x9d9   :  { %v3274_v47 = vpop.permute.xlu1 %3273  ;;  %v3276_v36 = vpop.permute.xlu0 %3275 }
 0x9da   :  { %v3277_v32 = vsel %vm665_vm3, %v3274_v47, %v3276_v36  ;;  %v3278_v20 = vsel %vm665_vm3, %v3276_v36, %v3274_v47  ;;  %v6866_v47 = vld [vmem:[%s9676_s9 + $0x2b4] ss:$8 sps:$4 sm:$0xff]   ;;  %v6864_v36 = vld [vmem:[%s9676_s9 + $0x2b0] ss:$8 sps:$4 sm:$0xff]  }
 0x9db   :  { %v8717_v33 = vadd.f32 %v3278_v20, %v3271_v40  ;;  %v8719_v62 = vadd.f32 %v3277_v32, %v3272_v53  ;;  %v6846_v40 = vld [vmem:[%s9676_s9 + $0x250] ss:$8 sps:$4 sm:$0xff]   ;;  %v6851_v53 = vld [vmem:[%s9676_s9 + $0x264] ss:$8 sps:$4 sm:$0xff]   ;;  %v6867_v32 = vld [vmem:[%s9676_s9 + $0x2c0] ss:$8 sps:$4 sm:$0xff]  }
 0x9dc   :  { %3696 = vmatpush1.bf16.msra.mxu0 %v6846_v40  ;;  %v6872_v20 = vld [vmem:[%s9676_s9 + $0x2d4] ss:$8 sps:$4 sm:$0xff]  }
 0x9dd   :  { %v3326_v28 = vpop.permute.xlu1 %3325  ;;  %3281 = vrot.lane.b32.xlu1 %v8717_v33, %s7084_s19  ;;  %3283 = vrot.lane.b32.xlu0 %v8719_v62, %s7084_s19  ;;  %v3328_v4 = vpop.permute.xlu0 %3327 }
 0x9de   :  { %v3329_v23 = vsel %vm665_vm3, %v3326_v28, %v3328_v4  ;;  %v3330_v54 = vsel %vm665_vm3, %v3328_v4, %v3326_v28  ;;  %3697 = vmatprep.subr.bf16.mxu0 %v6851_v53  ;;  %v6875_v28 = vld [vmem:[%s9676_s9 + $0x2e4] ss:$8 sps:$4 sm:$0xff]   ;;  %v6873_v4 = vld [vmem:[%s9676_s9 + $0x2e0] ss:$8 sps:$4 sm:$0xff]  }
 0x9df   :  { %v8735_v42 = vadd.f32 %v3330_v54, %v3323_v34  ;;  %v8737_v29 = vadd.f32 %v3329_v23, %v3324_v19  ;;  %v6855_v34 = vld [vmem:[%s9676_s9 + $0x280] ss:$8 sps:$4 sm:$0xff]   ;;  %v6860_v19 = vld [vmem:[%s9676_s9 + $0x294] ss:$8 sps:$4 sm:$0xff]   ;;  %v6876_v23 = vld [vmem:[%s9676_s9 + $0x2f0] ss:$8 sps:$4 sm:$0xff]  }
 0x9e0   :  { %3698 = vmatpush1.bf16.msra.mxu0 %v6849_v41  ;;  %v6881_v54 = vld [vmem:[%s9678_s10 + $0x704] ss:$8 sps:$4 sm:$0xff]  }
 0x9e1   :  { %3333 = vrot.lane.b32.xlu1 %v8735_v42, %s7084_s19  ;;  %3335 = vrot.lane.b32.xlu0 %v8737_v29, %s7084_s19 }
 0x9e2   :  { %3699 = vmatprep.subr.bf16.mxu0 %v6854_v55 }
 0x9e4   :  { %3700 = vmatpush1.bf16.msra.mxu0 %v6852_v21 }
 0x9e5   :  { %3701 = vmatprep.subr.bf16.mxu0 %v6857_v48 }
 0x9e8   :  { %3702 = vmatpush1.bf16.msra.mxu0 %v6855_v34 }
 0x9e9   :  { %3703 = vmatprep.subr.bf16.mxu0 %v6860_v19 }
 0x9ec   :  { %3704 = vmatpush1.bf16.msra.mxu0 %v6858_v8 }
 0x9ed   :  { %3705 = vmatprep.subr.bf16.mxu0 %v6863_v26 }
 0x9f0   :  { %3706 = vmatpush1.bf16.msra.mxu0 %v6861_v60 }
 0x9f1   :  { %3707 = vmatprep.subr.bf16.mxu0 %v6866_v47 }
 0x9f4   :  { %3708 = vmatpush1.bf16.msra.mxu0 %v6864_v36 }
 0x9f5   :  { %3709 = vmatprep.subr.bf16.mxu0 %v6869_v1 }
 0x9f8   :  { %3710 = vmatpush1.bf16.msra.mxu0 %v6867_v32  ;;  %v98_v32 = vsub.s32 4, %v7277_v38 }
 0x9f9   :  { %3711 = vmatprep.subr.bf16.mxu0 %v6872_v20  ;;  %v102_v20 = vsub.s32 5, %v7277_v38 }
 0x9fc   :  { %3712 = vmatpush1.bf16.msra.mxu0 %v6870_v30 }
 0x9fd   :  { %3713 = vmatprep.subr.bf16.mxu0 %v6875_v28 }
 0xa00   :  { %3714 = vmatpush1.bf16.msra.mxu0 %v6873_v4 }
 0xa01   :  { %3715 = vmatprep.subr.bf16.mxu0 %v6878_v24 }
 0xa04   :  { %3716 = vmatpush1.bf16.msra.mxu0 %v6876_v23 }
 0xa05   :  { %4004 = vmatprep.subr.bf16.mxu0 %v6881_v54 }
 0xa4f   :  { %v3282_v22 = vpop.permute.xlu1 %3281  ;;  %v3284_v43 = vpop.permute.xlu0 %3283 }
 0xa50   :  { %v3285_v59 = vsel %vm674_vm4, %v3282_v22, %v3284_v43  ;;  %v3286_v14 = vsel %vm674_vm4, %v3284_v43, %v3282_v22 }
 0xa51   :  { %v3287_v17 = vadd.f32 %v3286_v14, %v8717_v33  ;;  %v3288_v40 = vadd.f32 %v3285_v59, %v8719_v62 }
 0xa53   :  { %v3289_v53 = vadd.f32 %v3288_v40, %v3287_v17  ;;  %v3334_v41 = vpop.permute.xlu1 %3333  ;;  %v3336_v55 = vpop.permute.xlu0 %3335 }
 0xa54   :  { %v3337_v21 = vsel %vm674_vm4, %v3334_v41, %v3336_v55  ;;  %v3338_v48 = vsel %vm674_vm4, %v3336_v55, %v3334_v41 }
 0xa55   :  { %v3290_v34 = vmul.f32 0.001953125, %v3289_v53  ;;  %v3339_v19 = vadd.f32 %v3338_v48, %v8735_v42  ;;  %v3340_v8 = vadd.f32 %v3337_v21, %v8737_v29  ;;  %v5882_v42 = vld [vmem:[%s9682_s11 + $0x2] sm:$0x3] }
 0xa56   :  { %v7079_v29 = vld [vmem:[%s9675_s7] sm:$0xff] }
 0xa57   :  { %v3341_v26 = vadd.f32 %v3340_v8, %v3339_v19  ;;  %v3343_v60 = vmul.f32 %v3290_v34, %v3290_v34  ;;  %v99_v4 = vrot.slane %v7079_v29, %v98_v32  ;;  %v103_v24 = vrot.slane %v7079_v29, %v102_v20 }
 0xa58   :  { %v106_v8 = vsub.s32 6, %v7277_v38 }
 0xa59   :  { %v3342_v47 = vmul.f32 0.001953125, %v3341_v26  ;;  %v381_v22 = vadd.f32 %v7743_v56, %v99_v4  ;;  %v383_v43 = vadd.f32 %v7748_v45, %v103_v24  ;;  %v110_v56 = vsub.s32 7, %v7277_v38  ;;  %v7046_v38 = vld [vmem:[%s9684_s13 + $0x18] sm:$0xff]  }
 0xa5b   :  { %v3344_v33 = vsub.f32 %v3342_v47, %v3343_v60 }
 0xa5d   :  { %v3345_v36 = vmax.f32 %v3344_v33, 0.0  ;;  %v5883_v33 = vld [vmem:[%s9683_s12 + $0x2] sm:$0x3] }
 0xa5f   :  { %v3346_v62 = vadd.f32 1e-05, %v3345_v36 }
 0xa61   :  { %7075 = vrsqrt.f32 %v3346_v62 }
 0xa6b   :  { %v7076_v1 = vpop.eup %7075 }
 0xa6c   :  { %v3351_v30 = vcombine.low %v7076_v1, %v7076_v1 }
 0xa6e   :  { %v3358_v28 = vrot.slane %v3351_v30, %v7626_v57  ;;  %v107_v30 = vrot.slane %v7079_v29, %v106_v8 }
 0xa70   :  { %v3365_v23 = vrot.slane %v3358_v28, %v7626_v57  ;;  %v422_v4 = vadd.f32 %v7274_v37, %v107_v30  ;;  %v6891_v30 = vld [vmem:[%s9678_s10 + $0x740] ss:$8 sps:$4 sm:$0xff]  }
 0xa72   :  { %v3367_v54 = vmul.f32 %v5882_v42, %v3365_v23 }
 0xa74   :  { %v3374_v59 = vrot.slane %v3367_v54, %v7634_v63  ;;  %v3378_v14 = vrot.slane %v3367_v54, %v7637_v0 }
 0xa76   :  { %v3381_v17 = vmul.f32 %v3374_v59, %v3290_v34  ;;  %v3402_v40 = vmul.f32 %v3374_v59, %v381_v22  ;;  %v3382_v53 = vmul.f32 %v3378_v14, %v3290_v34  ;;  %v3403_v41 = vmul.f32 %v3378_v14, %v383_v43 }
 0xa78   :  { %v3385_v55 = vcombine.low %v3381_v17, %v3382_v53  ;;  %v3411_v21 = vrot.slane %v3403_v41, %v7634_v63  ;;  %v3407_v48 = vrot.slane %v3402_v40, %v7634_v63  ;;  %v3419_v19 = vrot.slane %v3403_v41, %v7637_v0 }
 0xa79   :  { %v3415_v45 = vrot.slane %v3402_v40, %v7637_v0 }
 0xa7a   :  { %v3392_v26 = vrot.slane %v3385_v55, %v7626_v57  ;;  %v3452_v60 = vmul.f32 %v3411_v21, %v8647_v6  ;;  %v3454_v34 = vmul.f32 %v3411_v21, %v8657_v5  ;;  %v3451_v47 = vmul.f32 %v3407_v48, %v8645_v2 }
 0xa7b   :  { %v3453_v36 = vmul.f32 %v3407_v48, %v8649_v12  ;;  %v3456_v62 = vmul.f32 %v3419_v19, %v8670_v7  ;;  %v3458_v1 = vmul.f32 %v3419_v19, %v8680_v44  ;;  %v3455_v32 = vmul.f32 %v3415_v45, %v8665_v13 }
 0xa7c   :  { %v3399_v20 = vrot.slane %v3392_v26, %v7626_v57  ;;  %v3457_v6 = vmul.f32 %v3415_v45, %v8675_v10  ;;  %v111_v5 = vrot.slane %v7079_v29, %v110_v56 }
 0xa7e   :  { %v3401_v28 = vsub.f32 %v5883_v33, %v3399_v20  ;;  %v424_v12 = vadd.f32 %v7279_v39, %v111_v5  ;;  %v6896_v5 = vld [vmem:[%s9678_s10 + $0x754] ss:$8 sps:$4 sm:$0xff]  }
 0xa80   :  { %v3424_v2 = vrot.slane %v3401_v28, %v7634_v63  ;;  %v3428_v42 = vrot.slane %v3401_v28, %v7637_v0  ;;  %v6894_v28 = vld [vmem:[%s9678_s10 + $0x750] ss:$8 sps:$4 sm:$0xff]  }
 0xa82   :  { %v3432_v7 = vmul.f32 %v3428_v42, %v383_v43  ;;  %v3431_v24 = vmul.f32 %v3424_v2, %v381_v22  ;;  %v6899_v2 = vld [vmem:[%s9678_s10 + $0x764] ss:$8 sps:$4 sm:$0xff]   ;;  %v6897_v42 = vld [vmem:[%s9678_s10 + $0x760] ss:$8 sps:$4 sm:$0xff]  }
 0xa84   :  { %v3434_v44 = vadd.f32 %v3432_v7, %v424_v12  ;;  %v3433_v23 = vadd.f32 %v3431_v24, %v422_v4  ;;  %v6902_v4 = vld [vmem:[%s9678_s10 + $0x774] ss:$8 sps:$4 sm:$0xff]   ;;  %v6900_v12 = vld [vmem:[%s9678_s10 + $0x770] ss:$8 sps:$4 sm:$0xff]   ;;  %v6905_v7 = vld [vmem:[%s9678_s10 + $0x784] ss:$8 sps:$4 sm:$0xff]  }
 0xa85   :  { %v6903_v24 = vld [vmem:[%s9678_s10 + $0x780] ss:$8 sps:$4 sm:$0xff]  }
 0xa86   :  { %v3442_v13 = vrot.slane %v3434_v44, %v7634_v63  ;;  %v3438_v54 = vrot.slane %v3433_v23, %v7634_v63  ;;  %v3450_v10 = vrot.slane %v3434_v44, %v7637_v0  ;;  %v3446_v29 = vrot.slane %v3433_v23, %v7637_v0  ;;  %v6908_v44 = vld [vmem:[%s9678_s10 + $0x794] ss:$8 sps:$4 sm:$0xff]   ;;  %v6906_v23 = vld [vmem:[%s9678_s10 + $0x790] ss:$8 sps:$4 sm:$0xff]  }
 0xa88   :  { %v3460_v59 = vadd.f32 %v3452_v60, %v3442_v13  ;;  %v3462_v14 = vadd.f32 %v3454_v34, %v3442_v13  ;;  %v3459_v17 = vadd.f32 %v3451_v47, %v3438_v54  ;;  %v3461_v40 = vadd.f32 %v3453_v36, %v3438_v54  ;;  %v6911_v13 = vld [vmem:[%s9678_s10 + $0x7a4] ss:$8 sps:$4 sm:$0xff]   ;;  %v6909_v54 = vld [vmem:[%s9678_s10 + $0x7a0] ss:$8 sps:$4 sm:$0xff]  }
 0xa89   :  { %v3464_v53 = vadd.f32 %v3456_v62, %v3450_v10  ;;  %v3466_v37 = vadd.f32 %v3458_v1, %v3450_v10  ;;  %v3463_v41 = vadd.f32 %v3455_v32, %v3446_v29  ;;  %v3465_v39 = vadd.f32 %v3457_v6, %v3446_v29  ;;  %v6893_v6 = vld [vmem:[%s9678_s10 + $0x744] ss:$8 sps:$4 sm:$0xff]   ;;  %v6914_v10 = vld [vmem:[%s9678_s10 + $0x7b4] ss:$8 sps:$4 sm:$0xff]   ;;  %v6912_v29 = vld [vmem:[%s9678_s10 + $0x7b0] ss:$8 sps:$4 sm:$0xff]  }
 0xa8a   :  { %v3468_v43 = vmax.f32 %v3460_v59, 0.0  ;;  %v3470_v22 = vmax.f32 %v3462_v14, 0.0  ;;  %v3467_v55 = vmax.f32 %v3459_v17, 0.0  ;;  %v3469_v21 = vmax.f32 %v3461_v40, 0.0  ;;  %v6917_v59 = vld [vmem:[%s9678_s10 + $0x7c4] ss:$8 sps:$4 sm:$0xff]  }
 0xa8b   :  { %v3472_v48 = vmax.f32 %v3464_v53, 0.0  ;;  %v3474_v19 = vmax.f32 %v3466_v37, 0.0  ;;  %v3471_v8 = vmax.f32 %v3463_v41, 0.0  ;;  %v3473_v56 = vmax.f32 %v3465_v39, 0.0  ;;  %v6915_v14 = vld [vmem:[%s9678_s10 + $0x7c0] ss:$8 sps:$4 sm:$0xff]  }
 0xa8c   :  { %v3476_v45 = vadd.f32 %v3468_v43, %v8354_v15  ;;  %v3478_v26 = vadd.f32 %v3470_v22, %v8356_v25  ;;  %v3475_v60 = vadd.f32 %v3467_v55, %v8358_v16  ;;  %v3477_v34 = vadd.f32 %v3469_v21, %v8352_v31  ;;  %v6879_v15 = vld [vmem:[%s9678_s10 + $0x700] ss:$8 sps:$4 sm:$0xff]   ;;  %v6884_v31 = vld [vmem:[%s9678_s10 + $0x714] ss:$8 sps:$4 sm:$0xff]   ;;  %v6882_v16 = vld [vmem:[%s9678_s10 + $0x710] ss:$8 sps:$4 sm:$0xff]  }
 0xa8d   :  { %v3480_v47 = vadd.f32 %v3472_v48, %v8380_v50  ;;  %v3482_v33 = vadd.f32 %v3474_v19, %v8382_v51  ;;  %v3479_v36 = vadd.f32 %v3471_v8, %v8384_v52  ;;  %v3481_v62 = vadd.f32 %v3473_v56, %v8374_v18  ;;  %v6887_v18 = vld [vmem:[%s9678_s10 + $0x724] ss:$8 sps:$4 sm:$0xff]   ;;  %v6885_v50 = vld [vmem:[%s9678_s10 + $0x720] ss:$8 sps:$4 sm:$0xff]   ;;  %v6890_v51 = vld [vmem:[%s9678_s10 + $0x734] ss:$8 sps:$4 sm:$0xff]  }
 0xa8e   :  { %v3484_v1 = vpack.c.bf16 %v3478_v26, %v3476_v45  ;;  %v3483_v32 = vpack.c.bf16 %v3477_v34, %v3475_v60  ;;  %v6888_v52 = vld [vmem:[%s9678_s10 + $0x730] ss:$8 sps:$4 sm:$0xff]   ;;  %v6920_v17 = vld [vmem:[%s9678_s10 + $0x7d4] ss:$8 sps:$4 sm:$0xff]   ;;  %v6923_v53 = vld [vmem:[%s9678_s10 + $0x7e4] ss:$8 sps:$4 sm:$0xff]  }
 0xa8f   :  { %v3486_v20 = vpack.c.bf16 %v3482_v33, %v3480_v47  ;;  %v3485_v25 = vpack.c.bf16 %v3481_v62, %v3479_v36  ;;  %v6918_v40 = vld [vmem:[%s9678_s10 + $0x7d0] ss:$8 sps:$4 sm:$0xff]   ;;  %v6921_v37 = vld [vmem:[%s9678_s10 + $0x7e0] ss:$8 sps:$4 sm:$0xff]   ;;  %v6926_v39 = vld [vmem:[%s9678_s10 + $0x7f4] ss:$8 sps:$4 sm:$0xff]  }
 0xa90   :  { %3717 = vmatprep.mubr.bf16.mxu0 %v3484_v1  ;;  %v6924_v41 = vld [vmem:[%s9678_s10 + $0x7f0] ss:$8 sps:$4 sm:$0xff]   ;;  %v6929_v43 = vld [vmem:[%s9678_s10 + $0x604] ss:$8 sps:$4 sm:$0xff]  }
 0xa91   :  { %3718 = vmatmul.mubr.bf16.vlgmr.msra.gmra.mrb[16].mxu0 %v3483_v32  ;;  %v5917_v22 = vld [vmem:[%s9681_s8 + $0x48] sm:$0xff]  ;;  %v5916_v55 = vld [vmem:[%s9681_s8 + $0x40] sm:$0xff]  ;;  %v5918_v48 = vld [vmem:[%s9681_s8 + $0x50] sm:$0xff] }
 0xa92   :  { %3727 = vmatprep.mubr.bf16.mxu0 %v3486_v20  ;;  %4005 = vmatpush1.bf16.msra.mxu0 %v6879_v15  ;;  %v5919_v8 = vld [vmem:[%s9681_s8 + $0x58] sm:$0xff]  ;;  %v6927_v20 = vld [vmem:[%s9678_s10 + $0x600] ss:$8 sps:$4 sm:$0xff]  }
 0xa93   :  { %4006 = vmatprep.subr.bf16.mxu0 %v6884_v31 }
 0xa96   :  { %4007 = vmatpush1.bf16.msra.mxu0 %v6882_v16  ;;  %v6932_v16 = vld [vmem:[%s9678_s10 + $0x614] ss:$8 sps:$4 sm:$0xff]  }
 0xa97   :  { %4008 = vmatprep.subr.bf16.mxu0 %v6887_v18 }
 0xa99   :  { %3728 = vmatmul.mubr.bf16.gmra.mrb[20].mxu0 %v3485_v25 }
 0xa9a   :  { %4009 = vmatpush1.bf16.msra.mxu0 %v6885_v50 }
 0xa9b   :  { %4010 = vmatprep.subr.bf16.mxu0 %v6890_v51 }
 0xa9e   :  { %4011 = vmatpush1.bf16.msra.mxu0 %v6888_v52 }
 0xa9f   :  { %4012 = vmatprep.subr.bf16.mxu0 %v6893_v6 }
 0xaa2   :  { %4013 = vmatpush1.bf16.msra.mxu0 %v6891_v30 }
 0xaa3   :  { %4014 = vmatprep.subr.bf16.mxu0 %v6896_v5 }
 0xaa6   :  { %4015 = vmatpush1.bf16.msra.mxu0 %v6894_v28  ;;  %v6930_v28 = vld [vmem:[%s9678_s10 + $0x610] ss:$8 sps:$4 sm:$0xff]  }
 0xaa7   :  { %4016 = vmatprep.subr.bf16.mxu0 %v6899_v2 }
 0xaaa   :  { %4017 = vmatpush1.bf16.msra.mxu0 %v6897_v42  ;;  %v6935_v42 = vld [vmem:[%s9678_s10 + $0x624] ss:$8 sps:$4 sm:$0xff]  }
 0xaab   :  { %4018 = vmatprep.subr.bf16.mxu0 %v6902_v4 }
 0xaae   :  { %4019 = vmatpush1.bf16.msra.mxu0 %v6900_v12 }
 0xaaf   :  { %4020 = vmatprep.subr.bf16.mxu0 %v6905_v7 }
 0xab2   :  { %4021 = vmatpush1.bf16.msra.mxu0 %v6903_v24 }
 0xab3   :  { %4022 = vmatprep.subr.bf16.mxu0 %v6908_v44 }
 0xab6   :  { %4023 = vmatpush1.bf16.msra.mxu0 %v6906_v23 }
 0xab7   :  { %4024 = vmatprep.subr.bf16.mxu0 %v6911_v13  ;;  %v6933_v13 = vld [vmem:[%s9678_s10 + $0x620] ss:$8 sps:$4 sm:$0xff]  }
 0xaba   :  { %4025 = vmatpush1.bf16.msra.mxu0 %v6909_v54 }
 0xabb   :  { %4026 = vmatprep.subr.bf16.mxu0 %v6914_v10 }
 0xabe   :  { %4027 = vmatpush1.bf16.msra.mxu0 %v6912_v29  ;;  %v6938_v29 = vld [vmem:[%s9678_s10 + $0x634] ss:$8 sps:$4 sm:$0xff]  }
 0xabf   :  { %4028 = vmatprep.subr.bf16.mxu0 %v6917_v59 }
 0xac2   :  { %4029 = vmatpush1.bf16.msra.mxu0 %v6915_v14 }
 0xac3   :  { %4030 = vmatprep.subr.bf16.mxu0 %v6920_v17 }
 0xac6   :  { %4031 = vmatpush1.bf16.msra.mxu0 %v6918_v40  ;;  %v6936_v40 = vld [vmem:[%s9678_s10 + $0x630] ss:$8 sps:$4 sm:$0xff]  }
 0xac7   :  { %4032 = vmatprep.subr.bf16.mxu0 %v6923_v53 }
 0xaca   :  { %4033 = vmatpush1.bf16.msra.mxu0 %v6921_v37  ;;  %v6941_v37 = vld [vmem:[%s9678_s10 + $0x644] ss:$8 sps:$4 sm:$0xff]  }
 0xacb   :  { %4034 = vmatprep.subr.bf16.mxu0 %v6926_v39  ;;  %v6944_v39 = vld [vmem:[%s9678_s10 + $0x654] ss:$8 sps:$4 sm:$0xff]  }
 0xace   :  { %4035 = vmatpush1.bf16.msra.mxu0 %v6924_v41  ;;  %v6939_v41 = vld [vmem:[%s9678_s10 + $0x640] ss:$8 sps:$4 sm:$0xff]  }
 0xacf   :  { %4217 = vmatprep.subr.bf16.mxu0 %v6929_v43  ;;  %v6942_v43 = vld [vmem:[%s9678_s10 + $0x650] ss:$8 sps:$4 sm:$0xff]  }
 0xb64   :  { %v3719_v21 = vpop.f32.mrb[16].mxu0 }
 0xb65   :  { %v3721_v19 = vpop.f32.mrb[17].mxu0  ;;  %v3720_v26 = vadd.f32 %v5916_v55, %v3719_v21  ;;  %v6950_v21 = vld [vmem:[%s9678_s10 + $0x674] ss:$8 sps:$4 sm:$0xff]  }
 0xb66   :  { %v3722_v56 = vadd.f32 %v5917_v22, %v3721_v19  ;;  %v3723_v45 = vpop.f32.mrb[18].mxu0  ;;  %v6953_v19 = vld [vmem:[%s9678_s10 + $0x684] ss:$8 sps:$4 sm:$0xff]  }
 0xb67   :  { %v3724_v60 = vadd.f32 %v5918_v48, %v3723_v45  ;;  %v3725_v34 = vpop.f32.mrb[19].mxu0  ;;  %v8999_v1 = vmax.f32 %v3720_v26, 0.0  ;;  %v6954_v45 = vld [vmem:[%s9678_s10 + $0x690] ss:$8 sps:$4 sm:$0xff]   ;;  %v6959_v26 = vld [vmem:[%s9678_s10 + $0x6a4] ss:$8 sps:$4 sm:$0xff]  }
 0xb68   :  { %v3726_v47 = vadd.f32 %v5919_v8, %v3725_v34  ;;  %v8995_v36 = vmax.f32 %v3722_v56, 0.0  ;;  %v6956_v56 = vld [vmem:[%s9678_s10 + $0x694] ss:$8 sps:$4 sm:$0xff]  }
 0xb69   :  { %v8993_v33 = vmax.f32 %v3724_v60, 0.0  ;;  %v6957_v60 = vld [vmem:[%s9678_s10 + $0x6a0] ss:$8 sps:$4 sm:$0xff]   ;;  %v6962_v34 = vld [vmem:[%s9678_s10 + $0x6b4] ss:$8 sps:$4 sm:$0xff]  }
 0xb6a   :  { %v8997_v62 = vmax.f32 %v3726_v47, 0.0  ;;  %v3747_v4 = vrot.slane %v8995_v36, 7  ;;  %v6960_v47 = vld [vmem:[%s9678_s10 + $0x6b0] ss:$8 sps:$4 sm:$0xff]  }
 0xb6b   :  { %v3807_v25 = vpack.c.bf16 %v8993_v33, %v8999_v1 }
 0xb6c   :  { %v3729_v32 = vpop.f32.mrb[20].mxu0  ;;  %v3808_v15 = vpack.c.bf16 %v8997_v62, %v8995_v36  ;;  %v3749_v30 = vrot.slane %v8997_v62, 7 }
 0xb6d   :  { %v3731_v31 = vpop.f32.mrb[21].mxu0  ;;  %v3730_v51 = vadd.f32 %v5916_v55, %v3729_v32  ;;  %v6945_v55 = vld [vmem:[%s9678_s10 + $0x660] ss:$8 sps:$4 sm:$0xff]   ;;  %v6965_v32 = vld [vmem:[%s9678_s10 + $0x6c4] ss:$8 sps:$4 sm:$0xff]  }
 0xb6e   :  { %v3732_v18 = vadd.f32 %v5917_v22, %v3731_v31  ;;  %v3733_v50 = vpop.f32.mrb[22].mxu0  ;;  %4036 = vmatprep.mubr.bf16.mxu0 %v3808_v15  ;;  %v3759_v54 = vsel %vm1096_vm5, %v3747_v4, %v3749_v30  ;;  %v6947_v22 = vld [vmem:[%s9678_s10 + $0x664] ss:$8 sps:$4 sm:$0xff]   ;;  %v6963_v15 = vld [vmem:[%s9678_s10 + $0x6c0] ss:$8 sps:$4 sm:$0xff]  }
 0xb6f   :  { %v3734_v52 = vadd.f32 %v5918_v48, %v3733_v50  ;;  %v3735_v6 = vpop.f32.mrb[23].mxu0  ;;  %4037 = vmatmul.mubr.bf16.vlgmr.msra.gmra.mrb[24].mxu0 %v3807_v25  ;;  %v9025_v24 = vmax.f32 %v3730_v51, 0.0  ;;  %v3765_v17 = vmul.f32 %v3759_v54, %v7733_v49  ;;  %v6948_v48 = vld [vmem:[%s9678_s10 + $0x670] ss:$8 sps:$4 sm:$0xff]   ;;  %v6971_v31 = vld [vmem:[%s9678_s10 + $0x6e4] ss:$8 sps:$4 sm:$0xff]  }
 0xb70   :  { %v3736_v5 = vadd.f32 %v5919_v8, %v3735_v6  ;;  %4218 = vmatpush1.bf16.msra.mxu0 %v6927_v20  ;;  %v9021_v12 = vmax.f32 %v3732_v18, 0.0  ;;  %v6951_v8 = vld [vmem:[%s9678_s10 + $0x680] ss:$8 sps:$4 sm:$0xff]   ;;  %v6968_v20 = vld [vmem:[%s9678_s10 + $0x6d4] ss:$8 sps:$4 sm:$0xff]   ;;  %v3746_v18 = vrot.slane %v8999_v1, 7 }
 0xb71   :  { %v9015_v2 = vmax.f32 %v3734_v52, 0.0  ;;  %4219 = vmatprep.subr.bf16.mxu0 %v6932_v16  ;;  %v6966_v25 = vld [vmem:[%s9678_s10 + $0x6d0] ss:$8 sps:$4 sm:$0xff]   ;;  %v3748_v50 = vrot.slane %v8993_v33, 7  ;;  %v6969_v51 = vld [vmem:[%s9678_s10 + $0x6e0] ss:$8 sps:$4 sm:$0xff]  }
 0xb72   :  { %v9023_v7 = vmax.f32 %v3736_v5, 0.0  ;;  %v3751_v52 = vrot.slane %v9021_v12, 7  ;;  %v6974_v6 = vld [vmem:[%s9678_s10 + $0x6f4] ss:$8 sps:$4 sm:$0xff]  }
 0xb73   :  { %v3809_v10 = vpack.c.bf16 %v9015_v2, %v9025_v24  ;;  %v3752_v16 = vrot.slane %v9015_v2, 7 }
 0xb74   :  { %v3753_v44 = vrot.slane %v9023_v7, 7  ;;  %4220 = vmatpush1.bf16.msra.mxu0 %v6930_v28  ;;  %v3810_v23 = vpack.c.bf16 %v9023_v7, %v9021_v12 }
 0xb75   :  { %4221 = vmatprep.subr.bf16.mxu0 %v6935_v42  ;;  %v3760_v5 = vsel %vm1096_vm5, %v3752_v16, %v3746_v18  ;;  %v3758_v42 = vsel %vm1096_vm5, %v3746_v18, %v3748_v50  ;;  %v6999_v18 = vld [vmem:[%s9678_s10 + $0x880] ss:$8 sps:$4 sm:$0xff]  }
 0xb76   :  { %4046 = vmatprep.mubr.bf16.mxu0 %v3810_v23  ;;  %v3761_v59 = vsel %vm1096_vm5, %v3753_v44, %v3747_v4  ;;  %v3755_v28 = vsel %vm1096_vm5, %v3751_v52, %v3753_v44  ;;  %v6972_v4 = vld [vmem:[%s9678_s10 + $0x6f0] ss:$8 sps:$4 sm:$0xff]   ;;  %v3762_v23 = vmul.f32 %v3760_v5, %v7735_v9  ;;  %v3757_v44 = vsel %vm1096_vm5, %v3749_v30, %v3751_v52  ;;  %v6980_v30 = vld [vmem:[%s9678_s10 + $0x814] ss:$8 sps:$4 sm:$0xff]   ;;  %v7007_v52 = vld [vmem:[%s9678_s10 + $0x8a4] ss:$8 sps:$4 sm:$0xff]  }
 0xb77   :  { %4047 = vmatmul.mubr.bf16.gmra.mrb[28].mxu0 %v3809_v10  ;;  %v3763_v14 = vmul.f32 %v3761_v59, %v7735_v9  ;;  %v3769_v54 = vmul.f32 %v3755_v28, %v7838_v3  ;;  %v4275_v10 = vrot.slane %v9021_v12, 1  ;;  %v3750_v59 = vrot.slane %v9025_v24, 7  ;;  %v6975_v9 = vld [vmem:[%s9678_s10 + $0x800] ss:$8 sps:$4 sm:$0xff]   ;;  %v7010_v5 = vld [vmem:[%s9678_s10 + $0x8b4] ss:$8 sps:$4 sm:$0xff]  }
 0xb78   :  { %4222 = vmatpush1.bf16.msra.mxu0 %v6933_v13  ;;  %v6977_v13 = vld [vmem:[%s9678_s10 + $0x804] ss:$8 sps:$4 sm:$0xff]   ;;  %v7008_v28 = vld [vmem:[%s9678_s10 + $0x8b0] ss:$8 sps:$4 sm:$0xff]  }
 0xb79   :  { %4223 = vmatprep.subr.bf16.mxu0 %v6938_v29  ;;  %v3771_v53 = vpack.c.bf16 %v3765_v17, %v3763_v14  ;;  %v3764_v29 = vmul.f32 %v3758_v42, %v7733_v49  ;;  %v3767_v14 = vmul.f32 %v3757_v44, %v7849_v11  ;;  %v4273_v17 = vrot.slane %v8997_v62, 1  ;;  %v7013_v42 = vld [vmem:[%s9678_s10 + $0x8c4] ss:$8 sps:$4 sm:$0xff]  }
 0xb7a   :  { %v3754_v49 = vsel %vm1096_vm5, %v3750_v59, %v3752_v16  ;;  %v7001_v16 = vld [vmem:[%s9678_s10 + $0x884] ss:$8 sps:$4 sm:$0xff]  }
 0xb7b   :  { %4249 = vmatprep.mubr.bf16.mxu0 %v3771_v53  ;;  %v3773_v53 = vpack.c.bf16 %v3769_v54, %v3767_v14  ;;  %v7019_v44 = vld [vmem:[%s9678_s10 + $0x8e4] ss:$8 sps:$4 sm:$0xff]   ;;  %v4274_v54 = vrot.slane %v9025_v24, 1  ;;  %v7022_v14 = vld [vmem:[%s9678_s10 + $0x8f4] ss:$8 sps:$4 sm:$0xff]  }
 0xb7c   :  { %4224 = vmatpush1.bf16.msra.mxu0 %v6936_v40  ;;  %v3770_v40 = vpack.c.bf16 %v3764_v29, %v3762_v23  ;;  %v7016_v23 = vld [vmem:[%s9678_s10 + $0x8d4] ss:$8 sps:$4 sm:$0xff]   ;;  %v4277_v29 = vrot.slane %v9023_v7, 1 }
 0xb7d   :  { %4225 = vmatprep.subr.bf16.mxu0 %v6941_v37  ;;  %v4271_v37 = vrot.slane %v8995_v36, 1 }
 0xb80   :  { %4226 = vmatpush1.bf16.msra.mxu0 %v6939_v41  ;;  %v4281_v41 = vsel %vm1644_vm6, %v4273_v17, %v4275_v10 }
 0xb81   :  { %4227 = vmatprep.subr.bf16.mxu0 %v6944_v39  ;;  %v6978_v39 = vld [vmem:[%s9678_s10 + $0x810] ss:$8 sps:$4 sm:$0xff]  }
 0xb84   :  { %4228 = vmatpush1.bf16.msra.mxu0 %v6942_v43  ;;  %v3756_v43 = vsel %vm1096_vm5, %v3748_v50, %v3750_v59  ;;  %v7004_v50 = vld [vmem:[%s9678_s10 + $0x894] ss:$8 sps:$4 sm:$0xff]   ;;  %v4272_v59 = vrot.slane %v8993_v33, 1 }
 0xb85   :  { %4229 = vmatprep.subr.bf16.mxu0 %v6947_v22  ;;  %v3768_v22 = vmul.f32 %v3754_v49, %v7838_v3 }
 0xb88   :  { %4230 = vmatpush1.bf16.msra.mxu0 %v6945_v55  ;;  %v6983_v55 = vld [vmem:[%s9678_s10 + $0x824] ss:$8 sps:$4 sm:$0xff]  }
 0xb89   :  { %4231 = vmatprep.subr.bf16.mxu0 %v6950_v21  ;;  %v4283_v21 = vsel %vm1644_vm6, %v4271_v37, %v4273_v17  ;;  %v4270_v17 = vrot.slane %v8999_v1, 1 }
 0xb8a   :  { %v4287_v3 = vmul.f32 %v4283_v21, %v7875_v35 }
 0xb8b   :  { %v4282_v49 = vsel %vm1644_vm6, %v4270_v17, %v4272_v59 }
 0xb8c   :  { %4232 = vmatpush1.bf16.msra.mxu0 %v6948_v48  ;;  %v4289_v48 = vmul.f32 %v4281_v41, %v7877_v27  ;;  %v7020_v41 = vld [vmem:[%s9678_s10 + $0x8f0] ss:$8 sps:$4 sm:$0xff]  }
 0xb8d   :  { %4233 = vmatprep.subr.bf16.mxu0 %v6953_v19  ;;  %v3766_v19 = vmul.f32 %v3756_v43, %v7849_v11  ;;  %v6984_v11 = vld [vmem:[%s9678_s10 + $0x830] ss:$8 sps:$4 sm:$0xff]   ;;  %v4276_v43 = vrot.slane %v9015_v2, 1 }
 0xb90   :  { %4234 = vmatpush1.bf16.msra.mxu0 %v6951_v8  ;;  %v6981_v8 = vld [vmem:[%s9678_s10 + $0x820] ss:$8 sps:$4 sm:$0xff]  }
 0xb91   :  { %4235 = vmatprep.subr.bf16.mxu0 %v6956_v56  ;;  %v3772_v56 = vpack.c.bf16 %v3768_v22, %v3766_v19  ;;  %v4284_v19 = vsel %vm1644_vm6, %v4276_v43, %v4270_v17 }
 0xb94   :  { %4236 = vmatpush1.bf16.msra.mxu0 %v6954_v45  ;;  %v6986_v45 = vld [vmem:[%s9678_s10 + $0x834] ss:$8 sps:$4 sm:$0xff]  }
 0xb95   :  { %4237 = vmatprep.subr.bf16.mxu0 %v6959_v26  ;;  %v4295_v26 = vpack.c.bf16 %v4289_v48, %v4287_v3  ;;  %v4278_v48 = vsel %vm1644_vm6, %v4274_v54, %v4276_v43 }
 0xb98   :  { %4238 = vmatpush1.bf16.msra.mxu0 %v6957_v60  ;;  %v6989_v60 = vld [vmem:[%s9678_s10 + $0x844] ss:$8 sps:$4 sm:$0xff]  }
 0xb99   :  { %4239 = vmatprep.subr.bf16.mxu0 %v6962_v34  ;;  %v6987_v34 = vld [vmem:[%s9678_s10 + $0x840] ss:$8 sps:$4 sm:$0xff]  }
 0xb9c   :  { %4240 = vmatpush1.bf16.msra.mxu0 %v6960_v47  ;;  %v6992_v47 = vld [vmem:[%s9678_s10 + $0x854] ss:$8 sps:$4 sm:$0xff]  }
 0xb9d   :  { %4241 = vmatprep.subr.bf16.mxu0 %v6965_v32  ;;  %v6990_v32 = vld [vmem:[%s9678_s10 + $0x850] ss:$8 sps:$4 sm:$0xff]  }
 0xba0   :  { %4242 = vmatpush1.bf16.msra.mxu0 %v6963_v15  ;;  %v6995_v15 = vld [vmem:[%s9678_s10 + $0x864] ss:$8 sps:$4 sm:$0xff]  }
 0xba1   :  { %4243 = vmatprep.subr.bf16.mxu0 %v6968_v20  ;;  %v6993_v20 = vld [vmem:[%s9678_s10 + $0x860] ss:$8 sps:$4 sm:$0xff]  }
 0xba4   :  { %4244 = vmatpush1.bf16.msra.mxu0 %v6966_v25  ;;  %v6998_v25 = vld [vmem:[%s9678_s10 + $0x874] ss:$8 sps:$4 sm:$0xff]  }
 0xba5   :  { %4245 = vmatprep.subr.bf16.mxu0 %v6971_v31  ;;  %v6996_v31 = vld [vmem:[%s9678_s10 + $0x870] ss:$8 sps:$4 sm:$0xff]  }
 0xba8   :  { %4246 = vmatpush1.bf16.msra.mxu0 %v6969_v51  ;;  %v7002_v51 = vld [vmem:[%s9678_s10 + $0x890] ss:$8 sps:$4 sm:$0xff]  }
 0xba9   :  { %4247 = vmatprep.subr.bf16.mxu0 %v6974_v6  ;;  %v7005_v6 = vld [vmem:[%s9678_s10 + $0x8a0] ss:$8 sps:$4 sm:$0xff]  }
 0xbac   :  { %4248 = vmatpush1.bf16.msra.mxu0 %v6972_v4  ;;  %v7011_v4 = vld [vmem:[%s9678_s10 + $0x8c0] ss:$8 sps:$4 sm:$0xff]  }
 0xbad   :  { %4491 = vmatprep.subr.bf16.mxu0 %v6977_v13  ;;  %v7014_v13 = vld [vmem:[%s9678_s10 + $0x8d0] ss:$8 sps:$4 sm:$0xff]  }
 0xbaf   :  { %4250 = vmatmul.mubr.bf16.vlgmr.msra.gmra.mrb[24].mxu0 %v3770_v40  ;;  %v4280_v40 = vsel %vm1644_vm6, %v4272_v59, %v4274_v54 }
 0xbb0   :  { %4259 = vmatprep.mubr.bf16.mxu0 %v3773_v53  ;;  %4492 = vmatpush1.bf16.msra.mxu0 %v6975_v9  ;;  %v7017_v9 = vld [vmem:[%s9678_s10 + $0x8e0] ss:$8 sps:$4 sm:$0xff]   ;;  %v4285_v53 = vsel %vm1644_vm6, %v4277_v29, %v4271_v37 }
 0xbb1   :  { %4493 = vmatprep.subr.bf16.mxu0 %v6980_v30  ;;  %v4279_v30 = vsel %vm1644_vm6, %v4275_v10, %v4277_v29  ;;  %v4293_v22 = vmul.f32 %v4285_v53, %v7974_v46 }
 0xbb2   :  { %v4291_v10 = vmul.f32 %v4279_v30, %v7976_v61 }
 0xbb4   :  { %4494 = vmatpush1.bf16.msra.mxu0 %v6978_v39  ;;  %v4288_v39 = vmul.f32 %v4280_v40, %v7877_v27  ;;  %v4297_v21 = vpack.c.bf16 %v4293_v22, %v4291_v10  ;;  %v4290_v27 = vmul.f32 %v4278_v48, %v7976_v61 }
 0xbb5   :  { %4495 = vmatprep.subr.bf16.mxu0 %v6983_v55  ;;  %v4286_v55 = vmul.f32 %v4282_v49, %v7875_v35 }
 0xbb7   :  { %4260 = vmatmul.mubr.bf16.gmra.mrb[28].mxu0 %v3772_v56  ;;  %v4294_v37 = vpack.c.bf16 %v4288_v39, %v4286_v55 }
 0xbb8   :  { %4496 = vmatpush1.bf16.msra.mxu0 %v6981_v8  ;;  %4523 = vmatprep.mubr.bf16.mxu0 %v4295_v26  ;;  %v4292_v8 = vmul.f32 %v4284_v19, %v7974_v46 }
 0xbb9   :  { %4497 = vmatprep.subr.bf16.mxu0 %v6986_v45 }
 0xbba   :  { %v4296_v3 = vpack.c.bf16 %v4292_v8, %v4290_v27 }
 0xbbc   :  { %4498 = vmatpush1.bf16.msra.mxu0 %v6984_v11 }
 0xbbd   :  { %4499 = vmatprep.subr.bf16.mxu0 %v6989_v60 }
 0xbc0   :  { %4500 = vmatpush1.bf16.msra.mxu0 %v6987_v34 }
 0xbc1   :  { %4501 = vmatprep.subr.bf16.mxu0 %v6992_v47 }
 0xbc4   :  { %4502 = vmatpush1.bf16.msra.mxu0 %v6990_v32 }
 0xbc5   :  { %4503 = vmatprep.subr.bf16.mxu0 %v6995_v15 }
 0xbc8   :  { %4504 = vmatpush1.bf16.msra.mxu0 %v6993_v20 }
 0xbc9   :  { %4505 = vmatprep.subr.bf16.mxu0 %v6998_v25 }
 0xbcc   :  { %4506 = vmatpush1.bf16.msra.mxu0 %v6996_v31 }
 0xbcd   :  { %4507 = vmatprep.subr.bf16.mxu0 %v7001_v16 }
 0xbd0   :  { %4508 = vmatpush1.bf16.msra.mxu0 %v6999_v18 }
 0xbd1   :  { %4509 = vmatprep.subr.bf16.mxu0 %v7004_v50 }
 0xbd4   :  { %4510 = vmatpush1.bf16.msra.mxu0 %v7002_v51 }
 0xbd5   :  { %4511 = vmatprep.subr.bf16.mxu0 %v7007_v52 }
 0xbd8   :  { %4512 = vmatpush1.bf16.msra.mxu0 %v7005_v6 }
 0xbd9   :  { %4513 = vmatprep.subr.bf16.mxu0 %v7010_v5 }
 0xbdc   :  { %4514 = vmatpush1.bf16.msra.mxu0 %v7008_v28 }
 0xbdd   :  { %4515 = vmatprep.subr.bf16.mxu0 %v7013_v42 }
 0xbe0   :  { %4516 = vmatpush1.bf16.msra.mxu0 %v7011_v4 }
 0xbe1   :  { %4517 = vmatprep.subr.bf16.mxu0 %v7016_v23 }
 0xbe4   :  { %4518 = vmatpush1.bf16.msra.mxu0 %v7014_v13 }
 0xbe5   :  { %4519 = vmatprep.subr.bf16.mxu0 %v7019_v44 }
 0xbe8   :  { %4520 = vmatpush1.bf16.msra.mxu0 %v7017_v9 }
 0xbe9   :  { %4521 = vmatprep.subr.bf16.mxu0 %v7022_v14 }
 0xbec   :  { %4522 = vmatpush1.bf16.msra.mxu0 %v7020_v41 }
 0xbef   :  { %4524 = vmatmul.mubr.bf16.vlgmr.msra.gmra.mrb[24].mxu0 %v4294_v37 }
 0xbf0   :  { %4533 = vmatprep.mubr.bf16.mxu0 %v4297_v21 }
 0xbf7   :  { %4534 = vmatmul.mubr.bf16.gmra.mrb[28].mxu0 %v4296_v3 }
 0xcc2   :  { %v9286_v56 = vpop.f32.mrb[24].mxu0 }
 0xcc3   :  { %v9288_v35 = vpop.f32.mrb[25].mxu0  ;;  %v4596_v26 = vmul.f32 %v9286_v56, %v9286_v56 }
 0xcc4   :  { %v9290_v45 = vpop.f32.mrb[26].mxu0  ;;  %v4597_v46 = vmul.f32 %v9288_v35, %v9288_v35 }
 0xcc5   :  { %v4552_v11 = vadd.f32 %v9290_v45, %v9286_v56  ;;  %v4598_v60 = vmul.f32 %v9290_v45, %v9290_v45  ;;  %v9298_v61 = vpop.f32.mrb[27].mxu0 }
 0xcc6   :  { %v4561_v34 = vadd.f32 %v9298_v61, %v9288_v35  ;;  %v4599_v47 = vmul.f32 %v9298_v61, %v9298_v61 }
 0xcc7   :  { %v4604_v32 = vadd.f32 %v4598_v60, %v4596_v26 }
 0xcc8   :  { %v4613_v15 = vadd.f32 %v4599_v47, %v4597_v46 }
 0xcca   :  { %v9306_v20 = vpop.f32.mrb[28].mxu0 }
 0xccb   :  { %v4553_v25 = vadd.f32 %v4552_v11, %v9306_v20  ;;  %v4600_v31 = vmul.f32 %v9306_v20, %v9306_v20  ;;  %v9311_v16 = vpop.f32.mrb[29].mxu0 }
 0xccc   :  { %v4562_v18 = vadd.f32 %v4561_v34, %v9311_v16  ;;  %v4601_v50 = vmul.f32 %v9311_v16, %v9311_v16  ;;  %v9316_v51 = vpop.f32.mrb[30].mxu0 }
 0xccd   :  { %v4605_v52 = vadd.f32 %v4604_v32, %v4600_v31  ;;  %v4554_v6 = vadd.f32 %v4553_v25, %v9316_v51  ;;  %v4602_v5 = vmul.f32 %v9316_v51, %v9316_v51  ;;  %v9321_v28 = vpop.f32.mrb[31].mxu0 }
 0xcce   :  { %v4614_v42 = vadd.f32 %v4613_v15, %v4601_v50  ;;  %v4563_v4 = vadd.f32 %v4562_v18, %v9321_v28  ;;  %v4603_v23 = vmul.f32 %v9321_v28, %v9321_v28 }
 0xccf   :  { %v4555_v13 = vrot.slane %v4554_v6, 4  ;;  %v4606_v44 = vadd.f32 %v4605_v52, %v4602_v5 }
 0xcd0   :  { %v4564_v54 = vrot.slane %v4563_v4, 4  ;;  %v4615_v29 = vadd.f32 %v4614_v42, %v4603_v23 }
 0xcd1   :  { %v4556_v59 = vadd.f32 %v4555_v13, %v4554_v6  ;;  %v4607_v9 = vrot.slane %v4606_v44, 4 }
 0xcd2   :  { %v4565_v14 = vadd.f32 %v4564_v54, %v4563_v4  ;;  %v4616_v17 = vrot.slane %v4615_v29, 4 }
 0xcd3   :  { %v4557_v40 = vrot.slane %v4556_v59, 2  ;;  %v4608_v30 = vadd.f32 %v4607_v9, %v4606_v44 }
 0xcd4   :  { %v4566_v53 = vrot.slane %v4565_v14, 2  ;;  %v4617_v49 = vadd.f32 %v4616_v17, %v4615_v29  ;;  %v7023_v17 = vld [vmem:[%s9684_s13 + $0xc0] sm:$0xff]  }
 0xcd5   :  { %v4558_v41 = vadd.f32 %v4557_v40, %v4556_v59  ;;  %v4609_v39 = vrot.slane %v4608_v30, 2  ;;  %v7024_v40 = vld [vmem:[%s9684_s13 + $0x80] sm:$0xff]   ;;  %6258 = vmatprep.subr.bf16.mxu1 %v7023_v17 }
 0xcd6   :  { %v4567_v43 = vadd.f32 %v4566_v53, %v4565_v14  ;;  %v4618_v10 = vrot.slane %v4617_v49, 2  ;;  %6259 = vmatpush3.bf16.msra.mxu1 %v7024_v40  ;;  %v7026_v53 = vld [vmem:[%s9684_s13 + $0x88] sm:$0xff]  }
 0xcd7   :  { %v4559_v22 = vrot.slane %v4558_v41, 1  ;;  %v4610_v55 = vadd.f32 %v4609_v39, %v4608_v30  ;;  %v7025_v30 = vld [vmem:[%s9684_s13 + $0xc8] sm:$0xff]   ;;  %v7029_v39 = vld [vmem:[%s9684_s13 + $0xd8] sm:$0xff]  }
 0xcd8   :  { %v4568_v37 = vrot.slane %v4567_v43, 1  ;;  %v4619_v21 = vadd.f32 %v4618_v10, %v4617_v49  ;;  %6260 = vmatprep.subr.bf16.mxu1 %v7025_v30  ;;  %v7027_v49 = vld [vmem:[%s9684_s13 + $0xd0] sm:$0xff]   ;;  %v7031_v10 = vld [vmem:[%s9684_s13 + $0xe0] sm:$0xff]  }
 0xcd9   :  { %v4560_v48 = vadd.f32 %v4559_v22, %v4558_v41  ;;  %v4611_v19 = vrot.slane %v4610_v55, 1  ;;  %v7028_v41 = vld [vmem:[%s9684_s13 + $0x90] sm:$0xff]   ;;  %v7032_v22 = vld [vmem:[%s9684_s13 + $0xa0] sm:$0xff]  }
 0xcda   :  { %v4569_v27 = vadd.f32 %v4568_v37, %v4567_v43  ;;  %v4620_v8 = vrot.slane %v4619_v21, 1  ;;  %6261 = vmatpush3.bf16.msra.mxu1 %v7026_v53  ;;  %v7030_v43 = vld [vmem:[%s9684_s13 + $0x98] sm:$0xff]   ;;  %v7034_v37 = vld [vmem:[%s9684_s13 + $0xa8] sm:$0xff]   ;;  %v9695_v30 = vld [vmem:[#allocation4_spill] sm:$0xff] }
 0xcdb   :  { %4570 = vrot.lane.b32.xlu1 %v4560_v48, %s7082_s24  ;;  %v4612_v3 = vadd.f32 %v4611_v19, %v4610_v55  ;;  %6262 = vmatprep.subr.bf16.mxu1 %v7027_v49  ;;  %v7033_v55 = vld [vmem:[%s9684_s13 + $0xe8] sm:$0xff]   ;;  %v7037_v19 = vld [vmem:[%s9684_s13 + $0xf8] sm:$0xff]  }
 0xcdc   :  { %4572 = vrot.lane.b32.xlu0 %v4569_v27, %s7082_s24  ;;  %v4621_v26 = vadd.f32 %v4620_v8, %v4619_v21  ;;  %v7035_v21 = vld [vmem:[%s9684_s13 + $0xf0] sm:$0xff]   ;;  %v7039_v8 = vld [vmem:[%s9684_s13 + $0x40] sm:$0xff]   ;;  %v9696_v49 = vld [vmem:[#allocation5_spill] sm:$0xff] }
 0xcde   :  { %6263 = vmatpush3.bf16.msra.mxu1 %v7028_v41 }
 0xcdf   :  { %4622 = vrot.lane.b32.xlu1 %v4612_v3, %s7082_s24  ;;  %6264 = vmatprep.subr.bf16.mxu1 %v7029_v39 }
 0xce0   :  { %4624 = vrot.lane.b32.xlu0 %v4621_v26, %s7082_s24 }
 0xce2   :  { %6265 = vmatpush3.bf16.msra.mxu1 %v7030_v43 }
 0xce3   :  { %6266 = vmatprep.subr.bf16.mxu1 %v7031_v10 }
 0xce6   :  { %6267 = vmatpush3.bf16.msra.mxu1 %v7032_v22 }
 0xce7   :  { %6268 = vmatprep.subr.bf16.mxu1 %v7033_v55 }
 0xcea   :  { %6269 = vmatpush3.bf16.msra.mxu1 %v7034_v37 }
 0xceb   :  { %6270 = vmatprep.subr.bf16.mxu1 %v7035_v21 }
 0xd4d   :  { %v4571_v11 = vpop.permute.xlu1 %4570 }
 0xd4e   :  { %v4573_v60 = vpop.permute.xlu0 %4572 }
 0xd4f   :  { %v4574_v46 = vsel %vm656_vm2, %v4571_v11, %v4573_v60  ;;  %v4575_v34 = vsel %vm656_vm2, %v4573_v60, %v4571_v11 }
 0xd50   :  { %v4576_v47 = vadd.f32 %v4575_v34, %v4560_v48  ;;  %v4577_v32 = vadd.f32 %v4574_v46, %v4569_v27  ;;  %v7036_v48 = vld [vmem:[%s9684_s13 + $0xb0] sm:$0xff]   ;;  %v7038_v27 = vld [vmem:[%s9684_s13 + $0xb8] sm:$0xff]  }
 0xd51   :  { %v4623_v15 = vpop.permute.xlu1 %4622  ;;  %6271 = vmatpush3.bf16.msra.mxu1 %v7036_v48 }
 0xd52   :  { %4578 = vrot.lane.b32.xlu1 %v4576_v47, %s7083_s18  ;;  %4580 = vrot.lane.b32.xlu0 %v4577_v32, %s7083_s18  ;;  %v4625_v25 = vpop.permute.xlu0 %4624 }
 0xd53   :  { %v4626_v31 = vsel %vm656_vm2, %v4623_v15, %v4625_v25  ;;  %v4627_v18 = vsel %vm656_vm2, %v4625_v25, %v4623_v15  ;;  %6272 = vmatprep.subr.bf16.mxu1 %v7037_v19 }
 0xd54   :  { %v4628_v50 = vadd.f32 %v4627_v18, %v4612_v3  ;;  %v4629_v52 = vadd.f32 %v4626_v31, %v4621_v26 }
 0xd55   :  { %6273 = vmatpush3.bf16.msra.mxu1 %v7038_v27 }
 0xd56   :  { %4630 = vrot.lane.b32.xlu1 %v4628_v50, %s7083_s18  ;;  %4632 = vrot.lane.b32.xlu0 %v4629_v52, %s7083_s18 }
 0xd57   :  { %6286 = vmatprep.subr.bf16.mxu1 %v7039_v8 }
 0xdc4   :  { %v4579_v6 = vpop.permute.xlu1 %4578  ;;  %v4581_v5 = vpop.permute.xlu0 %4580 }
 0xdc5   :  { %v4582_v42 = vsel %vm665_vm3, %v4579_v6, %v4581_v5  ;;  %v4583_v4 = vsel %vm665_vm3, %v4581_v5, %v4579_v6 }
 0xdc6   :  { %v4584_v23 = vadd.f32 %v4583_v4, %v4576_v47  ;;  %v4585_v13 = vadd.f32 %v4582_v42, %v4577_v32 }
 0xdc8   :  { %v4631_v44 = vpop.permute.xlu1 %4630  ;;  %4586 = vrot.lane.b32.xlu1 %v4584_v23, %s7084_s19  ;;  %4588 = vrot.lane.b32.xlu0 %v4585_v13, %s7084_s19  ;;  %v4633_v54 = vpop.permute.xlu0 %4632 }
 0xdc9   :  { %v4634_v29 = vsel %vm665_vm3, %v4631_v44, %v4633_v54  ;;  %v4635_v59 = vsel %vm665_vm3, %v4633_v54, %v4631_v44 }
 0xdca   :  { %v4636_v9 = vadd.f32 %v4635_v59, %v4628_v50  ;;  %v4637_v14 = vadd.f32 %v4634_v29, %v4629_v52  ;;  %v6144_v59 = vld [vmem:[%s9682_s11 + $0x4] sm:$0x3] }
 0xdcc   :  { %4638 = vrot.lane.b32.xlu1 %v4636_v9, %s7084_s19  ;;  %4640 = vrot.lane.b32.xlu0 %v4637_v14, %s7084_s19 }
 0xe3a   :  { %v4587_v3 = vpop.permute.xlu1 %4586  ;;  %v4589_v26 = vpop.permute.xlu0 %4588 }
 0xe3b   :  { %v4590_v11 = vsel %vm674_vm4, %v4587_v3, %v4589_v26  ;;  %v4591_v60 = vsel %vm674_vm4, %v4589_v26, %v4587_v3 }
 0xe3c   :  { %v4592_v46 = vadd.f32 %v4591_v60, %v4584_v23  ;;  %v4593_v34 = vadd.f32 %v4590_v11, %v4585_v13 }
 0xe3e   :  { %v4594_v47 = vadd.f32 %v4593_v34, %v4592_v46  ;;  %v4639_v32 = vpop.permute.xlu1 %4638  ;;  %v4641_v15 = vpop.permute.xlu0 %4640  ;;  %v6145_v46 = vld [vmem:[%s9683_s12 + $0x4] sm:$0x3] }
 0xe3f   :  { %v4642_v25 = vsel %vm674_vm4, %v4639_v32, %v4641_v15  ;;  %v4643_v31 = vsel %vm674_vm4, %v4641_v15, %v4639_v32 }
 0xe40   :  { %v4595_v18 = vmul.f32 0.001953125, %v4594_v47  ;;  %v4644_v50 = vadd.f32 %v4643_v31, %v4636_v9  ;;  %v4645_v52 = vadd.f32 %v4642_v25, %v4637_v14  ;;  %v115_v9 = vrot.slane %v7080_v58, %v7634_v63 }
 0xe41   :  { %v119_v14 = vrot.slane %v7080_v58, %v7637_v0 }
 0xe42   :  { %v4646_v6 = vadd.f32 %v4645_v52, %v4644_v50  ;;  %v4648_v5 = vmul.f32 %v4595_v18, %v4595_v18  ;;  %v463_v53 = vadd.f32 %v9695_v30, %v115_v9  ;;  %v9697_v52 = vld [vmem:[#allocation3_spill] sm:$0xff] }
 0xe43   :  { %v465_v41 = vadd.f32 %v9696_v49, %v119_v14 }
 0xe44   :  { %v4647_v42 = vmul.f32 0.001953125, %v4646_v6 }
 0xe46   :  { %v4649_v4 = vsub.f32 %v4647_v42, %v4648_v5 }
 0xe48   :  { %v4650_v44 = vmax.f32 %v4649_v4, 0.0 }
 0xe4a   :  { %v4651_v54 = vadd.f32 1e-05, %v4650_v44 }
 0xe4c   :  { %7077 = vrsqrt.f32 %v4651_v54 }
 0xe56   :  { %v7078_v23 = vpop.eup %7077 }
 0xe57   :  { %v4656_v13 = vcombine.low %v7078_v23, %v7078_v23 }
 0xe59   :  { %v4663_v29 = vrot.slane %v4656_v13, %v7626_v57 }
 0xe5b   :  { %v4670_v17 = vrot.slane %v4663_v29, %v7626_v57 }
 0xe5d   :  { %v4672_v40 = vmul.f32 %v6144_v59, %v4670_v17 }
 0xe5f   :  { %v4679_v39 = vrot.slane %v4672_v40, %v7634_v63  ;;  %v4683_v43 = vrot.slane %v4672_v40, %v7637_v0 }
 0xe61   :  { %v4686_v10 = vmul.f32 %v4679_v39, %v4595_v18  ;;  %v4687_v22 = vmul.f32 %v4683_v43, %v4595_v18  ;;  %v4707_v55 = vmul.f32 %v4679_v39, %v463_v53  ;;  %v4708_v37 = vmul.f32 %v4683_v43, %v465_v41 }
 0xe63   :  { %v4690_v21 = vcombine.low %v4686_v10, %v4687_v22  ;;  %v4712_v48 = vrot.slane %v4707_v55, %v7634_v63  ;;  %v4720_v19 = vrot.slane %v4707_v55, %v7637_v0  ;;  %v4716_v27 = vrot.slane %v4708_v37, %v7634_v63 }
 0xe64   :  { %v4724_v8 = vrot.slane %v4708_v37, %v7637_v0 }
 0xe65   :  { %v4697_v3 = vrot.slane %v4690_v21, %v7626_v57  ;;  %v4756_v26 = vmul.f32 %v4712_v48, %v9286_v56  ;;  %v4758_v11 = vmul.f32 %v4712_v48, %v9290_v45  ;;  %v4760_v60 = vmul.f32 %v4720_v19, %v9306_v20 }
 0xe66   :  { %v4757_v34 = vmul.f32 %v4716_v27, %v9288_v35  ;;  %v4759_v47 = vmul.f32 %v4716_v27, %v9298_v61  ;;  %v4761_v32 = vmul.f32 %v4724_v8, %v9311_v16  ;;  %v4763_v15 = vmul.f32 %v4724_v8, %v9321_v28  ;;  %v9698_v35 = vld [vmem:[#allocation2_spill] sm:$0xff] }
 0xe67   :  { %v4704_v25 = vrot.slane %v4697_v3, %v7626_v57  ;;  %v4762_v56 = vmul.f32 %v4720_v19, %v9316_v51  ;;  %v7040_v3 = vld [vmem:[%s9684_s13] sm:$0xff]  }
 0xe69   :  { %v4706_v31 = vsub.f32 %v6145_v46, %v4704_v25  ;;  %v7041_v46 = vld [vmem:[%s9684_s13 + $0x48] sm:$0xff]  }
 0xe6b   :  { %v4729_v45 = vrot.slane %v4706_v31, %v7634_v63  ;;  %v4733_v20 = vrot.slane %v4706_v31, %v7637_v0 }
 0xe6d   :  { %v4737_v18 = vmul.f32 %v4733_v20, %v465_v41  ;;  %v4736_v50 = vmul.f32 %v4729_v45, %v463_v53 }
 0xe6f   :  { %v4739_v6 = vadd.f32 %v4737_v18, %v9697_v52  ;;  %v4738_v5 = vadd.f32 %v4736_v50, %v9698_v35  ;;  %v7042_v50 = vld [vmem:[%s9684_s13 + $0x8] sm:$0xff]  }
 0xe71   :  { %v4747_v61 = vrot.slane %v4739_v6, %v7634_v63  ;;  %v4755_v16 = vrot.slane %v4739_v6, %v7637_v0  ;;  %v4743_v28 = vrot.slane %v4738_v5, %v7634_v63  ;;  %v4751_v57 = vrot.slane %v4738_v5, %v7637_v0 }
 0xe73   :  { %v4765_v51 = vadd.f32 %v4757_v34, %v4747_v61  ;;  %v4767_v42 = vadd.f32 %v4759_v47, %v4747_v61  ;;  %v4769_v4 = vadd.f32 %v4761_v32, %v4755_v16  ;;  %v4764_v44 = vadd.f32 %v4756_v26, %v4743_v28  ;;  %v7043_v61 = vld [vmem:[%s9684_s13 + $0x50] sm:$0xff]  }
 0xe74   :  { %v4766_v54 = vadd.f32 %v4758_v11, %v4743_v28  ;;  %v4768_v23 = vadd.f32 %v4760_v60, %v4751_v57  ;;  %v4771_v13 = vadd.f32 %v4763_v15, %v4755_v16  ;;  %v4770_v29 = vadd.f32 %v4762_v56, %v4751_v57 }
 0xe75   :  { %v4773_v59 = vmax.f32 %v4765_v51, 0.0  ;;  %v4775_v58 = vmax.f32 %v4767_v42, 0.0  ;;  %v4777_v9 = vmax.f32 %v4769_v4, 0.0  ;;  %v4772_v14 = vmax.f32 %v4764_v44, 0.0 }
 0xe76   :  { %v4774_v17 = vmax.f32 %v4766_v54, 0.0  ;;  %v4776_v40 = vmax.f32 %v4768_v23, 0.0  ;;  %v4779_v30 = vmax.f32 %v4771_v13, 0.0  ;;  %v4778_v53 = vmax.f32 %v4770_v29, 0.0  ;;  %v7044_v29 = vld [vmem:[%s9684_s13 + $0x10] sm:$0xff]  }
 0xe77   :  { %v9454_v63 = vadd.f32 %v4773_v59, %v8995_v36  ;;  %v9457_v0 = vadd.f32 %v4775_v58, %v8997_v62  ;;  %v9460_v49 = vadd.f32 %v4777_v9, %v9021_v12  ;;  %v9463_v41 = vadd.f32 %v4772_v14, %v8999_v1  ;;  %v7045_v9 = vld [vmem:[%s9684_s13 + $0x58] sm:$0xff]   ;;  %v7047_v14 = vld [vmem:[%s9684_s13 + $0x60] sm:$0xff]  }
 0xe78   :  { %v9466_v39 = vadd.f32 %v4774_v17, %v8993_v33  ;;  %v9469_v43 = vadd.f32 %v4776_v40, %v9025_v24  ;;  %v9472_v10 = vadd.f32 %v4779_v30, %v9023_v7  ;;  %v9475_v36 = vadd.f32 %v4778_v53, %v9015_v2  ;;  %v7048_v17 = vld [vmem:[%s9684_s13 + $0x20] sm:$0xff]   ;;  %v7049_v40 = vld [vmem:[%s9684_s13 + $0x68] sm:$0xff]   ;;  %v7051_v53 = vld [vmem:[%s9684_s13 + $0x70] sm:$0xff]  }
 0xe79   :  { %v4825_v62 = vrot.slane %v9454_v63, 1  ;;  %v4827_v12 = vrot.slane %v9457_v0, 1  ;;  %v4829_v22 = vrot.slane %v9460_v49, 1  ;;  %v4824_v1 = vrot.slane %v9463_v41, 1  ;;  %v7050_v30 = vld [vmem:[%s9684_s13 + $0x28] sm:$0xff]  }
 0xe7a   :  { %v4826_v33 = vrot.slane %v9466_v39, 1  ;;  %v4828_v55 = vrot.slane %v9469_v43, 1  ;;  %v4831_v24 = vrot.slane %v9472_v10, 1  ;;  %v4830_v7 = vrot.slane %v9475_v36, 1 }
 0xe7b   :  { %v4835_v2 = vsel %vm1644_vm6, %v4827_v12, %v4829_v22  ;;  %v4837_v37 = vsel %vm1644_vm6, %v4825_v62, %v4827_v12  ;;  %v4789_v21 = vpack.c.bf16 %v9457_v0, %v9454_v63  ;;  %v4788_v48 = vpack.c.bf16 %v9466_v39, %v9463_v41  ;;  %v7057_v12 = vld [vmem:[%s9684_s13 + $0x148] sm:$0xff]  }
 0xe7c   :  { %v4841_v19 = vpack.c.bf16 %v4835_v2, %v4837_v37  ;;  %v4834_v27 = vsel %vm1644_vm6, %v4826_v33, %v4828_v55  ;;  %v4836_v8 = vsel %vm1644_vm6, %v4824_v1, %v4826_v33  ;;  %v4833_v26 = vsel %vm1644_vm6, %v4829_v22, %v4831_v24  ;;  %v7058_v22 = vld [vmem:[%s9684_s13 + $0x108] sm:$0xff]   ;;  %v7060_v33 = vld [vmem:[%s9684_s13 + $0x110] sm:$0xff]   ;;  %v7069_v37 = vld [vmem:[%s9684_s13 + $0x178] sm:$0xff]  }
 0xe7d   :  { %v4840_v11 = vpack.c.bf16 %v4834_v27, %v4836_v8  ;;  %v4839_v60 = vsel %vm1644_vm6, %v4831_v24, %v4825_v62  ;;  %v4832_v34 = vsel %vm1644_vm6, %v4828_v55, %v4830_v7  ;;  %v4838_v47 = vsel %vm1644_vm6, %v4830_v7, %v4824_v1  ;;  %v7056_v62 = vld [vmem:[%s9684_s13 + $0x100] sm:$0xff]   ;;  %v7059_v1 = vld [vmem:[%s9684_s13 + $0x150] sm:$0xff]  }
 0xe7e   :  { %5005 = vmatprep.mubr.bf16.mxu1 %v4841_v19  ;;  %v4843_v32 = vpack.c.bf16 %v4839_v60, %v4833_v26  ;;  %v4842_v15 = vpack.c.bf16 %v4838_v47, %v4832_v34  ;;  %v4791_v25 = vpack.c.bf16 %v9472_v10, %v9460_v49  ;;  %v4790_v56 = vpack.c.bf16 %v9475_v36, %v9469_v43  ;;  %v7063_v55 = vld [vmem:[%s9684_s13 + $0x160] sm:$0xff]   ;;  %v7067_v7 = vld [vmem:[%s9684_s13 + $0x170] sm:$0xff]  }
 0xe7f   :  { %5006 = vmatmul.mubr.bf16.vlgmr.msra.gmra.mrb[48].mxu1 %v4840_v11  ;;  %v5168_v31 = vrot.slane %v9454_v63, 2  ;;  %v5170_v45 = vrot.slane %v9457_v0, 2  ;;  %v5172_v20 = vrot.slane %v9460_v49, 2  ;;  %v5167_v18 = vrot.slane %v9463_v41, 2  ;;  %v7052_v63 = vld [vmem:[%s9684_s13 + $0x30] sm:$0xff]   ;;  %v7053_v0 = vld [vmem:[%s9684_s13 + $0x78] sm:$0xff]  }
 0xe80   :  { %6287 = vmatpush3.bf16.msra.mxu1 %v7040_v3  ;;  %5013 = vmatprep.mubr.bf16.mxu1 %v4843_v32  ;;  %v5169_v52 = vrot.slane %v9466_v39, 2  ;;  %v5171_v6 = vrot.slane %v9469_v43, 2  ;;  %v5174_v35 = vrot.slane %v9472_v10, 2  ;;  %v5173_v5 = vrot.slane %v9475_v36, 2  ;;  %v7054_v49 = vld [vmem:[%s9684_s13 + $0x38] sm:$0xff]   ;;  %v7055_v10 = vld [vmem:[%s9684_s13 + $0x140] sm:$0xff]  }
 0xe81   :  { %6288 = vmatprep.subr.bf16.mxu1 %v7041_v46  ;;  %v5179_v16 = vsel %vm5175_vm7, %v5170_v45, %v5172_v20  ;;  %v5181_v28 = vsel %vm5175_vm7, %v5168_v31, %v5170_v45  ;;  %v7061_v41 = vld [vmem:[%s9684_s13 + $0x158] sm:$0xff]   ;;  %v7064_v24 = vld [vmem:[%s9684_s13 + $0x120] sm:$0xff]   ;;  %v7065_v43 = vld [vmem:[%s9684_s13 + $0x168] sm:$0xff]  }
 0xe82   :  { %v5185_v57 = vpack.c.bf16 %v5179_v16, %v5181_v28  ;;  %v9535_v51 = vsel %vm5175_vm7, %v5169_v52, %v5171_v6  ;;  %v9539_v42 = vsel %vm5175_vm7, %v5167_v18, %v5169_v52  ;;  %v9543_v4 = vsel %vm5175_vm7, %v5172_v20, %v5174_v35  ;;  %v7062_v39 = vld [vmem:[%s9684_s13 + $0x118] sm:$0xff]   ;;  %v7066_v36 = vld [vmem:[%s9684_s13 + $0x128] sm:$0xff]   ;;  %v7068_v2 = vld [vmem:[%s9684_s13 + $0x130] sm:$0xff]  }
 0xe83   :  { %v5184_v44 = vpack.c.bf16 %v9535_v51, %v9539_v42  ;;  %v9549_v54 = vsel %vm5175_vm7, %v5174_v35, %v5168_v31  ;;  %v9553_v23 = vsel %vm5175_vm7, %v5171_v6, %v5173_v5  ;;  %v9557_v13 = vsel %vm5175_vm7, %v5173_v5, %v5167_v18 }
 0xe84   :  { %6289 = vmatpush3.bf16.msra.mxu1 %v7042_v50  ;;  %v5187_v59 = vpack.c.bf16 %v9549_v54, %v9543_v4  ;;  %v5186_v58 = vpack.c.bf16 %v9557_v13, %v9553_v23  ;;  %v5370_v54 = vld [vmem:[%s9685_s14] sm:$0xff] }
 0xe85   :  { %6290 = vmatprep.subr.bf16.mxu1 %v7043_v61 }
 0xe87   :  { %5014 = vmatmul.mubr.bf16.gmra.mrb[52].mxu1 %v4842_v15 }
 0xe88   :  { %6291 = vmatpush3.bf16.msra.mxu1 %v7044_v29  ;;  %5150 = vmatprep.mubr.bf16.mxu1 %v4789_v21  ;;  %v7070_v21 = vld [vmem:[%s9684_s13 + $0x138] sm:$0xff]  }
 0xe89   :  { %6292 = vmatprep.subr.bf16.mxu1 %v7045_v9 }
 0xe8c   :  { %6293 = vmatpush3.bf16.msra.mxu1 %v7046_v38 }
 0xe8d   :  { %6294 = vmatprep.subr.bf16.mxu1 %v7047_v14 }
 0xe90   :  { %6295 = vmatpush3.bf16.msra.mxu1 %v7048_v17 }
 0xe91   :  { %6296 = vmatprep.subr.bf16.mxu1 %v7049_v40 }
 0xe94   :  { %6297 = vmatpush3.bf16.msra.mxu1 %v7050_v30 }
 0xe95   :  { %6298 = vmatprep.subr.bf16.mxu1 %v7051_v53 }
 0xe98   :  { %6299 = vmatpush3.bf16.msra.mxu1 %v7052_v63 }
 0xe99   :  { %6300 = vmatprep.subr.bf16.mxu1 %v7053_v0 }
 0xe9c   :  { %6301 = vmatpush3.bf16.msra.mxu1 %v7054_v49 }
 0xe9d   :  { %6314 = vmatprep.subr.bf16.mxu1 %v7055_v10 }
 0xe9f   :  { %5151 = vmatmul.mubr.bf16.vlgmr.msra.gmra.mrb[56].mxu1 %v4788_v48 }
 0xea0   :  { %5158 = vmatprep.mubr.bf16.mxu1 %v4791_v25  ;;  %6315 = vmatpush3.bf16.msra.mxu1 %v7056_v62 }
 0xea1   :  { %6316 = vmatprep.subr.bf16.mxu1 %v7057_v12 }
 0xea4   :  { %6317 = vmatpush3.bf16.msra.mxu1 %v7058_v22 }
 0xea5   :  { %6318 = vmatprep.subr.bf16.mxu1 %v7059_v1 }
 0xea7   :  { %5159 = vmatmul.mubr.bf16.gmra.mrb[60].mxu1 %v4790_v56 }
 0xea8   :  { %6319 = vmatpush3.bf16.msra.mxu1 %v7060_v33  ;;  %5349 = vmatprep.mubr.bf16.mxu1 %v5185_v57 }
 0xea9   :  { %6320 = vmatprep.subr.bf16.mxu1 %v7061_v41 }
 0xeac   :  { %6321 = vmatpush3.bf16.msra.mxu1 %v7062_v39 }
 0xead   :  { %6322 = vmatprep.subr.bf16.mxu1 %v7063_v55 }
 0xeb0   :  { %6323 = vmatpush3.bf16.msra.mxu1 %v7064_v24 }
 0xeb1   :  { %6324 = vmatprep.subr.bf16.mxu1 %v7065_v43 }
 0xeb4   :  { %6325 = vmatpush3.bf16.msra.mxu1 %v7066_v36 }
 0xeb5   :  { %6326 = vmatprep.subr.bf16.mxu1 %v7067_v7 }
 0xeb8   :  { %6327 = vmatpush3.bf16.msra.mxu1 %v7068_v2 }
 0xeb9   :  { %6328 = vmatprep.subr.bf16.mxu1 %v7069_v37 }
 0xebc   :  { %6329 = vmatpush3.bf16.msra.mxu1 %v7070_v21 }
 0xebf   :  { %5350 = vmatmul.mubr.bf16.vlgmr.msra.gmra.mrb[64].mxu1 %v5184_v44 }
 0xec0   :  { %5357 = vmatprep.mubr.bf16.mxu1 %v5187_v59  ;;  %v5371_v59 = vld [vmem:[%s9685_s14 + $0x8] sm:$0xff] }
 0xec7   :  { %5358 = vmatmul.mubr.bf16.gmra.mrb[68].mxu1 %v5186_v58 }
 0xf52   :  { %v6274_v48 = vpop.f32.mrb[48].mxu1 }
 0xf53   :  { %v6275_v19 = vpop.f32.mrb[49].mxu1 }
 0xf54   :  { %v6276_v27 = vadd.f32 %v6275_v19, %v6274_v48  ;;  %v6277_v8 = vpop.f32.mrb[50].mxu1 }
 0xf55   :  { %v6278_v3 = vpop.f32.mrb[51].mxu1 }
 0xf56   :  { %v6279_v26 = vadd.f32 %v6278_v3, %v6277_v8 }
 0xf5a   :  { %v6280_v11 = vpop.f32.mrb[52].mxu1 }
 0xf5b   :  { %v6281_v60 = vpop.f32.mrb[53].mxu1 }
 0xf5c   :  { %v6282_v46 = vadd.f32 %v6281_v60, %v6280_v11  ;;  %v6283_v34 = vpop.f32.mrb[54].mxu1 }
 0xf5d   :  { %v6284_v47 = vpop.f32.mrb[55].mxu1 }
 0xf5e   :  { %v6285_v32 = vadd.f32 %v6284_v47, %v6283_v34 }
 0xf72   :  { %v6302_v15 = vpop.f32.mrb[56].mxu1 }
 0xf73   :  { %v6303_v25 = vpop.f32.mrb[57].mxu1 }
 0xf74   :  { %v6304_v56 = vadd.f32 %v6303_v25, %v6302_v15  ;;  %v6305_v31 = vpop.f32.mrb[58].mxu1 }
 0xf75   :  { %v6306_v45 = vpop.f32.mrb[59].mxu1 }
 0xf76   :  { %v5153_v20 = vadd.f32 %v6304_v56, %v6276_v27  ;;  %v6307_v18 = vadd.f32 %v6306_v45, %v6305_v31 }
 0xf78   :  { %v5156_v50 = vadd.f32 %v6307_v18, %v6279_v26 }
 0xf7a   :  { %v6308_v52 = vpop.f32.mrb[60].mxu1 }
 0xf7b   :  { %v6309_v6 = vpop.f32.mrb[61].mxu1 }
 0xf7c   :  { %v6310_v35 = vadd.f32 %v6309_v6, %v6308_v52  ;;  %v6311_v5 = vpop.f32.mrb[62].mxu1 }
 0xf7d   :  { %v6312_v61 = vpop.f32.mrb[63].mxu1 }
 0xf7e   :  { %v5161_v16 = vadd.f32 %v6310_v35, %v6282_v46  ;;  %v6313_v28 = vadd.f32 %v6312_v61, %v6311_v5 }
 0xf80   :  { %v5164_v57 = vadd.f32 %v6313_v28, %v6285_v32 }
 0xf92   :  { %v6330_v51 = vpop.f32.mrb[64].mxu1 }
 0xf93   :  { %v6331_v42 = vpop.f32.mrb[65].mxu1 }
 0xf94   :  { %v6332_v4 = vadd.f32 %v6331_v42, %v6330_v51  ;;  %v6333_v44 = vpop.f32.mrb[66].mxu1 }
 0xf95   :  { %v6334_v23 = vpop.f32.mrb[67].mxu1 }
 0xf96   :  { %v5366_v13 = vadd.f32 %v6332_v4, %v5153_v20  ;;  %v6335_v29 = vadd.f32 %v6334_v23, %v6333_v44 }
 0xf98   :  { %v5372_v58 = vadd.f32 %v5370_v54, %v5366_v13  ;;  %v5367_v9 = vadd.f32 %v6335_v29, %v5156_v50 }
 0xf9a   :  { %5376 = vst [vmem:[%s9686_s15] sm:$0xff] %v5372_v58  ;;  %v5373_v38 = vadd.f32 %v5371_v59, %v5367_v9  ;;  %v6336_v14 = vpop.f32.mrb[68].mxu1 }
 0xf9b   :  { %v6337_v17 = vpop.f32.mrb[69].mxu1 }
 0xf9c   :  { %5377 = vst [vmem:[%s9686_s15 + $0x8] sm:$0xff] %v5373_v38  ;;  %v6338_v40 = vadd.f32 %v6337_v17, %v6336_v14  ;;  %v6339_v30 = vpop.f32.mrb[70].mxu1 }
 0xf9d   :  { %v6340_v53 = vpop.f32.mrb[71].mxu1 }
 0xf9e   :  { %v5368_v63 = vadd.f32 %v6338_v40, %v5161_v16  ;;  %v6341_v0 = vadd.f32 %v6340_v53, %v6339_v30 }
 0xfa0   :  { %v5374_v49 = vadd.f32 %v5370_v54, %v5368_v63  ;;  %v5369_v10 = vadd.f32 %v6341_v0, %v5164_v57 }
 0xfa2   :  { %5378 = vst [vmem:[%s9686_s15 + $0x10] sm:$0xff] %v5374_v49  ;;  %v5375_v62 = vadd.f32 %v5371_v59, %v5369_v10 }
 0xfa4   :  { %5379 = vst [vmem:[%s9686_s15 + $0x18] sm:$0xff] %v5375_v62 }

</bundles_post_ra>
